<compile_context>
chip_gen: v7x
topology: tpu7x:2x2x1
jax: 0.10.0
libtpu: 0.0.40
codegen_flags: <defaults>
</compile_context>

<pallas_src>
import functools

import jax
import jax.numpy as jnp
from jax import lax
from jax.experimental import pallas as pl
from jax.experimental.pallas import tpu as pltpu


def _pick_tile(n, target, multiple):
    """Largest t <= target with t % multiple == 0 and n % t == 0, else n (full dim)."""
    if n <= target:
        return n
    t = (min(target, n) // multiple) * multiple
    while t >= multiple:
        if n % t == 0:
            return t
        t -= multiple
    return n


# -----------------------------------------------------------------------------
# Kernel 1: linear layer  y = x @ W + b   (bf16 MXU, f32 accumulate)
# Weight block is the full (K, Dout) matrix with a constant index_map, so it is
# DMA'd once and stays resident in VMEM across all M tiles.
# -----------------------------------------------------------------------------
def _linear_kernel(x_ref, w_ref, b_ref, o_ref):
    x = x_ref[...].astype(jnp.bfloat16)
    w = w_ref[...].astype(jnp.bfloat16)      # no-op: weights pre-cast to bf16
    acc = jnp.dot(x, w, preferred_element_type=jnp.float32)
    o_ref[...] = (acc + b_ref[...]).astype(o_ref.dtype)


def linear(x2d, w, b, *, out_dtype=None, tm=512):
    """x2d: (M, K), w: (K, Dout) bf16, b: (Dout,) f32 -> (M, Dout) in out_dtype."""
    M, K = x2d.shape
    Dout = w.shape[1]
    out_dtype = out_dtype or x2d.dtype
    tm = _pick_tile(M, tm, 16)               # sublane tile (bf16-friendly)
    b2d = b.reshape(1, Dout).astype(jnp.float32)
    return pl.pallas_call(
        _linear_kernel,
        out_shape=jax.ShapeDtypeStruct((M, Dout), out_dtype),
        grid_spec=pltpu.PrefetchScalarGridSpec(
            num_scalar_prefetch=0,
            grid=(M // tm,),
            in_specs=[
                pl.BlockSpec((tm, K), lambda i: (i, 0)),
                pl.BlockSpec((K, Dout), lambda i: (0, 0)),   # resident weight
                pl.BlockSpec((1, Dout), lambda i: (0, 0)),
            ],
            out_specs=pl.BlockSpec((tm, Dout), lambda i: (i, 0)),
        ),
        compiler_params=pltpu.CompilerParams(dimension_semantics=("parallel",)),
    )(x2d, w, b2d)


# -----------------------------------------------------------------------------
# Kernel 2: attention, one (batch, head) per grid row, K/V resident in VMEM
# -----------------------------------------------------------------------------
def _attn_kernel(q_ref, k_ref, v_ref, o_ref):
    # q_ref: (tq, hd) bf16 -- softmax scale already folded into the qkv weights.
    # k_ref, v_ref: (N, hd) bf16, VMEM-resident per (batch, head).
    s = lax.dot_general(
        q_ref[...], k_ref[...],
        dimension_numbers=(((1,), (1,)), ((), ())),      # contract head_dim, no k.T
        preferred_element_type=jnp.float32)              # (tq, N) f32
    m = jnp.max(s, axis=-1, keepdims=True)
    p = jnp.exp(s - m)                                   # f32 exp (safe on v5e)
    l = jnp.sum(p, axis=-1, keepdims=True)
    acc = jnp.dot(p.astype(jnp.bfloat16), v_ref[...],
                  preferred_element_type=jnp.float32)    # (tq, hd) f32
    o_ref[...] = (acc / l).astype(o_ref.dtype)           # exact normalization


def attention_core(q, k, v, *, tq=256, out_dtype=None):
    """q, k, v: (B, H, N, hd) -> attention output (B, H, N, hd)."""
    B, H, N, hd = q.shape
    out_dtype = out_dtype or q.dtype
    tq = _pick_tile(N, tq, 16)

    # TODO(synk): for very large N the full-N K/V + (tq, N) f32 scores may not
    # fit VMEM; would need a kv grid axis with online softmax + masked tiles.
    q_spec = pl.BlockSpec((None, None, tq, hd), lambda b, h, qi: (b, h, qi, 0))
    kv_spec = pl.BlockSpec((None, None, N, hd), lambda b, h, qi: (b, h, 0, 0))
    o_spec = pl.BlockSpec((None, None, tq, hd), lambda b, h, qi: (b, h, qi, 0))

    return pl.pallas_call(
        _attn_kernel,
        out_shape=jax.ShapeDtypeStruct((B, H, N, hd), out_dtype),
        grid_spec=pltpu.PrefetchScalarGridSpec(
            num_scalar_prefetch=0,
            grid=(B, H, N // tq),
            in_specs=[q_spec, kv_spec, kv_spec],
            out_specs=o_spec,
        ),
        compiler_params=pltpu.CompilerParams(
            dimension_semantics=("parallel", "parallel", "parallel")),
    )(q, k, v)


# -----------------------------------------------------------------------------
# One-time parameter prep: fold the softmax scale into the q projection and
# pre-cast weights to bf16 (the MXU consumes bf16; halves weight HBM bytes).
# -----------------------------------------------------------------------------
def prepare_params(params, *, num_heads):
    w_qkv = jnp.asarray(params["w_qkv"], jnp.float32)    # (C, 3*all_head_dim)
    b_qkv = jnp.asarray(params["b_qkv"], jnp.float32)    # (3*all_head_dim,)
    all_head_dim = w_qkv.shape[1] // 3
    head_dim = all_head_dim // num_heads
    scale = head_dim ** (-0.5)
    col_scale = jnp.concatenate(
        [jnp.full((all_head_dim,), scale, jnp.float32),
         jnp.ones((2 * all_head_dim,), jnp.float32)])
    return {
        "w_qkv": (w_qkv * col_scale[None, :]).astype(jnp.bfloat16),
        "b_qkv": b_qkv * col_scale,
        "w_proj": jnp.asarray(params["w_proj"], jnp.float32).astype(jnp.bfloat16),
        "b_proj": jnp.asarray(params["b_proj"], jnp.float32),
    }


# -----------------------------------------------------------------------------
# Full module forward (attn_type='origin', dropout p=0 => identity in eval)
# -----------------------------------------------------------------------------
def attention_forward(x, prep, *, num_heads, tq=256, tm=512):
    B, N, C = x.shape
    all_head_dim = prep["w_qkv"].shape[1] // 3
    head_dim = all_head_dim // num_heads

    # qkv projection (resident bf16 weight); bf16 activations for attention.
    qkv = linear(x.reshape(B * N, C), prep["w_qkv"], prep["b_qkv"],
                 out_dtype=jnp.bfloat16, tm=tm)
    qkv = qkv.reshape(B, N, 3, num_heads, head_dim)
    qkv = jnp.transpose(qkv, (2, 0, 3, 1, 4))            # (3, B, H, N, hd)
    q, k, v = qkv[0], qkv[1], qkv[2]

    # Attention: heads on the grid, K/V resident across q tiles.
    attn = attention_core(q, k, v, tq=tq, out_dtype=jnp.bfloat16)   # (B,H,N,hd)
    attn = jnp.transpose(attn, (0, 2, 1, 3)).reshape(B * N, all_head_dim)

    # Output projection back to the input dtype.
    y = linear(attn, prep["w_proj"], prep["b_proj"], out_dtype=x.dtype, tm=tm)
    # TODO(synk): attn_drop / proj_drop are identity here (eval mode, p=0.0);
    # flash_v2 / xformer branches are math-equivalent and not separately implemented.
    # TODO(synk): ragged N (no multiple-of-16 tile dividing N) falls back to a
    # full-N q tile instead of masked partial tiles.
    return y.reshape(B, N, C)


# -----------------------------------------------------------------------------
# Reference in plain JAX (f32) for a correctness check
# -----------------------------------------------------------------------------
def attention_reference(x, params, *, num_heads):
    B, N, C = x.shape
    all_head_dim = params["w_qkv"].shape[1] // 3
    head_dim = all_head_dim // num_heads
    scale = head_dim ** (-0.5)
    qkv = x @ params["w_qkv"] + params["b_qkv"]
    qkv = qkv.reshape(B, N, 3, num_heads, head_dim)
    qkv = jnp.transpose(qkv, (2, 0, 3, 1, 4))
    q, k, v = qkv[0] * scale, qkv[1], qkv[2]
    attn = jnp.einsum("bhqd,bhkd->bhqk", q, k)
    attn = jax.nn.softmax(attn, axis=-1)
    out = jnp.einsum("bhqk,bhkd->bhqd", attn, v)
    out = jnp.transpose(out, (0, 2, 1, 3)).reshape(B, N, all_head_dim)
    return out @ params["w_proj"] + params["b_proj"]


if __name__ == "__main__":
    # Small shapes consistent with the module: B=2, N=512 tokens, dim=128,
    # 2 heads of head_dim=64 (matching real VideoMAE per-head width).
    B, N, C = 2, 512, 128
    num_heads = 2
    head_dim = C // num_heads
    all_head_dim = head_dim * num_heads

    key = jax.random.PRNGKey(0)
    kx, kw1, kw2, kb2 = jax.random.split(key, 4)

    x = jax.random.normal(kx, (B, N, C), dtype=jnp.float32)

    # Deterministic parameter init (qkv_bias=False -> zero qkv bias).
    params = {
        "w_qkv": jax.random.normal(kw1, (C, 3 * all_head_dim), dtype=jnp.float32) * 0.02,
        "b_qkv": jnp.zeros((3 * all_head_dim,), dtype=jnp.float32),
        "w_proj": jax.random.normal(kw2, (all_head_dim, C), dtype=jnp.float32) * 0.02,
        "b_proj": jax.random.normal(kb2, (C,), dtype=jnp.float32) * 0.02,
    }

    prep = prepare_params(params, num_heads=num_heads)
    fwd = jax.jit(functools.partial(attention_forward, num_heads=num_heads,
                                    tq=256, tm=512))
    y = jax.block_until_ready(fwd(x, prep))

    y_ref = attention_reference(x, params, num_heads=num_heads)
    assert y.shape == (B, N, C)
    max_err = float(jnp.max(jnp.abs(y.astype(jnp.float32) - y_ref)))
    assert max_err < 5e-3, f"mismatch vs reference: max abs err {max_err}"

    print("KERNEL_OK")
</pallas_src>

<mosaic_0001>
module attributes {stable_mosaic.version = 11 : i64} {
  func.func @_linear_kernel(%arg0: i32, %arg1: memref<512x128xf32, #tpu.memory_space<vmem>>, %arg2: memref<128x384xbf16, #tpu.memory_space<vmem>>, %arg3: memref<1x384xf32, #tpu.memory_space<vmem>>, %arg4: memref<512x384xbf16, #tpu.memory_space<vmem>>) attributes {dimension_semantics = [#tpu.dimension_semantics<parallel>], iteration_bounds = array<i64: 2>, scalar_prefetch = 0 : i64, scratch_operands = 0 : i64, tpu.core_type = #tpu.core_type<tc>, window_params = [{transform_indices = @transform_0, window_bounds = array<i64: 512, 128>}, {pipeline_mode = #tpu.pipeline_mode<synchronous>, transform_indices = @transform_1, window_bounds = array<i64: 128, 384>}, {pipeline_mode = #tpu.pipeline_mode<synchronous>, transform_indices = @transform_2, window_bounds = array<i64: 1, 384>}, {transform_indices = @transform_3, window_bounds = array<i64: 512, 384>}]} {
    %c0 = arith.constant 0 : index
    %c0_0 = arith.constant 0 : index
    %0 = vector.load %arg1[%c0, %c0_0] : memref<512x128xf32, #tpu.memory_space<vmem>>, vector<512x128xf32>
    %1 = arith.truncf %0 : vector<512x128xf32> to vector<512x128xbf16>
    %c0_1 = arith.constant 0 : index
    %c0_2 = arith.constant 0 : index
    %2 = vector.load %arg2[%c0_1, %c0_2] : memref<128x384xbf16, #tpu.memory_space<vmem>>, vector<128x384xbf16>
    %cst = arith.constant dense<0.000000e+00> : vector<512x384xf32>
    %3 = tpu.matmul %1, %2, %cst {dimension_numbers = #tpu.dot_dimension_numbers<[1], [0], [0], [1], [0, 0, 1, 1], [], []>} : vector<512x128xbf16>, vector<128x384xbf16>, vector<512x384xf32> -> vector<512x384xf32>
    %c0_3 = arith.constant 0 : index
    %c0_4 = arith.constant 0 : index
    %4 = vector.load %arg3[%c0_3, %c0_4] : memref<1x384xf32, #tpu.memory_space<vmem>>, vector<1x384xf32>
    %5 = vector.broadcast %4 : vector<1x384xf32> to vector<512x384xf32>
    %6 = arith.addf %3, %5 : vector<512x384xf32>
    %7 = arith.truncf %6 : vector<512x384xf32> to vector<512x384xbf16>
    %c0_5 = arith.constant 0 : index
    %c0_6 = arith.constant 0 : index
    %8 = vector.load %arg4[%c0_5, %c0_6] : memref<512x384xbf16, #tpu.memory_space<vmem>>, vector<512x384xbf16>
    tpu.vector_store %arg4[%c0_5, %c0_6], %7 {strides = array<i32>} : memref<512x384xbf16, #tpu.memory_space<vmem>>, vector<512x384xbf16>,
    return
  }
  func.func @transform_0(%arg0: i32) -> (i32, i32) {
    %c0_i32 = arith.constant 0 : i32
    %c0_i32_0 = arith.constant 0 : i32
    return %arg0, %c0_i32 : i32, i32
  }
  func.func @transform_1(%arg0: i32) -> (i32, i32) {
    %c0_i32 = arith.constant 0 : i32
    %c0_i32_0 = arith.constant 0 : i32
    %c0_i32_1 = arith.constant 0 : i32
    return %c0_i32, %c0_i32_0 : i32, i32
  }
  func.func @transform_2(%arg0: i32) -> (i32, i32) {
    %c0_i32 = arith.constant 0 : i32
    %c0_i32_0 = arith.constant 0 : i32
    %c0_i32_1 = arith.constant 0 : i32
    return %c0_i32, %c0_i32_0 : i32, i32
  }
  func.func @transform_3(%arg0: i32) -> (i32, i32) {
    %c0_i32 = arith.constant 0 : i32
    %c0_i32_0 = arith.constant 0 : i32
    return %arg0, %c0_i32 : i32, i32
  }
}

module attributes {stable_mosaic.version = 11 : i64} {
  func.func @_attn_kernel(%arg0: i32, %arg1: i32, %arg2: i32, %arg3: memref<1x1x256x64xbf16, #tpu.memory_space<vmem>>, %arg4: memref<1x1x512x64xbf16, #tpu.memory_space<vmem>>, %arg5: memref<1x1x512x64xbf16, #tpu.memory_space<vmem>>, %arg6: memref<1x1x256x64xbf16, #tpu.memory_space<vmem>>) attributes {dimension_semantics = [#tpu.dimension_semantics<parallel>, #tpu.dimension_semantics<parallel>, #tpu.dimension_semantics<parallel>], iteration_bounds = array<i64: 2, 2, 2>, scalar_prefetch = 0 : i64, scratch_operands = 0 : i64, tpu.core_type = #tpu.core_type<tc>, window_params = [{transform_indices = @transform_0, window_bounds = array<i64: 1, 1, 256, 64>}, {transform_indices = @transform_1, window_bounds = array<i64: 1, 1, 512, 64>}, {transform_indices = @transform_2, window_bounds = array<i64: 1, 1, 512, 64>}, {transform_indices = @transform_3, window_bounds = array<i64: 1, 1, 256, 64>}]} {
    %c0 = arith.constant 0 : index
    %c0_0 = arith.constant 0 : index
    %c0_1 = arith.constant 0 : index
    %c0_2 = arith.constant 0 : index
    %0 = vector.load %arg3[%c0, %c0_0, %c0_1, %c0_2] : memref<1x1x256x64xbf16, #tpu.memory_space<vmem>>, vector<1x1x256x64xbf16>
    %1 = vector.shape_cast %0 : vector<1x1x256x64xbf16> to vector<256x64xbf16>
    %c0_3 = arith.constant 0 : index
    %c0_4 = arith.constant 0 : index
    %c0_5 = arith.constant 0 : index
    %c0_6 = arith.constant 0 : index
    %2 = vector.load %arg4[%c0_3, %c0_4, %c0_5, %c0_6] : memref<1x1x512x64xbf16, #tpu.memory_space<vmem>>, vector<1x1x512x64xbf16>
    %3 = vector.shape_cast %2 : vector<1x1x512x64xbf16> to vector<512x64xbf16>
    %cst = arith.constant dense<0.000000e+00> : vector<256x512xf32>
    %4 = tpu.matmul %1, %3, %cst {dimension_numbers = #tpu.dot_dimension_numbers<[1], [1], [0], [0], [0, 0, 1, 0], [], []>} : vector<256x64xbf16>, vector<512x64xbf16>, vector<256x512xf32> -> vector<256x512xf32>
    %cst_7 = arith.constant dense<0xFF800000> : vector<256xf32>
    %5 = vector.multi_reduction <maximumf>, %4, %cst_7 [1] : vector<256x512xf32> to vector<256xf32>
    %6 = vector.shape_cast %5 : vector<256xf32> to vector<256x1xf32>
    %7 = vector.broadcast %6 : vector<256x1xf32> to vector<256x512xf32>
    %8 = arith.subf %4, %7 : vector<256x512xf32>
    %9 = math.exp %8 : vector<256x512xf32>
    %cst_8 = arith.constant dense<0.000000e+00> : vector<256xf32>
    %10 = vector.multi_reduction <add>, %9, %cst_8 [1] : vector<256x512xf32> to vector<256xf32>
    %11 = vector.shape_cast %10 : vector<256xf32> to vector<256x1xf32>
    %12 = arith.truncf %9 : vector<256x512xf32> to vector<256x512xbf16>
    %c0_9 = arith.constant 0 : index
    %c0_10 = arith.constant 0 : index
    %c0_11 = arith.constant 0 : index
    %c0_12 = arith.constant 0 : index
    %13 = vector.load %arg5[%c0_9, %c0_10, %c0_11, %c0_12] : memref<1x1x512x64xbf16, #tpu.memory_space<vmem>>, vector<1x1x512x64xbf16>
    %14 = vector.shape_cast %13 : vector<1x1x512x64xbf16> to vector<512x64xbf16>
    %cst_13 = arith.constant dense<0.000000e+00> : vector<256x64xf32>
    %15 = tpu.matmul %12, %14, %cst_13 {dimension_numbers = #tpu.dot_dimension_numbers<[1], [0], [0], [1], [0, 0, 1, 1], [], []>} : vector<256x512xbf16>, vector<512x64xbf16>, vector<256x64xf32> -> vector<256x64xf32>
    %16 = vector.broadcast %11 : vector<256x1xf32> to vector<256x64xf32>
    %17 = arith.divf %15, %16 : vector<256x64xf32>
    %18 = arith.truncf %17 : vector<256x64xf32> to vector<256x64xbf16>
    %c0_14 = arith.constant 0 : index
    %c0_15 = arith.constant 0 : index
    %c0_16 = arith.constant 0 : index
    %c0_17 = arith.constant 0 : index
    %19 = vector.load %arg6[%c0_14, %c0_15, %c0_16, %c0_17] : memref<1x1x256x64xbf16, #tpu.memory_space<vmem>>, vector<1x1x256x64xbf16>
    %20 = vector.shape_cast %19 : vector<1x1x256x64xbf16> to vector<256x64xbf16>
    %21 = vector.shape_cast %18 : vector<256x64xbf16> to vector<1x1x256x64xbf16>
    tpu.vector_store %arg6[%c0_14, %c0_15, %c0_16, %c0_17], %21 {strides = array<i32>} : memref<1x1x256x64xbf16, #tpu.memory_space<vmem>>, vector<1x1x256x64xbf16>,
    return
  }
  func.func @transform_0(%arg0: i32, %arg1: i32, %arg2: i32) -> (i32, i32, i32, i32) {
    %c0_i32 = arith.constant 0 : i32
    %c0_i32_0 = arith.constant 0 : i32
    return %arg0, %arg1, %arg2, %c0_i32 : i32, i32, i32, i32
  }
  func.func @transform_1(%arg0: i32, %arg1: i32, %arg2: i32) -> (i32, i32, i32, i32) {
    %c0_i32 = arith.constant 0 : i32
    %c0_i32_0 = arith.constant 0 : i32
    %c0_i32_1 = arith.constant 0 : i32
    return %arg0, %arg1, %c0_i32, %c0_i32_0 : i32, i32, i32, i32
  }
  func.func @transform_2(%arg0: i32, %arg1: i32, %arg2: i32) -> (i32, i32, i32, i32) {
    %c0_i32 = arith.constant 0 : i32
    %c0_i32_0 = arith.constant 0 : i32
    %c0_i32_1 = arith.constant 0 : i32
    return %arg0, %arg1, %c0_i32, %c0_i32_0 : i32, i32, i32, i32
  }
  func.func @transform_3(%arg0: i32, %arg1: i32, %arg2: i32) -> (i32, i32, i32, i32) {
    %c0_i32 = arith.constant 0 : i32
    %c0_i32_0 = arith.constant 0 : i32
    return %arg0, %arg1, %arg2, %c0_i32 : i32, i32, i32, i32
  }
}

module attributes {stable_mosaic.version = 11 : i64} {
  func.func @_linear_kernel(%arg0: i32, %arg1: memref<512x128xbf16, #tpu.memory_space<vmem>>, %arg2: memref<128x128xbf16, #tpu.memory_space<vmem>>, %arg3: memref<1x128xf32, #tpu.memory_space<vmem>>, %arg4: memref<512x128xf32, #tpu.memory_space<vmem>>) attributes {dimension_semantics = [#tpu.dimension_semantics<parallel>], iteration_bounds = array<i64: 2>, scalar_prefetch = 0 : i64, scratch_operands = 0 : i64, tpu.core_type = #tpu.core_type<tc>, window_params = [{transform_indices = @transform_0, window_bounds = array<i64: 512, 128>}, {pipeline_mode = #tpu.pipeline_mode<synchronous>, transform_indices = @transform_1, window_bounds = array<i64: 128, 128>}, {pipeline_mode = #tpu.pipeline_mode<synchronous>, transform_indices = @transform_2, window_bounds = array<i64: 1, 128>}, {transform_indices = @transform_3, window_bounds = array<i64: 512, 128>}]} {
    %c0 = arith.constant 0 : index
    %c0_0 = arith.constant 0 : index
    %0 = vector.load %arg1[%c0, %c0_0] : memref<512x128xbf16, #tpu.memory_space<vmem>>, vector<512x128xbf16>
    %c0_1 = arith.constant 0 : index
    %c0_2 = arith.constant 0 : index
    %1 = vector.load %arg2[%c0_1, %c0_2] : memref<128x128xbf16, #tpu.memory_space<vmem>>, vector<128x128xbf16>
    %cst = arith.constant dense<0.000000e+00> : vector<512x128xf32>
    %2 = tpu.matmul %0, %1, %cst {dimension_numbers = #tpu.dot_dimension_numbers<[1], [0], [0], [1], [0, 0, 1, 1], [], []>} : vector<512x128xbf16>, vector<128x128xbf16>, vector<512x128xf32> -> vector<512x128xf32>
    %c0_3 = arith.constant 0 : index
    %c0_4 = arith.constant 0 : index
    %3 = vector.load %arg3[%c0_3, %c0_4] : memref<1x128xf32, #tpu.memory_space<vmem>>, vector<1x128xf32>
    %4 = vector.broadcast %3 : vector<1x128xf32> to vector<512x128xf32>
    %5 = arith.addf %2, %4 : vector<512x128xf32>
    %c0_5 = arith.constant 0 : index
    %c0_6 = arith.constant 0 : index
    %6 = vector.load %arg4[%c0_5, %c0_6] : memref<512x128xf32, #tpu.memory_space<vmem>>, vector<512x128xf32>
    tpu.vector_store %arg4[%c0_5, %c0_6], %5 {strides = array<i32>} : memref<512x128xf32, #tpu.memory_space<vmem>>, vector<512x128xf32>,
    return
  }
  func.func @transform_0(%arg0: i32) -> (i32, i32) {
    %c0_i32 = arith.constant 0 : i32
    %c0_i32_0 = arith.constant 0 : i32
    return %arg0, %c0_i32 : i32, i32
  }
  func.func @transform_1(%arg0: i32) -> (i32, i32) {
    %c0_i32 = arith.constant 0 : i32
    %c0_i32_0 = arith.constant 0 : i32
    %c0_i32_1 = arith.constant 0 : i32
    return %c0_i32, %c0_i32_0 : i32, i32
  }
  func.func @transform_2(%arg0: i32) -> (i32, i32) {
    %c0_i32 = arith.constant 0 : i32
    %c0_i32_0 = arith.constant 0 : i32
    %c0_i32_1 = arith.constant 0 : i32
    return %c0_i32, %c0_i32_0 : i32, i32
  }
  func.func @transform_3(%arg0: i32) -> (i32, i32) {
    %c0_i32 = arith.constant 0 : i32
    %c0_i32_0 = arith.constant 0 : i32
    return %arg0, %c0_i32 : i32, i32
  }
}

</mosaic_0001>

<bundles_post_ra>
// kernel: attention_forward.3
= control target key start
LH: loop header
LB: loop body
LE: loop exit
PB: predicated region body
PF: predicated region fallthrough
CT: control target
= control target key end

     0   :  { %8 = vsyncpa [#allocation3], 0  ;;  %s3246_s0 = inlined_call_operand.hbm [shape: f32[1024,128], index: 0, kind: input, shape index: {}]   ;;  %s3247_s1 = inlined_call_operand.hbm [shape: bf16[128,384], index: 1, kind: input, shape index: {}]   ;;  %s3248_s2 = inlined_call_operand.vmem [shape: f32[1,384], index: 2, kind: input, shape index: {}]   ;;  %s3249_s3 = inlined_call_operand.vmem [shape: bf16[1024,384], index: 3, kind: output, shape index: {}]  }
   0x1   :  { %10 = vsyncpa [#allocation3 + $0x1], 0 }
   0x2   :  { %11 = vsyncpa [#allocation5], 0  ;;  %s2618_s12 = smov 0   ;;  %s2620_s13 = smov 0  }
   0x3   :  { %s2622_s14 = smov 0   ;;  %s2624_s15 = smov 0  }
   0x4 LB: > { %s1973_s16 = sadd.s32 4294967295, %s2589_s15   ;;  %p37_p0 = scmp.ne.s32.totalorder %s2581_s13, %s2577_s12  ;;  %s2589_s15 = sphi %s2624_s15, %s3265_s15   ;;  %s2585_s14 = sphi %s2622_s14, %s3264_s14   ;;  %s2581_s13 = sphi %s2620_s13, %s3263_s13   ;;  %s2577_s12 = sphi %s2618_s12, %s3262_s12  }
   0x5   : > { %p2640_p1 = scmp.eq.s32.totalorder %s1973_s16, 0  ;;  %p1975_p2 = scmp.ge.s32.totalorder %s2589_s15, 1 }
   0x6   : > { %p116_p3 = scmp.lt.s32.totalorder %s2589_s15, 3  ;;  %s2591_s20 = smov [#allocation4]  }
   0x7   : > { %s3254_s17 = scalar_select %p2640_p1, 1, 0 }
   0x8   : > { %p2648_p4 = por %p2640_p1, %p37_p0  ;;  %p2652_p5 = pnand %p1975_p2, %p116_p3 }
   0x9   : > { %s128_s21 = sshll.u32 %s2591_s20, 4  ;;  %s2665_s23 = sadd.s32 1, %s2589_s15   ;;  %s129_s21 = int_to_ptr.vmem [resolvable:$true] %s128_s21 }
   0xa   : > { %s3255_s18 = scalar_select %p2648_p4, 1, 0 }
   0xb   : > { %s3256_s19 = scalar_select %p2652_p5, 1, 0 }
   0xc   : > { %p2412_p6 = pneg %p2652_p5  ;;  %s24_s24 = sadd.s32 1, %s2585_s14 }
   0xd   : > { %s21_s25 = ssub.s32 %s2589_s15, %s2665_s23  ;;  %s2493_s28 = scalar_lea.hbm %s3247_s1, 3072 }
   0xe   : > { %p2660_p7 = pnand %p2412_p6, %p2640_p1  ;;  %p2494_p8 = scmp.ne.s32.totalorder %s3247_s1, %s2493_s28 }
   0xf   : > { %p2500_p12 = scmp.lt.u32.totalorder %s2493_s28, %s3247_s1 }
  0x10   : > { %p2495_p9 = pneg %p2660_p7 }
  0x12   : > { %p2496_p10 = pnand %p2495_p9, %p2494_p8 }
  0x14   : > { %p2497_p11 = pneg %p2496_p10 }
  0x16   : > { %p2502_p13 = pnand %p2500_p12, %p2497_p11 }
  0x18   : > { %2505 = shalt.err (!%p2502_p13)
}
  0x19   : > { %s2506_s6 = scalar_lea.vmem %s129_s21, 3072  ;;  %p2514_p6 = scmp.lt.s32.totalorder %s129_s21, %s129_s21 }
  0x1a   : > { %p2507_p0 = scmp.ne.s32.totalorder %s129_s21, %s2506_s6  ;;  %p2515_p1 = scmp.lt.s32.totalorder %s2506_s6, %s2506_s6 }
  0x1c   : > { %p2509_p2 = pnand %p2507_p0, %p2495_p9  ;;  %p2516_p4 = por %p2515_p1, %p2514_p6 }
  0x1e   : > { %p2510_p3 = pneg %p2509_p2 }
  0x20   : > { %p2517_p5 = pnand %p2516_p4, %p2510_p3 }
  0x22   : > { %2520 = shalt.err (!%p2517_p5)
}
  0x23   : > { %s2592_s7 = smov 192   ;;  %s2593_s8 = smov 12  }
  0x24   : > { %2415 = dma.hbm_to_vmem [thread:$0]  (!%p2660_p7), %s3247_s1, 3072, %s129_s21, [#allocation5], %s2592_s7, %s2592_s7, %s2593_s8  }
  0x25   : > { %p22_p8 = scmp.eq.s32.totalorder %s21_s25, 0  ;;  %p31_p9 = scmp.ne.s32.totalorder %s2585_s14, %s2581_s13 }
  0x26   : > { %p32_p1 = scmp.eq.s32.totalorder %s2589_s15, 0  ;;  %p2421_p4 = scmp.lt.s32.totalorder %s2589_s15, 2 }
  0x27   : > { %s2691_s11 = scalar_select %p22_p8, %s2585_s14, %s24_s24  }
  0x28   : > { %p33_p5 = por %p32_p1, %p31_p9  ;;  %s145_s12 = sand.u32 1, %s2585_s14  }
  0x29   : > { %s1978_s20 = sshll.u32 %s145_s12, 9  ;;  %s2140_s26 = sshll.u32 %s2589_s15, 13 }
  0x2a   : > { %s2698_s29 = scalar_lea.hbm %s3246_s0, %s2140_s26  ;;  %s149_s21 = scalar_lea.vmem [#allocation2], %s1978_s20 }
  0x2b   : > { %s156_s22 = sshll.u32 %s149_s21, 4  ;;  %p2702_p7 = pnand %p2421_p4, %p33_p5  ;;  %s2700_s22 = int_to_ptr.vmem [resolvable:$true] %s156_s22 }
  0x2c   : > { %s2706_s25 = scalar_lea.sflag [#allocation3], %s145_s12  ;;  %s2521_s30 = scalar_lea.hbm %s2698_s29, 8192 }
  0x2d   : > { %p2522_p10 = scmp.ne.s32.totalorder %s2698_s29, %s2521_s30  ;;  %p2523_p11 = pneg %p2702_p7 }
  0x2e   : > { %s2526_s6 = scalar_lea.hbm %s3246_s0, 16384  ;;  %p2527_p0 = scmp.lt.u32.totalorder %s2698_s29, %s3246_s0 }
  0x2f   : > { %p2524_p12 = pnand %p2523_p11, %p2522_p10  ;;  %p2528_p2 = scmp.lt.u32.totalorder %s2526_s6, %s2521_s30 }
  0x30   : > { %p2530_p6 = scmp.lt.u32.totalorder %s2521_s30, %s2698_s29 }
  0x31   : > { %p2525_p13 = pneg %p2524_p12  ;;  %p2529_p3 = por %p2528_p2, %p2527_p0 }
  0x33   : > { %p2531_p8 = por %p2530_p6, %p2529_p3 }
  0x35   : > { %p2532_p9 = pnand %p2531_p8, %p2525_p13 }
  0x37   : > { %2535 = shalt.err (!%p2532_p9)
}
  0x38   : > { %s2536_s9 = scalar_lea.vmem %s2700_s22, 8192  ;;  %s2594_s10 = smov [#allocation2]  }
  0x39   : > { %p2537_p1 = scmp.ne.s32.totalorder %s2700_s22, %s2536_s9  ;;  %s2541_s12 = sshll.u32 %s2594_s10, 4  ;;  %s2542_s12 = int_to_ptr.vmem [resolvable:$false] %s2541_s12 }
  0x3a   : > { %s2543_s20 = scalar_lea.vmem %s2542_s12, 16384  ;;  %p2544_p10 = scmp.lt.s32.totalorder %s2700_s22, %s2542_s12 }
  0x3b   : > { %p2539_p4 = pnand %p2537_p1, %p2523_p11  ;;  %p2545_p12 = scmp.lt.s32.totalorder %s2543_s20, %s2536_s9 }
  0x3d   : > { %p2540_p5 = pneg %p2539_p4  ;;  %p2546_p0 = por %p2545_p12, %p2544_p10 }
  0x3f   : > { %p2547_p2 = pnand %p2546_p0, %p2540_p5 }
  0x41   : > { %2550 = shalt.err (!%p2547_p2)
}
  0x42   : > { %s2595_s26 = smov 128   ;;  %s2596_s27 = smov 8  }
  0x43   : > { %2419 = dma.hbm_to_vmem [thread:$0]  (!%p2702_p7), %s2698_s29, 8192, %s2700_s22, %s2706_s25, %s2595_s26, %s2595_s26, %s2596_s27  }
  0x44   : > { %p3259_p11 = scmp.ne.s32.totalorder %s3256_s19, 0 }
  0x45   : > { %s170_s28 = sand.u32 (!%p3259_p11), 1, %s2581_s13   ;;  %p3260_p13 = scmp.ne.s32.totalorder (!%p3259_p11), %s3255_s18, 0 }
  0x46   : > { %168 = sbr.rel (%p3259_p11) target bundleno = 519 (0x207), region = 32  ;;  %s1982_s21 = sshll.u32 (!%p3259_p11), %s170_s28, 9 }
  0x47   : > { %s171_s30 = scalar_lea.sflag (!%p3259_p11), [#allocation3], %s170_s28  ;;  %s2737_s4 = scalar_lea.vmem (!%p3259_p11), [#allocation2], %s1982_s21 }
  0x4d   : > { %2568 = dma.done.wait (%p3260_p13), %s171_s30, 8192  }
  0x4e   : > { %2570 = vsyncadd (%p3260_p13), %s171_s30, 4294959104  ;;  %p3261_p3 = scmp.ne.s32.totalorder %s3254_s17, 0 }
  0x50   : > { %2572 = dma.done.wait (%p3261_p3), [#allocation5], 3072  }
  0x51   : > { %2574 = vsyncadd (%p3261_p3), [#allocation5], 4294964224  ;;  %v2597_v0 = vmov 0   ;;  %v2461_v1 = vld [vmem:[#allocation4 + $0x4] ss:$12 sps:$4 sm:$0xff]   ;;  %v212_v18 = vld [vmem:[%s2737_s4 + $0x8] sm:$0xff] }
  0x52   : > { %516 = vmatprep.mubr.bf16.mxu0 %v2597_v0  ;;  %756 = vmatprep.mubr.bf16.mxu1 %v2597_v0  ;;  %v2463_v2 = vld [vmem:[#allocation4] ss:$12 sps:$4 sm:$0xff]   ;;  %v2464_v3 = vld [vmem:[#allocation4 + $0x1c] ss:$12 sps:$4 sm:$0xff]   ;;  %v2466_v4 = vld [vmem:[#allocation4 + $0x18] ss:$12 sps:$4 sm:$0xff]  }
  0x53   : > { %484 = vmatprep.subr.bf16.mxu0 %v2461_v1  ;;  %2389 = vmatprep.subr.bf16.mxu1 %v2461_v1  ;;  %v2467_v5 = vld [vmem:[#allocation4 + $0x34] ss:$12 sps:$4 sm:$0xff]   ;;  %v2469_v6 = vld [vmem:[#allocation4 + $0x30] ss:$12 sps:$4 sm:$0xff]   ;;  %v2470_v7 = vld [vmem:[#allocation4 + $0x4c] ss:$12 sps:$4 sm:$0xff]  }
  0x54   : > { %485 = vmatpush1.bf16.msra.mxu0 %v2463_v2  ;;  %2397 = vmatpush1.bf16.msra.mxu1 %v2463_v2  ;;  %v2472_v8 = vld [vmem:[#allocation4 + $0x48] ss:$12 sps:$4 sm:$0xff]   ;;  %v2473_v9 = vld [vmem:[#allocation4 + $0x64] ss:$12 sps:$4 sm:$0xff]   ;;  %v2475_v10 = vld [vmem:[#allocation4 + $0x60] ss:$12 sps:$4 sm:$0xff]  }
  0x55   : > { %486 = vmatprep.subr.bf16.mxu0 %v2464_v3  ;;  %2390 = vmatprep.subr.bf16.mxu1 %v2464_v3  ;;  %v2476_v11 = vld [vmem:[#allocation4 + $0x7c] ss:$12 sps:$4 sm:$0xff]   ;;  %v2478_v12 = vld [vmem:[#allocation4 + $0x78] ss:$12 sps:$4 sm:$0xff]   ;;  %v2479_v13 = vld [vmem:[#allocation4 + $0x94] ss:$12 sps:$4 sm:$0xff]  }
  0x56   : > { %v2481_v14 = vld [vmem:[#allocation4 + $0x90] ss:$12 sps:$4 sm:$0xff]   ;;  %v2482_v15 = vld [vmem:[#allocation4 + $0xac] ss:$12 sps:$4 sm:$0xff]   ;;  %v2484_v16 = vld [vmem:[#allocation4 + $0xa8] ss:$12 sps:$4 sm:$0xff]  }
  0x57   : > { %v211_v17 = vld [vmem:[%s2737_s4] sm:$0xff]  ;;  %v260_v20 = vld [vmem:[%s2737_s4 + $0x188] sm:$0xff]  ;;  %v213_v25 = vld [vmem:[%s2737_s4 + $0x10] sm:$0xff]  ;;  %s1984_s17 = sshll.u32 %s1973_s16, 6 }
  0x58   : > { %487 = vmatpush1.bf16.msra.mxu0 %v2466_v4  ;;  %2398 = vmatpush1.bf16.msra.mxu1 %v2466_v4  ;;  %v259_v19 = vld [vmem:[%s2737_s4 + $0x180] sm:$0xff]  ;;  %v2485_v21 = vld [vmem:[#allocation4 + $0x8] ss:$12 sps:$4 sm:$0xff]   ;;  %v2753_v22 = vpack.c.bf16 %v212_v18, %v211_v17  ;;  %v214_v26 = vld [vmem:[%s2737_s4 + $0x18] sm:$0xff]  ;;  %p204_p7 = scmp.lt.s32.totalorder %s1984_s17, 127 }
  0x59   : > { %488 = vmatprep.subr.bf16.mxu0 %v2467_v5  ;;  %2391 = vmatprep.subr.bf16.mxu1 %v2467_v5  ;;  %v2755_v23 = vpack.c.bf16 %v260_v20, %v259_v19  ;;  %v2486_v24 = vld [vmem:[#allocation4 + $0x20] ss:$12 sps:$4 sm:$0xff]   ;;  %v261_v27 = vld [vmem:[%s2737_s4 + $0x190] sm:$0xff]  ;;  %v262_v28 = vld [vmem:[%s2737_s4 + $0x198] sm:$0xff]  ;;  %v2765_v30 = vpack.c.bf16 %v214_v26, %v213_v25 }
  0x5a   : > { %v2487_v29 = vld [vmem:[#allocation4 + $0x38] ss:$12 sps:$4 sm:$0xff]   ;;  %v2767_v31 = vpack.c.bf16 %v262_v28, %v261_v27  ;;  %v2488_v32 = vld [vmem:[#allocation4 + $0x50] ss:$12 sps:$4 sm:$0xff]   ;;  %v216_v34 = vld [vmem:[%s2737_s4 + $0x28] sm:$0xff]  ;;  %s3267_s17 = smov (!%p204_p7, %s1984_s17), 127 }
  0x5b   : > { %v215_v33 = vld [vmem:[%s2737_s4 + $0x20] sm:$0xff]  ;;  %v264_v36 = vld [vmem:[%s2737_s4 + $0x1a8] sm:$0xff]  ;;  %v217_v41 = vld [vmem:[%s2737_s4 + $0x30] sm:$0xff]  ;;  %s2405_s15 = smul.u32 12, %s3267_s17 }
  0x5c   : > { %489 = vmatpush1.bf16.msra.mxu0 %v2469_v6  ;;  %2399 = vmatpush1.bf16.msra.mxu1 %v2469_v6  ;;  %v263_v35 = vld [vmem:[%s2737_s4 + $0x1a0] sm:$0xff]  ;;  %v2489_v37 = vld [vmem:[#allocation4 + $0x68] ss:$12 sps:$4 sm:$0xff]   ;;  %v2777_v38 = vpack.c.bf16 %v216_v34, %v215_v33  ;;  %v218_v42 = vld [vmem:[%s2737_s4 + $0x38] sm:$0xff] }
  0x5d   : > { %490 = vmatprep.subr.bf16.mxu0 %v2470_v7  ;;  %2392 = vmatprep.subr.bf16.mxu1 %v2470_v7  ;;  %v2779_v39 = vpack.c.bf16 %v264_v36, %v263_v35  ;;  %v2490_v40 = vld [vmem:[#allocation4 + $0x80] ss:$12 sps:$4 sm:$0xff]   ;;  %v265_v43 = vld [vmem:[%s2737_s4 + $0x1b0] sm:$0xff]  ;;  %v266_v44 = vld [vmem:[%s2737_s4 + $0x1b8] sm:$0xff]  ;;  %v278_v46 = vpack.c.bf16 %v218_v42, %v217_v41  ;;  %s2911_s22 = scalar_lea.vmem %s3249_s3, %s2405_s15 }
  0x5e   : > { %v2491_v45 = vld [vmem:[#allocation4 + $0x98] ss:$12 sps:$4 sm:$0xff]   ;;  %v2789_v47 = vpack.c.bf16 %v266_v44, %v265_v43  ;;  %v2492_v48 = vld [vmem:[#allocation4 + $0xb0] ss:$12 sps:$4 sm:$0xff]   ;;  %v220_v50 = vld [vmem:[%s2737_s4 + $0x48] sm:$0xff] }
  0x5f   : > { %v219_v49 = vld [vmem:[%s2737_s4 + $0x40] sm:$0xff]  ;;  %v268_v52 = vld [vmem:[%s2737_s4 + $0x1c8] sm:$0xff]  ;;  %v221_v55 = vld [vmem:[%s2737_s4 + $0x50] sm:$0xff] }
  0x60   : > { %491 = vmatpush1.bf16.msra.mxu0 %v2472_v8  ;;  %2400 = vmatpush1.bf16.msra.mxu1 %v2472_v8  ;;  %v267_v51 = vld [vmem:[%s2737_s4 + $0x1c0] sm:$0xff]  ;;  %v279_v53 = vpack.c.bf16 %v220_v50, %v219_v49  ;;  %v222_v56 = vld [vmem:[%s2737_s4 + $0x58] sm:$0xff]  ;;  %v269_v57 = vld [vmem:[%s2737_s4 + $0x1d0] sm:$0xff] }
  0x61   : > { %492 = vmatprep.subr.bf16.mxu0 %v2473_v9  ;;  %2393 = vmatprep.subr.bf16.mxu1 %v2473_v9  ;;  %v2798_v54 = vpack.c.bf16 %v268_v52, %v267_v51  ;;  %v270_v58 = vld [vmem:[%s2737_s4 + $0x1d8] sm:$0xff]  ;;  %v280_v59 = vpack.c.bf16 %v222_v56, %v221_v55  ;;  %v223_v61 = vld [vmem:[%s2737_s4 + $0x60] sm:$0xff]  ;;  %v224_v62 = vld [vmem:[%s2737_s4 + $0x68] sm:$0xff] }
  0x62   : > { %v2807_v60 = vpack.c.bf16 %v270_v58, %v269_v57  ;;  %v271_v63 = vld [vmem:[%s2737_s4 + $0x1e0] sm:$0xff]  ;;  %v272_v1 = vld [vmem:[%s2737_s4 + $0x1e8] sm:$0xff]  ;;  %v281_v2 = vpack.c.bf16 %v224_v62, %v223_v61  ;;  %v225_v4 = vld [vmem:[%s2737_s4 + $0x70] sm:$0xff] }
  0x63   : > { %v2816_v3 = vpack.c.bf16 %v272_v1, %v271_v63  ;;  %v226_v5 = vld [vmem:[%s2737_s4 + $0x78] sm:$0xff]  ;;  %v273_v6 = vld [vmem:[%s2737_s4 + $0x1f0] sm:$0xff]  ;;  %v232_v17 = vld [vmem:[%s2737_s4 + $0xa8] sm:$0xff] }
  0x64   : > { %493 = vmatpush1.bf16.msra.mxu0 %v2475_v10  ;;  %2401 = vmatpush1.bf16.msra.mxu1 %v2475_v10  ;;  %v274_v7 = vld [vmem:[%s2737_s4 + $0x1f8] sm:$0xff]  ;;  %v282_v8 = vpack.c.bf16 %v226_v5, %v225_v4  ;;  %v227_v10 = vld [vmem:[%s2737_s4 + $0x80] sm:$0xff]  ;;  %v233_v19 = vld [vmem:[%s2737_s4 + $0xb0] sm:$0xff] }
  0x65   : > { %494 = vmatprep.subr.bf16.mxu0 %v2476_v11  ;;  %2394 = vmatprep.subr.bf16.mxu1 %v2476_v11  ;;  %v2825_v9 = vpack.c.bf16 %v274_v7, %v273_v6  ;;  %v228_v11 = vld [vmem:[%s2737_s4 + $0x88] sm:$0xff]  ;;  %v234_v20 = vld [vmem:[%s2737_s4 + $0xb8] sm:$0xff]  ;;  %v237_v26 = vld [vmem:[%s2737_s4 + $0xd0] sm:$0xff] }
  0x66   : > { %v238_v27 = vld [vmem:[%s2737_s4 + $0xd8] sm:$0xff]  ;;  %v241_v33 = vld [vmem:[%s2737_s4 + $0xf0] sm:$0xff]  ;;  %v243_v35 = vld [vmem:[%s2737_s4 + $0x100] sm:$0xff] }
  0x67   : > { %v288_v28 = vpack.c.bf16 %v238_v27, %v237_v26  ;;  %v242_v34 = vld [vmem:[%s2737_s4 + $0xf8] sm:$0xff]  ;;  %v244_v36 = vld [vmem:[%s2737_s4 + $0x108] sm:$0xff]  ;;  %v247_v42 = vld [vmem:[%s2737_s4 + $0x120] sm:$0xff] }
  0x68   : > { %495 = vmatpush1.bf16.msra.mxu0 %v2478_v12  ;;  %2402 = vmatpush1.bf16.msra.mxu1 %v2478_v12  ;;  %v283_v12 = vpack.c.bf16 %v228_v11, %v227_v10  ;;  %v246_v41 = vld [vmem:[%s2737_s4 + $0x118] sm:$0xff]  ;;  %v248_v43 = vld [vmem:[%s2737_s4 + $0x128] sm:$0xff]  ;;  %v251_v49 = vld [vmem:[%s2737_s4 + $0x140] sm:$0xff] }
  0x69   : > { %496 = vmatprep.subr.bf16.mxu0 %v2479_v13  ;;  %2395 = vmatprep.subr.bf16.mxu1 %v2479_v13  ;;  %v229_v13 = vld [vmem:[%s2737_s4 + $0x90] sm:$0xff]  ;;  %v252_v50 = vld [vmem:[%s2737_s4 + $0x148] sm:$0xff]  ;;  %v254_v55 = vld [vmem:[%s2737_s4 + $0x158] sm:$0xff] }
  0x6a   : > { %v295_v52 = vpack.c.bf16 %v252_v50, %v251_v49  ;;  %v255_v56 = vld [vmem:[%s2737_s4 + $0x160] sm:$0xff]  ;;  %v256_v57 = vld [vmem:[%s2737_s4 + $0x168] sm:$0xff]  ;;  %v257_v61 = vld [vmem:[%s2737_s4 + $0x170] sm:$0xff] }
  0x6b   : > { %v258_v62 = vld [vmem:[%s2737_s4 + $0x178] sm:$0xff] }
  0x6c   : > { %497 = vmatpush1.bf16.msra.mxu0 %v2481_v14  ;;  %2403 = vmatpush1.bf16.msra.mxu1 %v2481_v14  ;;  %v230_v14 = vld [vmem:[%s2737_s4 + $0x98] sm:$0xff]  ;;  %v298_v63 = vpack.c.bf16 %v258_v62, %v257_v61 }
  0x6d   : > { %498 = vmatprep.subr.bf16.mxu0 %v2482_v15  ;;  %2396 = vmatprep.subr.bf16.mxu1 %v2482_v15  ;;  %v284_v15 = vpack.c.bf16 %v230_v14, %v229_v13 }
  0x70   : > { %499 = vmatpush1.bf16.msra.mxu0 %v2484_v16  ;;  %2404 = vmatpush1.bf16.msra.mxu1 %v2484_v16  ;;  %v231_v16 = vld [vmem:[%s2737_s4 + $0xa0] sm:$0xff] }
  0x71   : > { %2309 = vmatprep.subr.bf16.mxu1 %v2485_v21  ;;  %v285_v18 = vpack.c.bf16 %v232_v17, %v231_v16 }
  0x73   : > { %517 = vmatmul.mubr.bf16.vlgmr.msra.gmra.mrb[0].mxu0 %v2753_v22  ;;  %757 = vmatmul.mubr.bf16.vlgmr.msra.gmra.mrb[0].mxu1 %v2755_v23 }
  0x74   : > { %2310 = vmatpush3.bf16.msra.mxu1 %v2485_v21  ;;  %526 = vmatprep.mubr.bf16.mxu0 %v2597_v0  ;;  %v286_v21 = vpack.c.bf16 %v234_v20, %v233_v19 }
  0x75   : > { %766 = vmatprep.mubr.bf16.mxu1 %v2597_v0  ;;  %2311 = vmatprep.subr.bf16.mxu1 %v2486_v24 }
  0x78   : > { %2312 = vmatpush3.bf16.msra.mxu1 %v2486_v24  ;;  %v236_v24 = vld [vmem:[%s2737_s4 + $0xc8] sm:$0xff] }
  0x79   : > { %2313 = vmatprep.subr.bf16.mxu1 %v2487_v29 }
  0x7b   : > { %527 = vmatmul.mubr.bf16.gmra.mrb[4].mxu0 %v2765_v30  ;;  %767 = vmatmul.mubr.bf16.gmra.mrb[4].mxu1 %v2767_v31 }
  0x7c   : > { %536 = vmatprep.mubr.bf16.mxu0 %v2597_v0  ;;  %776 = vmatprep.mubr.bf16.mxu1 %v2597_v0 }
  0x7d   : > { %2314 = vmatpush3.bf16.msra.mxu1 %v2487_v29  ;;  %v239_v29 = vld [vmem:[%s2737_s4 + $0xe0] sm:$0xff] }
  0x7e   : > { %2315 = vmatprep.subr.bf16.mxu1 %v2488_v32 }
  0x81   : > { %2316 = vmatpush3.bf16.msra.mxu1 %v2488_v32 }
  0x82   : > { %2317 = vmatprep.subr.bf16.mxu1 %v2489_v37 }
  0x83   : > { %537 = vmatmul.mubr.bf16.gmra.mrb[8].mxu0 %v2777_v38  ;;  %777 = vmatmul.mubr.bf16.gmra.mrb[8].mxu1 %v2779_v39 }
  0x84   : > { %546 = vmatprep.mubr.bf16.mxu0 %v2597_v0  ;;  %786 = vmatprep.mubr.bf16.mxu1 %v2597_v0 }
  0x85   : > { %2318 = vmatpush3.bf16.msra.mxu1 %v2489_v37  ;;  %v290_v37 = vpack.c.bf16 %v242_v34, %v241_v33 }
  0x86   : > { %2319 = vmatprep.subr.bf16.mxu1 %v2490_v40 }
  0x89   : > { %2320 = vmatpush3.bf16.msra.mxu1 %v2490_v40  ;;  %v245_v40 = vld [vmem:[%s2737_s4 + $0x110] sm:$0xff] }
  0x8a   : > { %2321 = vmatprep.subr.bf16.mxu1 %v2491_v45  ;;  %v292_v44 = vpack.c.bf16 %v246_v41, %v245_v40 }
  0x8b   : > { %547 = vmatmul.mubr.bf16.gmra.mrb[12].mxu0 %v278_v46  ;;  %787 = vmatmul.mubr.bf16.gmra.mrb[12].mxu1 %v2789_v47 }
  0x8c   : > { %556 = vmatprep.mubr.bf16.mxu0 %v2597_v0  ;;  %796 = vmatprep.mubr.bf16.mxu1 %v2597_v0 }
  0x8d   : > { %2322 = vmatpush3.bf16.msra.mxu1 %v2491_v45  ;;  %v293_v45 = vpack.c.bf16 %v248_v43, %v247_v42 }
  0x8e   : > { %2323 = vmatprep.subr.bf16.mxu1 %v2492_v48 }
  0x91   : > { %2324 = vmatpush3.bf16.msra.mxu1 %v2492_v48  ;;  %v250_v48 = vld [vmem:[%s2737_s4 + $0x138] sm:$0xff] }
  0x93   : > { %557 = vmatmul.mubr.bf16.gmra.mrb[16].mxu0 %v279_v53  ;;  %797 = vmatmul.mubr.bf16.gmra.mrb[16].mxu1 %v2798_v54 }
  0x94   : > { %566 = vmatprep.mubr.bf16.mxu0 %v2597_v0  ;;  %806 = vmatprep.mubr.bf16.mxu1 %v2597_v0 }
  0x9b   : > { %567 = vmatmul.mubr.bf16.gmra.mrb[20].mxu0 %v280_v59  ;;  %807 = vmatmul.mubr.bf16.gmra.mrb[20].mxu1 %v2807_v60 }
  0x9c   : > { %576 = vmatprep.mubr.bf16.mxu0 %v2597_v0  ;;  %816 = vmatprep.mubr.bf16.mxu1 %v2597_v0 }
  0xa3   : > { %577 = vmatmul.mubr.bf16.gmra.mrb[24].mxu0 %v281_v2  ;;  %817 = vmatmul.mubr.bf16.gmra.mrb[24].mxu1 %v2816_v3 }
  0xa4   : > { %586 = vmatprep.mubr.bf16.mxu0 %v2597_v0  ;;  %826 = vmatprep.mubr.bf16.mxu1 %v2597_v0 }
  0xab   : > { %587 = vmatmul.mubr.bf16.gmra.mrb[28].mxu0 %v282_v8  ;;  %827 = vmatmul.mubr.bf16.gmra.mrb[28].mxu1 %v2825_v9 }
  0xac   : > { %596 = vmatprep.mubr.bf16.mxu0 %v2597_v0  ;;  %2325 = vmatprep.mubr.bf16.mxu1 %v2753_v22  ;;  %v235_v22 = vld [vmem:[%s2737_s4 + $0xc0] sm:$0xff] }
  0xad   : > { %v287_v25 = vpack.c.bf16 %v236_v24, %v235_v22 }
  0xb3   : > { %597 = vmatmul.mubr.bf16.gmra.mrb[32].mxu0 %v283_v12  ;;  %2326 = vmatmul.mubr.bf16.vlgmr.msra.gmra.mrb[32].mxu1 %v2765_v30  ;;  %v240_v30 = vld [vmem:[%s2737_s4 + $0xe8] sm:$0xff] }
  0xb4   : > { %606 = vmatprep.mubr.bf16.mxu0 %v2597_v0  ;;  %2329 = vmatprep.mubr.bf16.mxu1 %v2777_v38  ;;  %v289_v32 = vpack.c.bf16 %v240_v30, %v239_v29  ;;  %v291_v38 = vpack.c.bf16 %v244_v36, %v243_v35 }
  0xbb   : > { %607 = vmatmul.mubr.bf16.gmra.mrb[36].mxu0 %v284_v15  ;;  %2330 = vmatmul.mubr.bf16.gmra.mrb[36].mxu1 %v278_v46  ;;  %v249_v46 = vld [vmem:[%s2737_s4 + $0x130] sm:$0xff] }
  0xbc   : > { %616 = vmatprep.mubr.bf16.mxu0 %v2597_v0  ;;  %2333 = vmatprep.mubr.bf16.mxu1 %v279_v53  ;;  %v294_v51 = vpack.c.bf16 %v250_v48, %v249_v46  ;;  %v253_v53 = vld [vmem:[%s2737_s4 + $0x150] sm:$0xff] }
  0xbd   : > { %v296_v58 = vpack.c.bf16 %v254_v55, %v253_v53 }
  0xc3   : > { %617 = vmatmul.mubr.bf16.gmra.mrb[40].mxu0 %v285_v18  ;;  %2334 = vmatmul.mubr.bf16.gmra.mrb[40].mxu1 %v280_v59  ;;  %v297_v59 = vpack.c.bf16 %v256_v57, %v255_v56 }
  0xc4   : > { %626 = vmatprep.mubr.bf16.mxu0 %v2597_v0  ;;  %2337 = vmatprep.mubr.bf16.mxu1 %v281_v2 }
  0xcb   : > { %627 = vmatmul.mubr.bf16.gmra.mrb[44].mxu0 %v286_v21  ;;  %2338 = vmatmul.mubr.bf16.gmra.mrb[44].mxu1 %v282_v8 }
  0xcc   : > { %636 = vmatprep.mubr.bf16.mxu0 %v2597_v0  ;;  %2341 = vmatprep.mubr.bf16.mxu1 %v283_v12 }
  0xd3   : > { %637 = vmatmul.mubr.bf16.gmra.mrb[48].mxu0 %v287_v25  ;;  %2342 = vmatmul.mubr.bf16.gmra.mrb[48].mxu1 %v284_v15 }
  0xd4   : > { %646 = vmatprep.mubr.bf16.mxu0 %v2597_v0  ;;  %2345 = vmatprep.mubr.bf16.mxu1 %v285_v18 }
  0xdb   : > { %647 = vmatmul.mubr.bf16.gmra.mrb[52].mxu0 %v288_v28  ;;  %2346 = vmatmul.mubr.bf16.gmra.mrb[52].mxu1 %v286_v21 }
  0xdc   : > { %656 = vmatprep.mubr.bf16.mxu0 %v2597_v0  ;;  %2349 = vmatprep.mubr.bf16.mxu1 %v287_v25 }
  0xe3   : > { %657 = vmatmul.mubr.bf16.gmra.mrb[56].mxu0 %v289_v32  ;;  %2350 = vmatmul.mubr.bf16.gmra.mrb[56].mxu1 %v288_v28 }
  0xe4   : > { %666 = vmatprep.mubr.bf16.mxu0 %v2597_v0  ;;  %2353 = vmatprep.mubr.bf16.mxu1 %v289_v32 }
  0xeb   : > { %667 = vmatmul.mubr.bf16.gmra.mrb[60].mxu0 %v290_v37  ;;  %2354 = vmatmul.mubr.bf16.gmra.mrb[60].mxu1 %v290_v37 }
  0xec   : > { %676 = vmatprep.mubr.bf16.mxu0 %v2597_v0  ;;  %2357 = vmatprep.mubr.bf16.mxu1 %v291_v38 }
  0xf3   : > { %677 = vmatmul.mubr.bf16.gmra.mrb[64].mxu0 %v291_v38  ;;  %2358 = vmatmul.mubr.bf16.gmra.mrb[64].mxu1 %v292_v44 }
  0xf4   : > { %686 = vmatprep.mubr.bf16.mxu0 %v2597_v0  ;;  %2361 = vmatprep.mubr.bf16.mxu1 %v293_v45 }
  0xfb   : > { %687 = vmatmul.mubr.bf16.gmra.mrb[68].mxu0 %v292_v44  ;;  %2362 = vmatmul.mubr.bf16.gmra.mrb[68].mxu1 %v294_v51 }
  0xfc   : > { %696 = vmatprep.mubr.bf16.mxu0 %v2597_v0  ;;  %2365 = vmatprep.mubr.bf16.mxu1 %v295_v52 }
 0x103   : > { %697 = vmatmul.mubr.bf16.gmra.mrb[72].mxu0 %v293_v45  ;;  %2366 = vmatmul.mubr.bf16.gmra.mrb[72].mxu1 %v296_v58 }
 0x104   : > { %706 = vmatprep.mubr.bf16.mxu0 %v2597_v0  ;;  %2369 = vmatprep.mubr.bf16.mxu1 %v297_v59 }
 0x10b   : > { %707 = vmatmul.mubr.bf16.gmra.mrb[76].mxu0 %v294_v51  ;;  %2370 = vmatmul.mubr.bf16.gmra.mrb[76].mxu1 %v298_v63 }
 0x10c   : > { %716 = vmatprep.mubr.bf16.mxu0 %v2597_v0  ;;  %2373 = vmatprep.mubr.bf16.mxu1 %v2755_v23  ;;  %v341_v23 = vlaneseq }
 0x113   : > { %717 = vmatmul.mubr.bf16.gmra.mrb[80].mxu0 %v295_v52  ;;  %2374 = vmatmul.mubr.bf16.gmra.mrb[80].mxu1 %v2767_v31  ;;  %v2889_v31 = vshrl.u32 %v341_v23, 7 }
 0x114   : > { %726 = vmatprep.mubr.bf16.mxu0 %v2597_v0  ;;  %2377 = vmatprep.mubr.bf16.mxu1 %v2779_v39 }
 0x115   : > { %v343_v39 = vsub.s32 0, %v2889_v31 }
 0x11b   : > { %727 = vmatmul.mubr.bf16.gmra.mrb[84].mxu0 %v296_v58  ;;  %2378 = vmatmul.mubr.bf16.gmra.mrb[84].mxu1 %v2789_v47  ;;  %v2895_v47 = vld [vmem:[%s3248_s2] sm:$0x7] }
 0x11c   : > { %736 = vmatprep.mubr.bf16.mxu0 %v2597_v0  ;;  %2381 = vmatprep.mubr.bf16.mxu1 %v2798_v54  ;;  %v2899_v54 = vrot.slane %v2895_v47, %v343_v39 }
 0x123   : > { %737 = vmatmul.mubr.bf16.gmra.mrb[88].mxu0 %v297_v59  ;;  %2382 = vmatmul.mubr.bf16.gmra.mrb[88].mxu1 %v2807_v60 }
 0x124   : > { %746 = vmatprep.mubr.bf16.mxu0 %v2597_v0  ;;  %2385 = vmatprep.mubr.bf16.mxu1 %v2816_v3  ;;  %v347_v0 = vsub.s32 1, %v2889_v31 }
 0x126   : > { %v2902_v60 = vrot.slane %v2895_v47, %v347_v0 }
 0x12b   : > { %747 = vmatmul.mubr.bf16.gmra.mrb[92].mxu0 %v298_v63  ;;  %2386 = vmatmul.mubr.bf16.gmra.mrb[92].mxu1 %v2825_v9 }
 0x146   : > { %v518_v1 = vpop.f32.mrb[0].mxu0  ;;  %v758_v2 = vpop.f32.mrb[0].mxu1 }
 0x147   : > { %v519_v3 = vadd.f32 %v518_v1, %v2899_v54  ;;  %v759_v4 = vadd.f32 %v758_v2, %v2899_v54  ;;  %v520_v5 = vpop.f32.mrb[1].mxu0  ;;  %v760_v6 = vpop.f32.mrb[1].mxu1 }
 0x148   : > { %v521_v7 = vadd.f32 %v520_v5, %v2902_v60  ;;  %v761_v8 = vadd.f32 %v760_v6, %v2902_v60  ;;  %v522_v9 = vpop.f32.mrb[2].mxu0  ;;  %v762_v10 = vpop.f32.mrb[2].mxu1 }
 0x149   : > { %v523_v11 = vadd.f32 %v522_v9, %v2899_v54  ;;  %v763_v12 = vadd.f32 %v762_v10, %v2899_v54  ;;  %v524_v13 = vpop.f32.mrb[3].mxu0  ;;  %v764_v14 = vpop.f32.mrb[3].mxu1 }
 0x14a   : > { %v2141_v15 = vpack.c.bf16 %v521_v7, %v519_v3  ;;  %v2237_v16 = vpack.c.bf16 %v761_v8, %v759_v4  ;;  %v525_v17 = vadd.f32 %v524_v13, %v2902_v60  ;;  %v765_v18 = vadd.f32 %v764_v14, %v2902_v60 }
 0x14c   : > { %1766 = vst [vmem:[%s2911_s22] sm:$0xff] %v2141_v15  ;;  %1862 = vst [vmem:[%s2911_s22 + $0x240] sm:$0xff] %v2237_v16  ;;  %v2143_v19 = vpack.c.bf16 %v525_v17, %v523_v11  ;;  %v2239_v20 = vpack.c.bf16 %v765_v18, %v763_v12 }
 0x14e   : > { %1768 = vst [vmem:[%s2911_s22 + $0xc] sm:$0xff] %v2143_v19  ;;  %1864 = vst [vmem:[%s2911_s22 + $0x24c] sm:$0xff] %v2239_v20  ;;  %v528_v21 = vpop.f32.mrb[4].mxu0  ;;  %v768_v22 = vpop.f32.mrb[4].mxu1 }
 0x14f   : > { %v529_v24 = vadd.f32 %v528_v21, %v2899_v54  ;;  %v769_v25 = vadd.f32 %v768_v22, %v2899_v54  ;;  %v530_v26 = vpop.f32.mrb[5].mxu0  ;;  %v770_v27 = vpop.f32.mrb[5].mxu1 }
 0x150   : > { %v531_v28 = vadd.f32 %v530_v26, %v2902_v60  ;;  %v771_v29 = vadd.f32 %v770_v27, %v2902_v60  ;;  %v532_v30 = vpop.f32.mrb[6].mxu0  ;;  %v772_v32 = vpop.f32.mrb[6].mxu1 }
 0x151   : > { %v533_v33 = vadd.f32 %v532_v30, %v2899_v54  ;;  %v773_v34 = vadd.f32 %v772_v32, %v2899_v54  ;;  %v534_v35 = vpop.f32.mrb[7].mxu0  ;;  %v774_v36 = vpop.f32.mrb[7].mxu1 }
 0x152   : > { %v2145_v37 = vpack.c.bf16 %v531_v28, %v529_v24  ;;  %v2241_v38 = vpack.c.bf16 %v771_v29, %v769_v25  ;;  %v535_v40 = vadd.f32 %v534_v35, %v2902_v60  ;;  %v775_v41 = vadd.f32 %v774_v36, %v2902_v60 }
 0x154   : > { %1770 = vst [vmem:[%s2911_s22 + $0x18] sm:$0xff] %v2145_v37  ;;  %1866 = vst [vmem:[%s2911_s22 + $0x258] sm:$0xff] %v2241_v38  ;;  %v2147_v42 = vpack.c.bf16 %v535_v40, %v533_v33  ;;  %v2243_v43 = vpack.c.bf16 %v775_v41, %v773_v34 }
 0x156   : > { %1772 = vst [vmem:[%s2911_s22 + $0x24] sm:$0xff] %v2147_v42  ;;  %1868 = vst [vmem:[%s2911_s22 + $0x264] sm:$0xff] %v2243_v43  ;;  %v538_v44 = vpop.f32.mrb[8].mxu0  ;;  %v778_v45 = vpop.f32.mrb[8].mxu1 }
 0x157   : > { %v539_v46 = vadd.f32 %v538_v44, %v2899_v54  ;;  %v779_v48 = vadd.f32 %v778_v45, %v2899_v54  ;;  %v540_v49 = vpop.f32.mrb[9].mxu0  ;;  %v780_v50 = vpop.f32.mrb[9].mxu1 }
 0x158   : > { %v541_v51 = vadd.f32 %v540_v49, %v2902_v60  ;;  %v781_v52 = vadd.f32 %v780_v50, %v2902_v60  ;;  %v542_v53 = vpop.f32.mrb[10].mxu0  ;;  %v782_v55 = vpop.f32.mrb[10].mxu1 }
 0x159   : > { %v543_v56 = vadd.f32 %v542_v53, %v2899_v54  ;;  %v783_v57 = vadd.f32 %v782_v55, %v2899_v54  ;;  %v544_v58 = vpop.f32.mrb[11].mxu0  ;;  %v784_v59 = vpop.f32.mrb[11].mxu1 }
 0x15a   : > { %v2149_v61 = vpack.c.bf16 %v541_v51, %v539_v46  ;;  %v2245_v62 = vpack.c.bf16 %v781_v52, %v779_v48  ;;  %v545_v63 = vadd.f32 %v544_v58, %v2902_v60  ;;  %v785_v23 = vadd.f32 %v784_v59, %v2902_v60 }
 0x15c   : > { %1774 = vst [vmem:[%s2911_s22 + $0x30] sm:$0xff] %v2149_v61  ;;  %1870 = vst [vmem:[%s2911_s22 + $0x270] sm:$0xff] %v2245_v62  ;;  %v2151_v39 = vpack.c.bf16 %v545_v63, %v543_v56  ;;  %v2247_v0 = vpack.c.bf16 %v785_v23, %v783_v57 }
 0x15e   : > { %1776 = vst [vmem:[%s2911_s22 + $0x3c] sm:$0xff] %v2151_v39  ;;  %1872 = vst [vmem:[%s2911_s22 + $0x27c] sm:$0xff] %v2247_v0  ;;  %v548_v1 = vpop.f32.mrb[12].mxu0  ;;  %v788_v2 = vpop.f32.mrb[12].mxu1 }
 0x15f   : > { %v549_v3 = vadd.f32 %v548_v1, %v2899_v54  ;;  %v789_v4 = vadd.f32 %v788_v2, %v2899_v54  ;;  %v550_v5 = vpop.f32.mrb[13].mxu0  ;;  %v790_v6 = vpop.f32.mrb[13].mxu1 }
 0x160   : > { %v551_v7 = vadd.f32 %v550_v5, %v2902_v60  ;;  %v791_v8 = vadd.f32 %v790_v6, %v2902_v60  ;;  %v552_v9 = vpop.f32.mrb[14].mxu0  ;;  %v792_v10 = vpop.f32.mrb[14].mxu1 }
 0x161   : > { %v553_v11 = vadd.f32 %v552_v9, %v2899_v54  ;;  %v793_v12 = vadd.f32 %v792_v10, %v2899_v54  ;;  %v554_v13 = vpop.f32.mrb[15].mxu0  ;;  %v794_v14 = vpop.f32.mrb[15].mxu1 }
 0x162   : > { %v2153_v15 = vpack.c.bf16 %v551_v7, %v549_v3  ;;  %v2249_v16 = vpack.c.bf16 %v791_v8, %v789_v4  ;;  %v555_v17 = vadd.f32 %v554_v13, %v2902_v60  ;;  %v795_v18 = vadd.f32 %v794_v14, %v2902_v60 }
 0x164   : > { %1778 = vst [vmem:[%s2911_s22 + $0x48] sm:$0xff] %v2153_v15  ;;  %1874 = vst [vmem:[%s2911_s22 + $0x288] sm:$0xff] %v2249_v16  ;;  %v2155_v19 = vpack.c.bf16 %v555_v17, %v553_v11  ;;  %v2251_v20 = vpack.c.bf16 %v795_v18, %v793_v12 }
 0x166   : > { %1780 = vst [vmem:[%s2911_s22 + $0x54] sm:$0xff] %v2155_v19  ;;  %1876 = vst [vmem:[%s2911_s22 + $0x294] sm:$0xff] %v2251_v20  ;;  %v558_v21 = vpop.f32.mrb[16].mxu0  ;;  %v798_v22 = vpop.f32.mrb[16].mxu1 }
 0x167   : > { %v559_v24 = vadd.f32 %v558_v21, %v2899_v54  ;;  %v799_v25 = vadd.f32 %v798_v22, %v2899_v54  ;;  %v560_v26 = vpop.f32.mrb[17].mxu0  ;;  %v800_v27 = vpop.f32.mrb[17].mxu1 }
 0x168   : > { %v561_v28 = vadd.f32 %v560_v26, %v2902_v60  ;;  %v801_v29 = vadd.f32 %v800_v27, %v2902_v60  ;;  %v562_v30 = vpop.f32.mrb[18].mxu0  ;;  %v802_v32 = vpop.f32.mrb[18].mxu1 }
 0x169   : > { %v563_v33 = vadd.f32 %v562_v30, %v2899_v54  ;;  %v803_v34 = vadd.f32 %v802_v32, %v2899_v54  ;;  %v564_v35 = vpop.f32.mrb[19].mxu0  ;;  %v804_v36 = vpop.f32.mrb[19].mxu1 }
 0x16a   : > { %v2157_v37 = vpack.c.bf16 %v561_v28, %v559_v24  ;;  %v2253_v38 = vpack.c.bf16 %v801_v29, %v799_v25  ;;  %v565_v40 = vadd.f32 %v564_v35, %v2902_v60  ;;  %v805_v41 = vadd.f32 %v804_v36, %v2902_v60 }
 0x16b   : > { %v351_v28 = vsub.s32 2, %v2889_v31 }
 0x16c   : > { %1782 = vst [vmem:[%s2911_s22 + $0x60] sm:$0xff] %v2157_v37  ;;  %1878 = vst [vmem:[%s2911_s22 + $0x2a0] sm:$0xff] %v2253_v38  ;;  %v2159_v42 = vpack.c.bf16 %v565_v40, %v563_v33  ;;  %v2255_v43 = vpack.c.bf16 %v805_v41, %v803_v34 }
 0x16e   : > { %1784 = vst [vmem:[%s2911_s22 + $0x6c] sm:$0xff] %v2159_v42  ;;  %1880 = vst [vmem:[%s2911_s22 + $0x2ac] sm:$0xff] %v2255_v43  ;;  %v568_v44 = vpop.f32.mrb[20].mxu0  ;;  %v808_v45 = vpop.f32.mrb[20].mxu1  ;;  %v3003_v42 = vrot.slane %v2895_v47, %v351_v28 }
 0x16f   : > { %v569_v46 = vadd.f32 %v568_v44, %v2899_v54  ;;  %v809_v48 = vadd.f32 %v808_v45, %v2899_v54  ;;  %v570_v49 = vpop.f32.mrb[21].mxu0  ;;  %v810_v50 = vpop.f32.mrb[21].mxu1 }
 0x170   : > { %v571_v51 = vadd.f32 %v570_v49, %v2902_v60  ;;  %v811_v52 = vadd.f32 %v810_v50, %v2902_v60  ;;  %v572_v53 = vpop.f32.mrb[22].mxu0  ;;  %v812_v55 = vpop.f32.mrb[22].mxu1 }
 0x171   : > { %v573_v56 = vadd.f32 %v572_v53, %v2899_v54  ;;  %v813_v57 = vadd.f32 %v812_v55, %v2899_v54  ;;  %v574_v58 = vpop.f32.mrb[23].mxu0  ;;  %v814_v59 = vpop.f32.mrb[23].mxu1 }
 0x172   : > { %v2161_v61 = vpack.c.bf16 %v571_v51, %v569_v46  ;;  %v2257_v62 = vpack.c.bf16 %v811_v52, %v809_v48  ;;  %v575_v63 = vadd.f32 %v574_v58, %v2902_v60  ;;  %v815_v23 = vadd.f32 %v814_v59, %v2902_v60 }
 0x174   : > { %1786 = vst [vmem:[%s2911_s22 + $0x78] sm:$0xff] %v2161_v61  ;;  %1882 = vst [vmem:[%s2911_s22 + $0x2b8] sm:$0xff] %v2257_v62  ;;  %v2163_v39 = vpack.c.bf16 %v575_v63, %v573_v56  ;;  %v2259_v0 = vpack.c.bf16 %v815_v23, %v813_v57 }
 0x176   : > { %1788 = vst [vmem:[%s2911_s22 + $0x84] sm:$0xff] %v2163_v39  ;;  %1884 = vst [vmem:[%s2911_s22 + $0x2c4] sm:$0xff] %v2259_v0  ;;  %v578_v1 = vpop.f32.mrb[24].mxu0  ;;  %v818_v2 = vpop.f32.mrb[24].mxu1 }
 0x177   : > { %v579_v3 = vadd.f32 %v578_v1, %v2899_v54  ;;  %v819_v4 = vadd.f32 %v818_v2, %v2899_v54  ;;  %v580_v5 = vpop.f32.mrb[25].mxu0  ;;  %v820_v6 = vpop.f32.mrb[25].mxu1 }
 0x178   : > { %v581_v7 = vadd.f32 %v580_v5, %v2902_v60  ;;  %v821_v8 = vadd.f32 %v820_v6, %v2902_v60  ;;  %v582_v9 = vpop.f32.mrb[26].mxu0  ;;  %v822_v10 = vpop.f32.mrb[26].mxu1 }
 0x179   : > { %v583_v11 = vadd.f32 %v582_v9, %v2899_v54  ;;  %v823_v12 = vadd.f32 %v822_v10, %v2899_v54  ;;  %v584_v13 = vpop.f32.mrb[27].mxu0  ;;  %v824_v14 = vpop.f32.mrb[27].mxu1 }
 0x17a   : > { %v2165_v15 = vpack.c.bf16 %v581_v7, %v579_v3  ;;  %v2261_v16 = vpack.c.bf16 %v821_v8, %v819_v4  ;;  %v585_v17 = vadd.f32 %v584_v13, %v2902_v60  ;;  %v825_v18 = vadd.f32 %v824_v14, %v2902_v60 }
 0x17c   : > { %1790 = vst [vmem:[%s2911_s22 + $0x90] sm:$0xff] %v2165_v15  ;;  %1886 = vst [vmem:[%s2911_s22 + $0x2d0] sm:$0xff] %v2261_v16  ;;  %v2167_v19 = vpack.c.bf16 %v585_v17, %v583_v11  ;;  %v2263_v20 = vpack.c.bf16 %v825_v18, %v823_v12 }
 0x17e   : > { %1792 = vst [vmem:[%s2911_s22 + $0x9c] sm:$0xff] %v2167_v19  ;;  %1888 = vst [vmem:[%s2911_s22 + $0x2dc] sm:$0xff] %v2263_v20  ;;  %v588_v21 = vpop.f32.mrb[28].mxu0  ;;  %v828_v22 = vpop.f32.mrb[28].mxu1 }
 0x17f   : > { %v589_v24 = vadd.f32 %v588_v21, %v2899_v54  ;;  %v829_v25 = vadd.f32 %v828_v22, %v2899_v54  ;;  %v590_v26 = vpop.f32.mrb[29].mxu0  ;;  %v830_v27 = vpop.f32.mrb[29].mxu1 }
 0x180   : > { %v591_v29 = vadd.f32 %v590_v26, %v2902_v60  ;;  %v831_v30 = vadd.f32 %v830_v27, %v2902_v60  ;;  %v592_v32 = vpop.f32.mrb[30].mxu0  ;;  %v832_v33 = vpop.f32.mrb[30].mxu1 }
 0x181   : > { %v593_v34 = vadd.f32 %v592_v32, %v2899_v54  ;;  %v833_v35 = vadd.f32 %v832_v33, %v2899_v54  ;;  %v594_v36 = vpop.f32.mrb[31].mxu0  ;;  %v834_v37 = vpop.f32.mrb[31].mxu1 }
 0x182   : > { %v2169_v38 = vpack.c.bf16 %v591_v29, %v589_v24  ;;  %v2265_v40 = vpack.c.bf16 %v831_v30, %v829_v25  ;;  %v595_v41 = vadd.f32 %v594_v36, %v2902_v60  ;;  %v835_v31 = vadd.f32 %v834_v37, %v2902_v60 }
 0x184   : > { %1794 = vst [vmem:[%s2911_s22 + $0xa8] sm:$0xff] %v2169_v38  ;;  %1890 = vst [vmem:[%s2911_s22 + $0x2e8] sm:$0xff] %v2265_v40  ;;  %v2171_v43 = vpack.c.bf16 %v595_v41, %v593_v34  ;;  %v2267_v44 = vpack.c.bf16 %v835_v31, %v833_v35 }
 0x186   : > { %1796 = vst [vmem:[%s2911_s22 + $0xb4] sm:$0xff] %v2171_v43  ;;  %1892 = vst [vmem:[%s2911_s22 + $0x2f4] sm:$0xff] %v2267_v44  ;;  %v598_v45 = vpop.f32.mrb[32].mxu0  ;;  %v2327_v46 = vpop.f32.mrb[32].mxu1 }
 0x187   : > { %v599_v48 = vadd.f32 %v598_v45, %v2899_v54  ;;  %v880_v49 = vadd.f32 %v2327_v46, %v3003_v42  ;;  %v600_v50 = vpop.f32.mrb[33].mxu0  ;;  %v871_v51 = vpop.f32.mrb[33].mxu1 }
 0x188   : > { %v601_v52 = vadd.f32 %v600_v50, %v2902_v60  ;;  %v872_v47 = vadd.f32 %v871_v51, %v3003_v42  ;;  %v602_v53 = vpop.f32.mrb[34].mxu0  ;;  %v2328_v55 = vpop.f32.mrb[34].mxu1 }
 0x189   : > { %v2146_v56 = vpack.c.bf16 %v880_v49, %v880_v49  ;;  %v603_v57 = vadd.f32 %v602_v53, %v2899_v54  ;;  %v883_v58 = vadd.f32 %v2328_v55, %v3003_v42  ;;  %v604_v59 = vpop.f32.mrb[35].mxu0  ;;  %v874_v61 = vpop.f32.mrb[35].mxu1 }
 0x18a   : > { %v2173_v62 = vpack.c.bf16 %v601_v52, %v599_v48  ;;  %v2142_v63 = vpack.c.bf16 %v872_v47, %v872_v47  ;;  %v605_v23 = vadd.f32 %v604_v59, %v2902_v60  ;;  %v875_v39 = vadd.f32 %v874_v61, %v3003_v42 }
 0x18b   : > { %1771 = vst [vmem:[%s2911_s22 + $0x20] sm:$0xf] %v2146_v56  ;;  %v2148_v0 = vpack.c.bf16 %v883_v58, %v883_v58 }
 0x18c   : > { %1798 = vst [vmem:[%s2911_s22 + $0xc0] sm:$0xff] %v2173_v62  ;;  %1767 = vst [vmem:[%s2911_s22 + $0x8] sm:$0xf] %v2142_v63  ;;  %v2175_v1 = vpack.c.bf16 %v605_v23, %v603_v57  ;;  %v2144_v2 = vpack.c.bf16 %v875_v39, %v875_v39 }
 0x18d   : > { %1773 = vst [vmem:[%s2911_s22 + $0x2c] sm:$0xf] %v2148_v0 }
 0x18e   : > { %1800 = vst [vmem:[%s2911_s22 + $0xcc] sm:$0xff] %v2175_v1  ;;  %1769 = vst [vmem:[%s2911_s22 + $0x14] sm:$0xf] %v2144_v2  ;;  %v608_v3 = vpop.f32.mrb[36].mxu0  ;;  %v2331_v4 = vpop.f32.mrb[36].mxu1 }
 0x18f   : > { %v609_v5 = vadd.f32 %v608_v3, %v2899_v54  ;;  %v896_v6 = vadd.f32 %v2331_v4, %v3003_v42  ;;  %v610_v7 = vpop.f32.mrb[37].mxu0  ;;  %v887_v8 = vpop.f32.mrb[37].mxu1 }
 0x190   : > { %v611_v9 = vadd.f32 %v610_v7, %v2902_v60  ;;  %v888_v10 = vadd.f32 %v887_v8, %v3003_v42  ;;  %v612_v11 = vpop.f32.mrb[38].mxu0  ;;  %v2332_v12 = vpop.f32.mrb[38].mxu1 }
 0x191   : > { %v2154_v13 = vpack.c.bf16 %v896_v6, %v896_v6  ;;  %v613_v14 = vadd.f32 %v612_v11, %v2899_v54  ;;  %v899_v15 = vadd.f32 %v2332_v12, %v3003_v42  ;;  %v614_v16 = vpop.f32.mrb[39].mxu0  ;;  %v890_v17 = vpop.f32.mrb[39].mxu1 }
 0x192   : > { %v2177_v18 = vpack.c.bf16 %v611_v9, %v609_v5  ;;  %v2150_v19 = vpack.c.bf16 %v888_v10, %v888_v10  ;;  %v615_v20 = vadd.f32 %v614_v16, %v2902_v60  ;;  %v891_v21 = vadd.f32 %v890_v17, %v3003_v42 }
 0x193   : > { %1779 = vst [vmem:[%s2911_s22 + $0x50] sm:$0xf] %v2154_v13  ;;  %v2156_v22 = vpack.c.bf16 %v899_v15, %v899_v15 }
 0x194   : > { %1802 = vst [vmem:[%s2911_s22 + $0xd8] sm:$0xff] %v2177_v18  ;;  %1775 = vst [vmem:[%s2911_s22 + $0x38] sm:$0xf] %v2150_v19  ;;  %v2179_v24 = vpack.c.bf16 %v615_v20, %v613_v14  ;;  %v2152_v25 = vpack.c.bf16 %v891_v21, %v891_v21 }
 0x195   : > { %1781 = vst [vmem:[%s2911_s22 + $0x5c] sm:$0xf] %v2156_v22 }
 0x196   : > { %1804 = vst [vmem:[%s2911_s22 + $0xe4] sm:$0xff] %v2179_v24  ;;  %1777 = vst [vmem:[%s2911_s22 + $0x44] sm:$0xf] %v2152_v25  ;;  %v618_v26 = vpop.f32.mrb[40].mxu0  ;;  %v2335_v27 = vpop.f32.mrb[40].mxu1 }
 0x197   : > { %v619_v28 = vadd.f32 %v618_v26, %v2899_v54  ;;  %v912_v29 = vadd.f32 %v2335_v27, %v3003_v42  ;;  %v620_v30 = vpop.f32.mrb[41].mxu0  ;;  %v903_v32 = vpop.f32.mrb[41].mxu1 }
 0x198   : > { %v621_v33 = vadd.f32 %v620_v30, %v2902_v60  ;;  %v904_v34 = vadd.f32 %v903_v32, %v3003_v42  ;;  %v622_v35 = vpop.f32.mrb[42].mxu0  ;;  %v2336_v36 = vpop.f32.mrb[42].mxu1 }
 0x199   : > { %v2162_v37 = vpack.c.bf16 %v912_v29, %v912_v29  ;;  %v623_v38 = vadd.f32 %v622_v35, %v2899_v54  ;;  %v915_v40 = vadd.f32 %v2336_v36, %v3003_v42  ;;  %v624_v41 = vpop.f32.mrb[43].mxu0  ;;  %v906_v31 = vpop.f32.mrb[43].mxu1 }
 0x19a   : > { %v2181_v43 = vpack.c.bf16 %v621_v33, %v619_v28  ;;  %v2158_v44 = vpack.c.bf16 %v904_v34, %v904_v34  ;;  %v625_v45 = vadd.f32 %v624_v41, %v2902_v60  ;;  %v907_v46 = vadd.f32 %v906_v31, %v3003_v42 }
 0x19b   : > { %1787 = vst [vmem:[%s2911_s22 + $0x80] sm:$0xf] %v2162_v37  ;;  %v2164_v48 = vpack.c.bf16 %v915_v40, %v915_v40 }
 0x19c   : > { %1806 = vst [vmem:[%s2911_s22 + $0xf0] sm:$0xff] %v2181_v43  ;;  %1783 = vst [vmem:[%s2911_s22 + $0x68] sm:$0xf] %v2158_v44  ;;  %v2183_v49 = vpack.c.bf16 %v625_v45, %v623_v38  ;;  %v2160_v50 = vpack.c.bf16 %v907_v46, %v907_v46 }
 0x19d   : > { %1789 = vst [vmem:[%s2911_s22 + $0x8c] sm:$0xf] %v2164_v48 }
 0x19e   : > { %1808 = vst [vmem:[%s2911_s22 + $0xfc] sm:$0xff] %v2183_v49  ;;  %1785 = vst [vmem:[%s2911_s22 + $0x74] sm:$0xf] %v2160_v50  ;;  %v628_v51 = vpop.f32.mrb[44].mxu0  ;;  %v2339_v52 = vpop.f32.mrb[44].mxu1 }
 0x19f   : > { %v629_v47 = vadd.f32 %v628_v51, %v2899_v54  ;;  %v928_v53 = vadd.f32 %v2339_v52, %v3003_v42  ;;  %v630_v55 = vpop.f32.mrb[45].mxu0  ;;  %v919_v56 = vpop.f32.mrb[45].mxu1 }
 0x1a0   : > { %v631_v57 = vadd.f32 %v630_v55, %v2902_v60  ;;  %v920_v58 = vadd.f32 %v919_v56, %v3003_v42  ;;  %v632_v59 = vpop.f32.mrb[46].mxu0  ;;  %v2340_v61 = vpop.f32.mrb[46].mxu1 }
 0x1a1   : > { %v2170_v62 = vpack.c.bf16 %v928_v53, %v928_v53  ;;  %v633_v63 = vadd.f32 %v632_v59, %v2899_v54  ;;  %v931_v23 = vadd.f32 %v2340_v61, %v3003_v42  ;;  %v634_v39 = vpop.f32.mrb[47].mxu0  ;;  %v922_v0 = vpop.f32.mrb[47].mxu1 }
 0x1a2   : > { %v2185_v1 = vpack.c.bf16 %v631_v57, %v629_v47  ;;  %v2166_v2 = vpack.c.bf16 %v920_v58, %v920_v58  ;;  %v635_v3 = vadd.f32 %v634_v39, %v2902_v60  ;;  %v923_v4 = vadd.f32 %v922_v0, %v3003_v42 }
 0x1a3   : > { %1795 = vst [vmem:[%s2911_s22 + $0xb0] sm:$0xf] %v2170_v62  ;;  %v2172_v5 = vpack.c.bf16 %v931_v23, %v931_v23 }
 0x1a4   : > { %1810 = vst [vmem:[%s2911_s22 + $0x108] sm:$0xff] %v2185_v1  ;;  %1791 = vst [vmem:[%s2911_s22 + $0x98] sm:$0xf] %v2166_v2  ;;  %v2187_v6 = vpack.c.bf16 %v635_v3, %v633_v63  ;;  %v2168_v7 = vpack.c.bf16 %v923_v4, %v923_v4 }
 0x1a5   : > { %1797 = vst [vmem:[%s2911_s22 + $0xbc] sm:$0xf] %v2172_v5 }
 0x1a6   : > { %1812 = vst [vmem:[%s2911_s22 + $0x114] sm:$0xff] %v2187_v6  ;;  %1793 = vst [vmem:[%s2911_s22 + $0xa4] sm:$0xf] %v2168_v7  ;;  %v638_v8 = vpop.f32.mrb[48].mxu0  ;;  %v2343_v9 = vpop.f32.mrb[48].mxu1 }
 0x1a7   : > { %v639_v10 = vadd.f32 %v638_v8, %v2899_v54  ;;  %v944_v11 = vadd.f32 %v2343_v9, %v3003_v42  ;;  %v640_v12 = vpop.f32.mrb[49].mxu0  ;;  %v935_v13 = vpop.f32.mrb[49].mxu1 }
 0x1a8   : > { %v641_v14 = vadd.f32 %v640_v12, %v2902_v60  ;;  %v936_v15 = vadd.f32 %v935_v13, %v3003_v42  ;;  %v642_v16 = vpop.f32.mrb[50].mxu0  ;;  %v2344_v17 = vpop.f32.mrb[50].mxu1 }
 0x1a9   : > { %v2178_v18 = vpack.c.bf16 %v944_v11, %v944_v11  ;;  %v643_v19 = vadd.f32 %v642_v16, %v2899_v54  ;;  %v947_v20 = vadd.f32 %v2344_v17, %v3003_v42  ;;  %v644_v21 = vpop.f32.mrb[51].mxu0  ;;  %v938_v22 = vpop.f32.mrb[51].mxu1 }
 0x1aa   : > { %v2189_v24 = vpack.c.bf16 %v641_v14, %v639_v10  ;;  %v2174_v25 = vpack.c.bf16 %v936_v15, %v936_v15  ;;  %v645_v26 = vadd.f32 %v644_v21, %v2902_v60  ;;  %v939_v27 = vadd.f32 %v938_v22, %v3003_v42 }
 0x1ab   : > { %1803 = vst [vmem:[%s2911_s22 + $0xe0] sm:$0xf] %v2178_v18  ;;  %v2180_v28 = vpack.c.bf16 %v947_v20, %v947_v20 }
 0x1ac   : > { %1814 = vst [vmem:[%s2911_s22 + $0x120] sm:$0xff] %v2189_v24  ;;  %1799 = vst [vmem:[%s2911_s22 + $0xc8] sm:$0xf] %v2174_v25  ;;  %v2191_v29 = vpack.c.bf16 %v645_v26, %v643_v19  ;;  %v2176_v30 = vpack.c.bf16 %v939_v27, %v939_v27 }
 0x1ad   : > { %1805 = vst [vmem:[%s2911_s22 + $0xec] sm:$0xf] %v2180_v28 }
 0x1ae   : > { %1816 = vst [vmem:[%s2911_s22 + $0x12c] sm:$0xff] %v2191_v29  ;;  %1801 = vst [vmem:[%s2911_s22 + $0xd4] sm:$0xf] %v2176_v30  ;;  %v648_v32 = vpop.f32.mrb[52].mxu0  ;;  %v2347_v33 = vpop.f32.mrb[52].mxu1 }
 0x1af   : > { %v649_v34 = vadd.f32 %v648_v32, %v2899_v54  ;;  %v960_v35 = vadd.f32 %v2347_v33, %v3003_v42  ;;  %v650_v36 = vpop.f32.mrb[53].mxu0  ;;  %v951_v37 = vpop.f32.mrb[53].mxu1 }
 0x1b0   : > { %v651_v38 = vadd.f32 %v650_v36, %v2902_v60  ;;  %v952_v40 = vadd.f32 %v951_v37, %v3003_v42  ;;  %v652_v41 = vpop.f32.mrb[54].mxu0  ;;  %v2348_v31 = vpop.f32.mrb[54].mxu1 }
 0x1b1   : > { %v2186_v43 = vpack.c.bf16 %v960_v35, %v960_v35  ;;  %v653_v44 = vadd.f32 %v652_v41, %v2899_v54  ;;  %v963_v45 = vadd.f32 %v2348_v31, %v3003_v42  ;;  %v654_v46 = vpop.f32.mrb[55].mxu0  ;;  %v954_v48 = vpop.f32.mrb[55].mxu1 }
 0x1b2   : > { %v2193_v49 = vpack.c.bf16 %v651_v38, %v649_v34  ;;  %v2182_v50 = vpack.c.bf16 %v952_v40, %v952_v40  ;;  %v655_v51 = vadd.f32 %v654_v46, %v2902_v60  ;;  %v955_v52 = vadd.f32 %v954_v48, %v3003_v42 }
 0x1b3   : > { %1811 = vst [vmem:[%s2911_s22 + $0x110] sm:$0xf] %v2186_v43  ;;  %v2188_v47 = vpack.c.bf16 %v963_v45, %v963_v45 }
 0x1b4   : > { %1818 = vst [vmem:[%s2911_s22 + $0x138] sm:$0xff] %v2193_v49  ;;  %1807 = vst [vmem:[%s2911_s22 + $0xf8] sm:$0xf] %v2182_v50  ;;  %v2195_v53 = vpack.c.bf16 %v655_v51, %v653_v44  ;;  %v2184_v55 = vpack.c.bf16 %v955_v52, %v955_v52 }
 0x1b5   : > { %1813 = vst [vmem:[%s2911_s22 + $0x11c] sm:$0xf] %v2188_v47 }
 0x1b6   : > { %1820 = vst [vmem:[%s2911_s22 + $0x144] sm:$0xff] %v2195_v53  ;;  %1809 = vst [vmem:[%s2911_s22 + $0x104] sm:$0xf] %v2184_v55  ;;  %v658_v56 = vpop.f32.mrb[56].mxu0  ;;  %v2351_v57 = vpop.f32.mrb[56].mxu1 }
 0x1b7   : > { %v659_v58 = vadd.f32 %v658_v56, %v2899_v54  ;;  %v976_v59 = vadd.f32 %v2351_v57, %v3003_v42  ;;  %v660_v61 = vpop.f32.mrb[57].mxu0  ;;  %v967_v62 = vpop.f32.mrb[57].mxu1 }
 0x1b8   : > { %v661_v63 = vadd.f32 %v660_v61, %v2902_v60  ;;  %v968_v23 = vadd.f32 %v967_v62, %v3003_v42  ;;  %v662_v39 = vpop.f32.mrb[58].mxu0  ;;  %v2352_v0 = vpop.f32.mrb[58].mxu1 }
 0x1b9   : > { %v2194_v1 = vpack.c.bf16 %v976_v59, %v976_v59  ;;  %v663_v2 = vadd.f32 %v662_v39, %v2899_v54  ;;  %v979_v3 = vadd.f32 %v2352_v0, %v3003_v42  ;;  %v664_v4 = vpop.f32.mrb[59].mxu0  ;;  %v970_v5 = vpop.f32.mrb[59].mxu1 }
 0x1ba   : > { %v2197_v6 = vpack.c.bf16 %v661_v63, %v659_v58  ;;  %v2190_v7 = vpack.c.bf16 %v968_v23, %v968_v23  ;;  %v665_v8 = vadd.f32 %v664_v4, %v2902_v60  ;;  %v971_v9 = vadd.f32 %v970_v5, %v3003_v42 }
 0x1bb   : > { %1819 = vst [vmem:[%s2911_s22 + $0x140] sm:$0xf] %v2194_v1  ;;  %v2196_v10 = vpack.c.bf16 %v979_v3, %v979_v3 }
 0x1bc   : > { %1822 = vst [vmem:[%s2911_s22 + $0x150] sm:$0xff] %v2197_v6  ;;  %1815 = vst [vmem:[%s2911_s22 + $0x128] sm:$0xf] %v2190_v7  ;;  %v2199_v11 = vpack.c.bf16 %v665_v8, %v663_v2  ;;  %v2192_v12 = vpack.c.bf16 %v971_v9, %v971_v9 }
 0x1bd   : > { %1821 = vst [vmem:[%s2911_s22 + $0x14c] sm:$0xf] %v2196_v10 }
 0x1be   : > { %1824 = vst [vmem:[%s2911_s22 + $0x15c] sm:$0xff] %v2199_v11  ;;  %1817 = vst [vmem:[%s2911_s22 + $0x134] sm:$0xf] %v2192_v12  ;;  %v668_v13 = vpop.f32.mrb[60].mxu0  ;;  %v2355_v14 = vpop.f32.mrb[60].mxu1 }
 0x1bf   : > { %v669_v15 = vadd.f32 %v668_v13, %v2899_v54  ;;  %v992_v16 = vadd.f32 %v2355_v14, %v3003_v42  ;;  %v670_v17 = vpop.f32.mrb[61].mxu0  ;;  %v983_v18 = vpop.f32.mrb[61].mxu1 }
 0x1c0   : > { %v671_v19 = vadd.f32 %v670_v17, %v2902_v60  ;;  %v984_v20 = vadd.f32 %v983_v18, %v3003_v42  ;;  %v672_v21 = vpop.f32.mrb[62].mxu0  ;;  %v2356_v22 = vpop.f32.mrb[62].mxu1 }
 0x1c1   : > { %v2202_v24 = vpack.c.bf16 %v992_v16, %v992_v16  ;;  %v673_v25 = vadd.f32 %v672_v21, %v2899_v54  ;;  %v995_v26 = vadd.f32 %v2356_v22, %v3003_v42  ;;  %v674_v27 = vpop.f32.mrb[63].mxu0  ;;  %v986_v28 = vpop.f32.mrb[63].mxu1 }
 0x1c2   : > { %v2201_v29 = vpack.c.bf16 %v671_v19, %v669_v15  ;;  %v2198_v30 = vpack.c.bf16 %v984_v20, %v984_v20  ;;  %v675_v32 = vadd.f32 %v674_v27, %v2902_v60  ;;  %v987_v33 = vadd.f32 %v986_v28, %v3003_v42 }
 0x1c3   : > { %1827 = vst [vmem:[%s2911_s22 + $0x170] sm:$0xf] %v2202_v24  ;;  %v2204_v34 = vpack.c.bf16 %v995_v26, %v995_v26 }
 0x1c4   : > { %1826 = vst [vmem:[%s2911_s22 + $0x168] sm:$0xff] %v2201_v29  ;;  %1823 = vst [vmem:[%s2911_s22 + $0x158] sm:$0xf] %v2198_v30  ;;  %v2203_v35 = vpack.c.bf16 %v675_v32, %v673_v25  ;;  %v2200_v36 = vpack.c.bf16 %v987_v33, %v987_v33 }
 0x1c5   : > { %1829 = vst [vmem:[%s2911_s22 + $0x17c] sm:$0xf] %v2204_v34 }
 0x1c6   : > { %1828 = vst [vmem:[%s2911_s22 + $0x174] sm:$0xff] %v2203_v35  ;;  %1825 = vst [vmem:[%s2911_s22 + $0x164] sm:$0xf] %v2200_v36  ;;  %v678_v37 = vpop.f32.mrb[64].mxu0  ;;  %v2359_v38 = vpop.f32.mrb[64].mxu1 }
 0x1c7   : > { %v679_v40 = vadd.f32 %v678_v37, %v2899_v54  ;;  %v1008_v41 = vadd.f32 %v2359_v38, %v3003_v42  ;;  %v680_v31 = vpop.f32.mrb[65].mxu0  ;;  %v999_v43 = vpop.f32.mrb[65].mxu1 }
 0x1c8   : > { %v681_v44 = vadd.f32 %v680_v31, %v2902_v60  ;;  %v1000_v45 = vadd.f32 %v999_v43, %v3003_v42  ;;  %v682_v46 = vpop.f32.mrb[66].mxu0  ;;  %v2360_v48 = vpop.f32.mrb[66].mxu1 }
 0x1c9   : > { %v2210_v49 = vpack.c.bf16 %v1008_v41, %v1008_v41  ;;  %v683_v50 = vadd.f32 %v682_v46, %v2899_v54  ;;  %v1011_v51 = vadd.f32 %v2360_v48, %v3003_v42  ;;  %v684_v52 = vpop.f32.mrb[67].mxu0  ;;  %v1002_v47 = vpop.f32.mrb[67].mxu1 }
 0x1ca   : > { %v2205_v53 = vpack.c.bf16 %v681_v44, %v679_v40  ;;  %v2206_v55 = vpack.c.bf16 %v1000_v45, %v1000_v45  ;;  %v685_v56 = vadd.f32 %v684_v52, %v2902_v60  ;;  %v1003_v57 = vadd.f32 %v1002_v47, %v3003_v42 }
 0x1cb   : > { %1835 = vst [vmem:[%s2911_s22 + $0x1a0] sm:$0xf] %v2210_v49  ;;  %v2212_v58 = vpack.c.bf16 %v1011_v51, %v1011_v51 }
 0x1cc   : > { %1830 = vst [vmem:[%s2911_s22 + $0x180] sm:$0xff] %v2205_v53  ;;  %1831 = vst [vmem:[%s2911_s22 + $0x188] sm:$0xf] %v2206_v55  ;;  %v2207_v59 = vpack.c.bf16 %v685_v56, %v683_v50  ;;  %v2208_v61 = vpack.c.bf16 %v1003_v57, %v1003_v57 }
 0x1cd   : > { %1837 = vst [vmem:[%s2911_s22 + $0x1ac] sm:$0xf] %v2212_v58 }
 0x1ce   : > { %1832 = vst [vmem:[%s2911_s22 + $0x18c] sm:$0xff] %v2207_v59  ;;  %1833 = vst [vmem:[%s2911_s22 + $0x194] sm:$0xf] %v2208_v61  ;;  %v688_v62 = vpop.f32.mrb[68].mxu0  ;;  %v2363_v63 = vpop.f32.mrb[68].mxu1 }
 0x1cf   : > { %v689_v23 = vadd.f32 %v688_v62, %v2899_v54  ;;  %v1024_v39 = vadd.f32 %v2363_v63, %v3003_v42  ;;  %v690_v0 = vpop.f32.mrb[69].mxu0  ;;  %v1015_v1 = vpop.f32.mrb[69].mxu1 }
 0x1d0   : > { %v691_v2 = vadd.f32 %v690_v0, %v2902_v60  ;;  %v1016_v3 = vadd.f32 %v1015_v1, %v3003_v42  ;;  %v692_v4 = vpop.f32.mrb[70].mxu0  ;;  %v2364_v5 = vpop.f32.mrb[70].mxu1 }
 0x1d1   : > { %v2218_v6 = vpack.c.bf16 %v1024_v39, %v1024_v39  ;;  %v693_v7 = vadd.f32 %v692_v4, %v2899_v54  ;;  %v1027_v8 = vadd.f32 %v2364_v5, %v3003_v42  ;;  %v694_v9 = vpop.f32.mrb[71].mxu0  ;;  %v1018_v10 = vpop.f32.mrb[71].mxu1 }
 0x1d2   : > { %v2209_v11 = vpack.c.bf16 %v691_v2, %v689_v23  ;;  %v2214_v12 = vpack.c.bf16 %v1016_v3, %v1016_v3  ;;  %v695_v13 = vadd.f32 %v694_v9, %v2902_v60  ;;  %v1019_v14 = vadd.f32 %v1018_v10, %v3003_v42 }
 0x1d3   : > { %1843 = vst [vmem:[%s2911_s22 + $0x1d0] sm:$0xf] %v2218_v6  ;;  %v2220_v15 = vpack.c.bf16 %v1027_v8, %v1027_v8 }
 0x1d4   : > { %1834 = vst [vmem:[%s2911_s22 + $0x198] sm:$0xff] %v2209_v11  ;;  %1839 = vst [vmem:[%s2911_s22 + $0x1b8] sm:$0xf] %v2214_v12  ;;  %v2211_v16 = vpack.c.bf16 %v695_v13, %v693_v7  ;;  %v2216_v17 = vpack.c.bf16 %v1019_v14, %v1019_v14 }
 0x1d5   : > { %1845 = vst [vmem:[%s2911_s22 + $0x1dc] sm:$0xf] %v2220_v15 }
 0x1d6   : > { %1836 = vst [vmem:[%s2911_s22 + $0x1a4] sm:$0xff] %v2211_v16  ;;  %1841 = vst [vmem:[%s2911_s22 + $0x1c4] sm:$0xf] %v2216_v17  ;;  %v698_v18 = vpop.f32.mrb[72].mxu0  ;;  %v2367_v19 = vpop.f32.mrb[72].mxu1 }
 0x1d7   : > { %v699_v20 = vadd.f32 %v698_v18, %v2899_v54  ;;  %v1040_v21 = vadd.f32 %v2367_v19, %v3003_v42  ;;  %v700_v22 = vpop.f32.mrb[73].mxu0  ;;  %v1031_v24 = vpop.f32.mrb[73].mxu1 }
 0x1d8   : > { %v701_v25 = vadd.f32 %v700_v22, %v2902_v60  ;;  %v1032_v26 = vadd.f32 %v1031_v24, %v3003_v42  ;;  %v702_v27 = vpop.f32.mrb[74].mxu0  ;;  %v2368_v28 = vpop.f32.mrb[74].mxu1 }
 0x1d9   : > { %v2226_v29 = vpack.c.bf16 %v1040_v21, %v1040_v21  ;;  %v703_v30 = vadd.f32 %v702_v27, %v2899_v54  ;;  %v1043_v32 = vadd.f32 %v2368_v28, %v3003_v42  ;;  %v704_v33 = vpop.f32.mrb[75].mxu0  ;;  %v1034_v34 = vpop.f32.mrb[75].mxu1 }
 0x1da   : > { %v2213_v35 = vpack.c.bf16 %v701_v25, %v699_v20  ;;  %v2222_v36 = vpack.c.bf16 %v1032_v26, %v1032_v26  ;;  %v705_v37 = vadd.f32 %v704_v33, %v2902_v60  ;;  %v1035_v38 = vadd.f32 %v1034_v34, %v3003_v42 }
 0x1db   : > { %1851 = vst [vmem:[%s2911_s22 + $0x200] sm:$0xf] %v2226_v29  ;;  %v2228_v40 = vpack.c.bf16 %v1043_v32, %v1043_v32 }
 0x1dc   : > { %1838 = vst [vmem:[%s2911_s22 + $0x1b0] sm:$0xff] %v2213_v35  ;;  %1847 = vst [vmem:[%s2911_s22 + $0x1e8] sm:$0xf] %v2222_v36  ;;  %v2215_v41 = vpack.c.bf16 %v705_v37, %v703_v30  ;;  %v2224_v31 = vpack.c.bf16 %v1035_v38, %v1035_v38 }
 0x1dd   : > { %1853 = vst [vmem:[%s2911_s22 + $0x20c] sm:$0xf] %v2228_v40 }
 0x1de   : > { %1840 = vst [vmem:[%s2911_s22 + $0x1bc] sm:$0xff] %v2215_v41  ;;  %1849 = vst [vmem:[%s2911_s22 + $0x1f4] sm:$0xf] %v2224_v31  ;;  %v708_v43 = vpop.f32.mrb[76].mxu0  ;;  %v2371_v44 = vpop.f32.mrb[76].mxu1 }
 0x1df   : > { %v709_v45 = vadd.f32 %v708_v43, %v2899_v54  ;;  %v1056_v46 = vadd.f32 %v2371_v44, %v3003_v42  ;;  %v710_v48 = vpop.f32.mrb[77].mxu0  ;;  %v1047_v49 = vpop.f32.mrb[77].mxu1 }
 0x1e0   : > { %v711_v50 = vadd.f32 %v710_v48, %v2902_v60  ;;  %v1048_v51 = vadd.f32 %v1047_v49, %v3003_v42  ;;  %v712_v52 = vpop.f32.mrb[78].mxu0  ;;  %v2372_v47 = vpop.f32.mrb[78].mxu1 }
 0x1e1   : > { %v2234_v53 = vpack.c.bf16 %v1056_v46, %v1056_v46  ;;  %v713_v55 = vadd.f32 %v712_v52, %v2899_v54  ;;  %v1059_v56 = vadd.f32 %v2372_v47, %v3003_v42  ;;  %v714_v57 = vpop.f32.mrb[79].mxu0  ;;  %v1050_v58 = vpop.f32.mrb[79].mxu1 }
 0x1e2   : > { %v2217_v59 = vpack.c.bf16 %v711_v50, %v709_v45  ;;  %v2230_v61 = vpack.c.bf16 %v1048_v51, %v1048_v51  ;;  %v715_v62 = vadd.f32 %v714_v57, %v2902_v60  ;;  %v1051_v63 = vadd.f32 %v1050_v58, %v3003_v42 }
 0x1e3   : > { %1859 = vst [vmem:[%s2911_s22 + $0x230] sm:$0xf] %v2234_v53  ;;  %v2236_v23 = vpack.c.bf16 %v1059_v56, %v1059_v56 }
 0x1e4   : > { %1842 = vst [vmem:[%s2911_s22 + $0x1c8] sm:$0xff] %v2217_v59  ;;  %1855 = vst [vmem:[%s2911_s22 + $0x218] sm:$0xf] %v2230_v61  ;;  %v2219_v39 = vpack.c.bf16 %v715_v62, %v713_v55  ;;  %v2232_v0 = vpack.c.bf16 %v1051_v63, %v1051_v63 }
 0x1e5   : > { %1861 = vst [vmem:[%s2911_s22 + $0x23c] sm:$0xf] %v2236_v23 }
 0x1e6   : > { %1844 = vst [vmem:[%s2911_s22 + $0x1d4] sm:$0xff] %v2219_v39  ;;  %1857 = vst [vmem:[%s2911_s22 + $0x224] sm:$0xf] %v2232_v0  ;;  %v718_v1 = vpop.f32.mrb[80].mxu0  ;;  %v2375_v2 = vpop.f32.mrb[80].mxu1 }
 0x1e7   : > { %v719_v3 = vadd.f32 %v718_v1, %v2899_v54  ;;  %v1072_v4 = vadd.f32 %v2375_v2, %v3003_v42  ;;  %v720_v5 = vpop.f32.mrb[81].mxu0  ;;  %v1063_v6 = vpop.f32.mrb[81].mxu1 }
 0x1e8   : > { %v721_v7 = vadd.f32 %v720_v5, %v2902_v60  ;;  %v1064_v8 = vadd.f32 %v1063_v6, %v3003_v42  ;;  %v722_v9 = vpop.f32.mrb[82].mxu0  ;;  %v2376_v10 = vpop.f32.mrb[82].mxu1 }
 0x1e9   : > { %v2242_v11 = vpack.c.bf16 %v1072_v4, %v1072_v4  ;;  %v723_v12 = vadd.f32 %v722_v9, %v2899_v54  ;;  %v1075_v13 = vadd.f32 %v2376_v10, %v3003_v42  ;;  %v724_v14 = vpop.f32.mrb[83].mxu0  ;;  %v1066_v15 = vpop.f32.mrb[83].mxu1 }
 0x1ea   : > { %v2221_v16 = vpack.c.bf16 %v721_v7, %v719_v3  ;;  %v2238_v17 = vpack.c.bf16 %v1064_v8, %v1064_v8  ;;  %v725_v18 = vadd.f32 %v724_v14, %v2902_v60  ;;  %v1067_v19 = vadd.f32 %v1066_v15, %v3003_v42 }
 0x1eb   : > { %1867 = vst [vmem:[%s2911_s22 + $0x260] sm:$0xf] %v2242_v11  ;;  %v2244_v20 = vpack.c.bf16 %v1075_v13, %v1075_v13 }
 0x1ec   : > { %1846 = vst [vmem:[%s2911_s22 + $0x1e0] sm:$0xff] %v2221_v16  ;;  %1863 = vst [vmem:[%s2911_s22 + $0x248] sm:$0xf] %v2238_v17  ;;  %v2223_v21 = vpack.c.bf16 %v725_v18, %v723_v12  ;;  %v2240_v22 = vpack.c.bf16 %v1067_v19, %v1067_v19 }
 0x1ed   : > { %1869 = vst [vmem:[%s2911_s22 + $0x26c] sm:$0xf] %v2244_v20 }
 0x1ee   : > { %1848 = vst [vmem:[%s2911_s22 + $0x1ec] sm:$0xff] %v2223_v21  ;;  %1865 = vst [vmem:[%s2911_s22 + $0x254] sm:$0xf] %v2240_v22  ;;  %v728_v24 = vpop.f32.mrb[84].mxu0  ;;  %v2379_v25 = vpop.f32.mrb[84].mxu1 }
 0x1ef   : > { %v729_v26 = vadd.f32 %v728_v24, %v2899_v54  ;;  %v1088_v27 = vadd.f32 %v2379_v25, %v3003_v42  ;;  %v730_v28 = vpop.f32.mrb[85].mxu0  ;;  %v1079_v29 = vpop.f32.mrb[85].mxu1 }
 0x1f0   : > { %v731_v30 = vadd.f32 %v730_v28, %v2902_v60  ;;  %v1080_v32 = vadd.f32 %v1079_v29, %v3003_v42  ;;  %v732_v33 = vpop.f32.mrb[86].mxu0  ;;  %v2380_v34 = vpop.f32.mrb[86].mxu1 }
 0x1f1   : > { %v2250_v35 = vpack.c.bf16 %v1088_v27, %v1088_v27  ;;  %v733_v36 = vadd.f32 %v732_v33, %v2899_v54  ;;  %v1091_v37 = vadd.f32 %v2380_v34, %v3003_v42  ;;  %v734_v38 = vpop.f32.mrb[87].mxu0  ;;  %v1082_v40 = vpop.f32.mrb[87].mxu1 }
 0x1f2   : > { %v2225_v41 = vpack.c.bf16 %v731_v30, %v729_v26  ;;  %v2246_v31 = vpack.c.bf16 %v1080_v32, %v1080_v32  ;;  %v735_v43 = vadd.f32 %v734_v38, %v2902_v60  ;;  %v1083_v44 = vadd.f32 %v1082_v40, %v3003_v42 }
 0x1f3   : > { %1875 = vst [vmem:[%s2911_s22 + $0x290] sm:$0xf] %v2250_v35  ;;  %v2252_v45 = vpack.c.bf16 %v1091_v37, %v1091_v37 }
 0x1f4   : > { %1850 = vst [vmem:[%s2911_s22 + $0x1f8] sm:$0xff] %v2225_v41  ;;  %1871 = vst [vmem:[%s2911_s22 + $0x278] sm:$0xf] %v2246_v31  ;;  %v2227_v46 = vpack.c.bf16 %v735_v43, %v733_v36  ;;  %v2248_v48 = vpack.c.bf16 %v1083_v44, %v1083_v44 }
 0x1f5   : > { %1877 = vst [vmem:[%s2911_s22 + $0x29c] sm:$0xf] %v2252_v45 }
 0x1f6   : > { %1852 = vst [vmem:[%s2911_s22 + $0x204] sm:$0xff] %v2227_v46  ;;  %1873 = vst [vmem:[%s2911_s22 + $0x284] sm:$0xf] %v2248_v48  ;;  %v738_v49 = vpop.f32.mrb[88].mxu0  ;;  %v2383_v50 = vpop.f32.mrb[88].mxu1 }
 0x1f7   : > { %v739_v51 = vadd.f32 %v738_v49, %v2899_v54  ;;  %v1104_v52 = vadd.f32 %v2383_v50, %v3003_v42  ;;  %v740_v47 = vpop.f32.mrb[89].mxu0  ;;  %v1095_v53 = vpop.f32.mrb[89].mxu1 }
 0x1f8   : > { %v741_v55 = vadd.f32 %v740_v47, %v2902_v60  ;;  %v1096_v56 = vadd.f32 %v1095_v53, %v3003_v42  ;;  %v742_v57 = vpop.f32.mrb[90].mxu0  ;;  %v2384_v58 = vpop.f32.mrb[90].mxu1 }
 0x1f9   : > { %v2258_v59 = vpack.c.bf16 %v1104_v52, %v1104_v52  ;;  %v743_v61 = vadd.f32 %v742_v57, %v2899_v54  ;;  %v1107_v62 = vadd.f32 %v2384_v58, %v3003_v42  ;;  %v744_v63 = vpop.f32.mrb[91].mxu0  ;;  %v1098_v23 = vpop.f32.mrb[91].mxu1 }
 0x1fa   : > { %v2229_v39 = vpack.c.bf16 %v741_v55, %v739_v51  ;;  %v2254_v0 = vpack.c.bf16 %v1096_v56, %v1096_v56  ;;  %v745_v1 = vadd.f32 %v744_v63, %v2902_v60  ;;  %v1099_v2 = vadd.f32 %v1098_v23, %v3003_v42 }
 0x1fb   : > { %1883 = vst [vmem:[%s2911_s22 + $0x2c0] sm:$0xf] %v2258_v59  ;;  %v2260_v3 = vpack.c.bf16 %v1107_v62, %v1107_v62 }
 0x1fc   : > { %1854 = vst [vmem:[%s2911_s22 + $0x210] sm:$0xff] %v2229_v39  ;;  %1879 = vst [vmem:[%s2911_s22 + $0x2a8] sm:$0xf] %v2254_v0  ;;  %v2231_v4 = vpack.c.bf16 %v745_v1, %v743_v61  ;;  %v2256_v5 = vpack.c.bf16 %v1099_v2, %v1099_v2 }
 0x1fd   : > { %1885 = vst [vmem:[%s2911_s22 + $0x2cc] sm:$0xf] %v2260_v3 }
 0x1fe   : > { %1856 = vst [vmem:[%s2911_s22 + $0x21c] sm:$0xff] %v2231_v4  ;;  %1881 = vst [vmem:[%s2911_s22 + $0x2b4] sm:$0xf] %v2256_v5  ;;  %v748_v6 = vpop.f32.mrb[92].mxu0  ;;  %v2387_v7 = vpop.f32.mrb[92].mxu1 }
 0x1ff   : > { %v749_v8 = vadd.f32 %v748_v6, %v2899_v54  ;;  %v1120_v9 = vadd.f32 %v2387_v7, %v3003_v42  ;;  %v750_v10 = vpop.f32.mrb[93].mxu0  ;;  %v1111_v11 = vpop.f32.mrb[93].mxu1 }
 0x200   : > { %v751_v12 = vadd.f32 %v750_v10, %v2902_v60  ;;  %v1112_v13 = vadd.f32 %v1111_v11, %v3003_v42  ;;  %v752_v14 = vpop.f32.mrb[94].mxu0  ;;  %v2388_v15 = vpop.f32.mrb[94].mxu1 }
 0x201   : > { %v2266_v16 = vpack.c.bf16 %v1120_v9, %v1120_v9  ;;  %v753_v17 = vadd.f32 %v752_v14, %v2899_v54  ;;  %v1123_v18 = vadd.f32 %v2388_v15, %v3003_v42  ;;  %v754_v19 = vpop.f32.mrb[95].mxu0  ;;  %v1114_v20 = vpop.f32.mrb[95].mxu1 }
 0x202   : > { %v2233_v21 = vpack.c.bf16 %v751_v12, %v749_v8  ;;  %v2262_v22 = vpack.c.bf16 %v1112_v13, %v1112_v13  ;;  %v755_v24 = vadd.f32 %v754_v19, %v2902_v60  ;;  %v1115_v25 = vadd.f32 %v1114_v20, %v3003_v42 }
 0x203   : > { %1891 = vst [vmem:[%s2911_s22 + $0x2f0] sm:$0xf] %v2266_v16  ;;  %v2268_v26 = vpack.c.bf16 %v1123_v18, %v1123_v18 }
 0x204   : > { %1858 = vst [vmem:[%s2911_s22 + $0x228] sm:$0xff] %v2233_v21  ;;  %1887 = vst [vmem:[%s2911_s22 + $0x2d8] sm:$0xf] %v2262_v22  ;;  %v2235_v27 = vpack.c.bf16 %v755_v24, %v753_v17  ;;  %v2264_v28 = vpack.c.bf16 %v1115_v25, %v1115_v25 }
 0x205   : > { %1893 = vst [vmem:[%s2911_s22 + $0x2fc] sm:$0xf] %v2268_v26 }
 0x206   : > { %1860 = vst [vmem:[%s2911_s22 + $0x234] sm:$0xff] %v2235_v27  ;;  %1889 = vst [vmem:[%s2911_s22 + $0x2e4] sm:$0xf] %v2264_v28 }
 0x207 PF: > { %p14_p6 = scmp.ge.s32.totalorder %s2665_s23, 4   ;;  %s3262_s12 = smov %s2581_s13 }
 0x208   : > { %s3263_s13 = smov %s2585_s14  ;;  %s3264_s14 = smov %s2691_s11 }
 0x209   : > { %s3265_s15 = smov %s2665_s23  ;;  %16 = sbr.rel (!%p14_p6) target bundleno = 4 (0x4), region = 76 }
 0x210   :  { %1918 = vsyncpa [#allocation3], 1 }
 0x211   :  { %1920 = vsyncpa [#allocation3 + $0x1], 1 }
 0x212   :  { %1921 = vsyncpa [#allocation5], 1 }

// kernel: attention_forward.4
= control target key start
LH: loop header
LB: loop body
LE: loop exit
PB: predicated region body
PF: predicated region fallthrough
CT: control target
= control target key end

     0   :  { %s3973_s12 = smov 0   ;;  %s3975_s13 = smov 0   ;;  %s5039_s0 = inlined_call_operand.vmem [shape: bf16[2,2,512,64], index: 0, kind: input, shape index: {}]   ;;  %s5040_s1 = inlined_call_operand.vmem [shape: bf16[2,2,512,64], index: 1, kind: input, shape index: {}]   ;;  %s5041_s2 = inlined_call_operand.vmem [shape: bf16[2,2,512,64], index: 2, kind: input, shape index: {}]   ;;  %s5042_s3 = inlined_call_operand.vmem [shape: bf16[2,2,512,64], index: 3, kind: output, shape index: {}]  }
   0x1   :  { %s3977_s14 = smov 0   ;;  %s3979_s15 = smov 0  }
   0x2   :  { %s3981_s16 = smov 0   ;;  %s3983_s17 = smov 0  }
   0x3   :  { %s3985_s18 = smov 0  }
   0x4 LB: > { %s25_s19 = sadd.s32 1, %s3939_s15  ;;  %s28_s20 = sadd.s32 1, %s3943_s16  ;;  %s3951_s18 = sphi %s3985_s18, %s13_s18   ;;  %s3947_s17 = sphi %s3983_s17, %s5282_s17   ;;  %s3943_s16 = sphi %s3981_s16, %s5281_s16   ;;  %s3939_s15 = sphi %s3979_s15, %s5280_s15   ;;  %s3935_s14 = sphi %s3977_s14, %s5279_s14   ;;  %s3931_s13 = sphi %s3975_s13, %s5278_s13   ;;  %s3927_s12 = sphi %s3973_s12, %s5277_s12  }
   0x5   : > { %p26_p0 = scmp.ge.s32.totalorder %s25_s19, 2  ;;  %p2912_p1 = scmp.ge.s32.totalorder %s3951_s18, 1 }
   0x6   : > { %p205_p2 = scmp.lt.s32.totalorder %s3951_s18, 9  ;;  %s32_s21 = sadd.s32 1, %s3947_s17 }
   0x7   : > { %s5284_s19 = smov (%p26_p0, %s25_s19), 0  ;;  %s5286_s20 = smov (!%p26_p0, %s28_s20), %s3943_s16 }
   0x8   : > { %p206_p3 = pnand %p2912_p1, %p205_p2  ;;  %p30_p4 = scmp.ge.s32.totalorder %s5286_s20, 2 }
   0xa   : > { %s5288_s20 = smov (%p30_p4, %s5286_s20), 0  ;;  %s5290_s21 = smov (!%p30_p4, %s32_s21), %s3947_s17 }
   0xb   : > { %p34_p5 = scmp.ge.s32.totalorder %s5290_s21, 2  ;;  %209 = sbr.rel (%p206_p3) target bundleno = 829 (0x33d), region = 32 }
   0xd   : > { %s5292_s21 = smov (%p34_p5, %s5290_s21), 0 }
  0x12   : > { %p264_p6 = scmp.lt.s32.totalorder %s3935_s14, 1  ;;  %p266_p7 = scmp.lt.s32.totalorder %s3931_s13, 1  ;;  %vm646_vm0 = vcmask 523264   ;;  %vm2715_vm1 = vcmask 519168  }
  0x13   : > { %s2913_s29 = sshll.u32 %s3927_s12, 5 }
  0x14   : > { %s5294_s14 = smov (!%p264_p6, %s3935_s14), 1  ;;  %s5296_s13 = smov (!%p266_p7, %s3931_s13), 1 }
  0x15   : > { %s2915_s22 = sshll.u32 %s5294_s14, 7  ;;  %s2914_s23 = sshll.u32 %s5296_s13, 6 }
  0x16   : > { %s4027_s24 = sadd.s32 %s2915_s22, %s2914_s23  ;;  %p268_p8 = scmp.lt.s32.totalorder %s2913_s29, 63 }
  0x17   : > { %s2919_s25 = sshll.u32 %s4027_s24, 2 }
  0x18   : > { %s4035_s28 = scalar_lea.vmem %s5040_s1, %s2919_s25  ;;  %s5298_s29 = smov (!%p268_p8, %s2913_s29), 63 }
  0x19   : > { %v3497_v0 = vld [vmem:[%s4035_s28 + $0x40] sm:$0xff]   ;;  %v3501_v5 = vld [vmem:[%s4035_s28 + $0x48] sm:$0xff]   ;;  %v3505_v11 = vld [vmem:[%s4035_s28 + $0x50] sm:$0xff]   ;;  %s271_s30 = sadd.s32 %s2914_s23, %s5298_s29  ;;  %s4112_s11 = scalar_lea.vmem %s5041_s2, %s2919_s25 }
  0x1a   : > { %v3498_v1 = vld [vmem:[%s4035_s28 + $0xc0] sm:$0xff]   ;;  %3425 = vmatprep.subr.msk.bf16.mxu0 %vm646_vm0, %v3497_v0  ;;  %v3502_v7 = vld [vmem:[%s4035_s28 + $0xc8] sm:$0xff]   ;;  %v3506_v13 = vld [vmem:[%s4035_s28 + $0xd0] sm:$0xff]   ;;  %s4070_s4 = sadd.s32 %s2915_s22, %s271_s30 }
  0x1b   : > { %v3499_v2 = vld [vmem:[%s4035_s28] sm:$0xff]   ;;  %3433 = vmatprep.subr.msk.bf16.mxu1 %vm646_vm0, %v3498_v1  ;;  %v3503_v8 = vld [vmem:[%s4035_s28 + $0x8] sm:$0xff]   ;;  %v3507_v14 = vld [vmem:[%s4035_s28 + $0x10] sm:$0xff]   ;;  %s2916_s5 = sshll.u32 %s4070_s4, 2 }
  0x1c   : > { %v3500_v3 = vld [vmem:[%s4035_s28 + $0x80] sm:$0xff]   ;;  %v696_v4 = vsel %vm646_vm0, %v3499_v2, 0  ;;  %v3504_v9 = vld [vmem:[%s4035_s28 + $0x88] sm:$0xff]   ;;  %v699_v10 = vsel %vm646_vm0, %v3503_v8, 0  ;;  %v3508_v15 = vld [vmem:[%s4035_s28 + $0x90] sm:$0xff]   ;;  %v702_v16 = vsel %vm646_vm0, %v3507_v14, 0  ;;  %s4084_s8 = scalar_lea.vmem %s5039_s0, %s2916_s5  ;;  %s4952_s14 = scalar_lea.vmem %s5042_s3, %s2916_s5 }
  0x1d   : > { %3106 = vmatpush3.bf16.xpose.msra.mxu0 %v696_v4  ;;  %v744_v6 = vsel %vm646_vm0, %v3500_v3, 0  ;;  %v747_v12 = vsel %vm646_vm0, %v3504_v9, 0  ;;  %v3509_v17 = vld [vmem:[%s4035_s28 + $0x58] sm:$0xff]   ;;  %v750_v18 = vsel %vm646_vm0, %v3508_v15, 0  ;;  %v3513_v23 = vld [vmem:[%s4035_s28 + $0x60] sm:$0xff]   ;;  %v3517_v30 = vld [vmem:[%s4035_s28 + $0x68] sm:$0xff]  }
  0x1e   : > { %3154 = vmatpush3.bf16.xpose.msra.mxu1 %v744_v6  ;;  %3426 = vmatprep.subr.msk.bf16.mxu0 %vm646_vm0, %v3501_v5  ;;  %v3510_v19 = vld [vmem:[%s4035_s28 + $0xd8] sm:$0xff]   ;;  %v3514_v25 = vld [vmem:[%s4035_s28 + $0xe0] sm:$0xff]   ;;  %v3518_v32 = vld [vmem:[%s4035_s28 + $0xe8] sm:$0xff]  }
  0x1f   : > { %3434 = vmatprep.subr.msk.bf16.mxu1 %vm646_vm0, %v3502_v7  ;;  %v3511_v20 = vld [vmem:[%s4035_s28 + $0x18] sm:$0xff]   ;;  %v3515_v26 = vld [vmem:[%s4035_s28 + $0x20] sm:$0xff]   ;;  %v3519_v33 = vld [vmem:[%s4035_s28 + $0x28] sm:$0xff]  }
  0x20   : > { %v3512_v21 = vld [vmem:[%s4035_s28 + $0x98] sm:$0xff]   ;;  %v705_v22 = vsel %vm646_vm0, %v3511_v20, 0  ;;  %v3516_v27 = vld [vmem:[%s4035_s28 + $0xa0] sm:$0xff]   ;;  %v708_v29 = vsel %vm646_vm0, %v3515_v26, 0  ;;  %v3520_v34 = vld [vmem:[%s4035_s28 + $0xa8] sm:$0xff]   ;;  %v711_v37 = vsel %vm646_vm0, %v3519_v33, 0 }
  0x21   : > { %v753_v24 = vsel %vm646_vm0, %v3512_v21, 0  ;;  %v3529_v28 = vld [vmem:[%s4084_s8] sm:$0xff]   ;;  %v756_v31 = vsel %vm646_vm0, %v3516_v27, 0  ;;  %v3521_v35 = vld [vmem:[%s4035_s28 + $0x70] sm:$0xff]   ;;  %v759_v39 = vsel %vm646_vm0, %v3520_v34, 0  ;;  %v3527_v43 = vld [vmem:[%s4035_s28 + $0x38] sm:$0xff]  }
  0x22   : > { %3121 = vmatprep.mubr.msk.bf16.mxu0 %vm646_vm0, %v3529_v28  ;;  %3169 = vmatprep.mubr.msk.bf16.mxu1 %vm646_vm0, %v3529_v28  ;;  %v3523_v36 = vld [vmem:[%s4035_s28 + $0x30] sm:$0xff]   ;;  %v3528_v44 = vld [vmem:[%s4035_s28 + $0xb8] sm:$0xff]   ;;  %v717_v47 = vsel %vm646_vm0, %v3527_v43, 0  ;;  %v3530_v49 = vld [vmem:[%s4084_s8 + $0x8] sm:$0xff]  }
  0x23   : > { %v3524_v38 = vld [vmem:[%s4035_s28 + $0xb0] sm:$0xff]   ;;  %v714_v41 = vsel %vm646_vm0, %v3523_v36, 0  ;;  %v3525_v45 = vld [vmem:[%s4035_s28 + $0x78] sm:$0xff]   ;;  %v765_v48 = vsel %vm646_vm0, %v3528_v44, 0  ;;  %v3533_v52 = vld [vmem:[%s4084_s8 + $0x20] sm:$0xff]  }
  0x24   : > { %v3522_v40 = vld [vmem:[%s4035_s28 + $0xf0] sm:$0xff]   ;;  %v762_v42 = vsel %vm646_vm0, %v3524_v38, 0  ;;  %v3526_v46 = vld [vmem:[%s4035_s28 + $0xf8] sm:$0xff]   ;;  %v3534_v53 = vld [vmem:[%s4084_s8 + $0x28] sm:$0xff]  }
  0x25   : > { %3108 = vmatpush3.bf16.xpose.msra.mxu0 %v699_v10  ;;  %v3531_v50 = vld [vmem:[%s4084_s8 + $0x10] sm:$0xff]   ;;  %v3532_v51 = vld [vmem:[%s4084_s8 + $0x18] sm:$0xff]   ;;  %v3537_v56 = vld [vmem:[%s4084_s8 + $0x40] sm:$0xff]  }
  0x26   : > { %3156 = vmatpush3.bf16.xpose.msra.mxu1 %v747_v12  ;;  %3427 = vmatprep.subr.msk.bf16.mxu0 %vm646_vm0, %v3505_v11  ;;  %v3535_v54 = vld [vmem:[%s4084_s8 + $0x30] sm:$0xff]   ;;  %v3536_v55 = vld [vmem:[%s4084_s8 + $0x38] sm:$0xff]   ;;  %v3538_v57 = vld [vmem:[%s4084_s8 + $0x48] sm:$0xff]  }
  0x27   : > { %3435 = vmatprep.subr.msk.bf16.mxu1 %vm646_vm0, %v3506_v13  ;;  %v3539_v58 = vld [vmem:[%s4084_s8 + $0x50] sm:$0xff]   ;;  %v3540_v59 = vld [vmem:[%s4084_s8 + $0x58] sm:$0xff]   ;;  %v3541_v60 = vld [vmem:[%s4084_s8 + $0x60] sm:$0xff]  }
  0x28   : > { %v3542_v61 = vld [vmem:[%s4084_s8 + $0x68] sm:$0xff]   ;;  %v3543_v62 = vld [vmem:[%s4084_s8 + $0x70] sm:$0xff]   ;;  %v3544_v63 = vld [vmem:[%s4084_s8 + $0x78] sm:$0xff]  }
  0x29   : > { %v3545_v0 = vld [vmem:[%s4112_s11 + $0x40] sm:$0xff]   ;;  %v3549_v4 = vld [vmem:[%s4112_s11 + $0x48] sm:$0xff]   ;;  %v3553_v8 = vld [vmem:[%s4112_s11 + $0x50] sm:$0xff]  }
  0x2a   : > { %v3546_v1 = vld [vmem:[%s4112_s11 + $0xc0] sm:$0xff]   ;;  %v3550_v5 = vld [vmem:[%s4112_s11 + $0xc8] sm:$0xff]   ;;  %v3554_v9 = vld [vmem:[%s4112_s11 + $0xd0] sm:$0xff]  }
  0x2b   : > { %v3547_v2 = vld [vmem:[%s4112_s11] sm:$0xff]   ;;  %v3551_v6 = vld [vmem:[%s4112_s11 + $0x8] sm:$0xff]   ;;  %v3555_v10 = vld [vmem:[%s4112_s11 + $0x10] sm:$0xff]  }
  0x2c   : > { %v3548_v3 = vld [vmem:[%s4112_s11 + $0x80] sm:$0xff]   ;;  %v3552_v7 = vld [vmem:[%s4112_s11 + $0x88] sm:$0xff]   ;;  %v3556_v11 = vld [vmem:[%s4112_s11 + $0x90] sm:$0xff]  }
  0x2d   : > { %3110 = vmatpush3.bf16.xpose.msra.mxu0 %v702_v16  ;;  %v3557_v12 = vld [vmem:[%s4112_s11 + $0x58] sm:$0xff]   ;;  %v3561_v16 = vld [vmem:[%s4112_s11 + $0x60] sm:$0xff]   ;;  %v3565_v20 = vld [vmem:[%s4112_s11 + $0x68] sm:$0xff]  }
  0x2e   : > { %3158 = vmatpush3.bf16.xpose.msra.mxu1 %v750_v18  ;;  %3428 = vmatprep.subr.msk.bf16.mxu0 %vm646_vm0, %v3509_v17  ;;  %v3558_v13 = vld [vmem:[%s4112_s11 + $0xd8] sm:$0xff]   ;;  %v3562_v17 = vld [vmem:[%s4112_s11 + $0xe0] sm:$0xff]   ;;  %v3566_v21 = vld [vmem:[%s4112_s11 + $0xe8] sm:$0xff]  }
  0x2f   : > { %3436 = vmatprep.subr.msk.bf16.mxu1 %vm646_vm0, %v3510_v19  ;;  %v3559_v14 = vld [vmem:[%s4112_s11 + $0x18] sm:$0xff]   ;;  %v3563_v18 = vld [vmem:[%s4112_s11 + $0x20] sm:$0xff]  }
  0x30   : > { %v3560_v15 = vld [vmem:[%s4112_s11 + $0x98] sm:$0xff]   ;;  %v3564_v19 = vld [vmem:[%s4112_s11 + $0xa0] sm:$0xff]  }
  0x35   : > { %3112 = vmatpush3.bf16.xpose.msra.mxu0 %v705_v22  ;;  %v3567_v22 = vld [vmem:[%s4112_s11 + $0x28] sm:$0xff]  }
  0x36   : > { %3160 = vmatpush3.bf16.xpose.msra.mxu1 %v753_v24  ;;  %3429 = vmatprep.subr.msk.bf16.mxu0 %vm646_vm0, %v3513_v23  ;;  %v3568_v23 = vld [vmem:[%s4112_s11 + $0xa8] sm:$0xff]  }
  0x37   : > { %3437 = vmatprep.subr.msk.bf16.mxu1 %vm646_vm0, %v3514_v25 }
  0x3d   : > { %3114 = vmatpush3.bf16.xpose.msra.mxu0 %v708_v29 }
  0x3e   : > { %3162 = vmatpush3.bf16.xpose.msra.mxu1 %v756_v31  ;;  %3430 = vmatprep.subr.msk.bf16.mxu0 %vm646_vm0, %v3517_v30  ;;  %v3569_v30 = vld [vmem:[%s4112_s11 + $0x70] sm:$0xff]  }
  0x3f   : > { %3438 = vmatprep.subr.msk.bf16.mxu1 %vm646_vm0, %v3518_v32  ;;  %v3570_v31 = vld [vmem:[%s4112_s11 + $0xf0] sm:$0xff]  }
  0x40   : > { %v3571_v32 = vld [vmem:[%s4112_s11 + $0x30] sm:$0xff]  }
  0x45   : > { %3116 = vmatpush3.bf16.xpose.msra.mxu0 %v711_v37 }
  0x46   : > { %3164 = vmatpush3.bf16.xpose.msra.mxu1 %v759_v39  ;;  %3431 = vmatprep.subr.msk.bf16.mxu0 %vm646_vm0, %v3521_v35  ;;  %v3572_v35 = vld [vmem:[%s4112_s11 + $0xb0] sm:$0xff]  }
  0x47   : > { %3439 = vmatprep.subr.msk.bf16.mxu1 %vm646_vm0, %v3522_v40 }
  0x4d   : > { %3118 = vmatpush3.bf16.xpose.msra.mxu0 %v714_v41 }
  0x4e   : > { %3166 = vmatpush3.bf16.xpose.msra.mxu1 %v762_v42  ;;  %3432 = vmatprep.subr.msk.bf16.mxu0 %vm646_vm0, %v3525_v45 }
  0x4f   : > { %3440 = vmatprep.subr.msk.bf16.mxu1 %vm646_vm0, %v3526_v46 }
  0x55   : > { %3120 = vmatpush3.bf16.xpose.msra.mxu0 %v717_v47 }
  0x56   : > { %3168 = vmatpush3.bf16.xpose.msra.mxu1 %v765_v48  ;;  %3201 = vmatprep.subr.bf16.mxu0 %v3545_v0 }
  0x57   : > { %3313 = vmatprep.subr.bf16.mxu1 %v3546_v1 }
  0x5c   : > { %3122 = vmatmul.mubr.msk.bf16.vlgmr.msra.gmra.mrb[0].mxu0 %vm646_vm0, %v3529_v28 }
  0x5d   : > { %3170 = vmatmul.mubr.msk.bf16.vlgmr.msra.gmra.mrb[0].mxu1 %vm646_vm0, %v3529_v28  ;;  %3123 = vmatprep.mubr.msk.bf16.mxu0 %vm646_vm0, %v3530_v49 }
  0x5e   : > { %3171 = vmatprep.mubr.msk.bf16.mxu1 %vm646_vm0, %v3530_v49  ;;  %3202 = vmatpush3.bf16.msra.mxu0 %v3547_v2 }
  0x5f   : > { %3314 = vmatpush3.bf16.msra.mxu1 %v3548_v3  ;;  %3203 = vmatprep.subr.bf16.mxu0 %v3549_v4 }
  0x60   : > { %3315 = vmatprep.subr.bf16.mxu1 %v3550_v5 }
  0x62   : > { %3204 = vmatpush3.bf16.msra.mxu0 %v3551_v6 }
  0x63   : > { %3316 = vmatpush3.bf16.msra.mxu1 %v3552_v7  ;;  %3205 = vmatprep.subr.bf16.mxu0 %v3553_v8 }
  0x64   : > { %3124 = vmatmul.mubr.msk.bf16.gmra.mrb[4].mxu0 %vm646_vm0, %v3530_v49  ;;  %3317 = vmatprep.subr.bf16.mxu1 %v3554_v9 }
  0x65   : > { %3172 = vmatmul.mubr.msk.bf16.gmra.mrb[4].mxu1 %vm646_vm0, %v3530_v49  ;;  %3125 = vmatprep.mubr.msk.bf16.mxu0 %vm646_vm0, %v3531_v50 }
  0x66   : > { %3173 = vmatprep.mubr.msk.bf16.mxu1 %vm646_vm0, %v3531_v50  ;;  %3206 = vmatpush3.bf16.msra.mxu0 %v3555_v10 }
  0x67   : > { %3318 = vmatpush3.bf16.msra.mxu1 %v3556_v11  ;;  %3207 = vmatprep.subr.bf16.mxu0 %v3557_v12 }
  0x68   : > { %3319 = vmatprep.subr.bf16.mxu1 %v3558_v13 }
  0x6a   : > { %3208 = vmatpush3.bf16.msra.mxu0 %v3559_v14 }
  0x6b   : > { %3320 = vmatpush3.bf16.msra.mxu1 %v3560_v15  ;;  %3209 = vmatprep.subr.bf16.mxu0 %v3561_v16 }
  0x6c   : > { %3126 = vmatmul.mubr.msk.bf16.gmra.mrb[8].mxu0 %vm646_vm0, %v3531_v50  ;;  %3321 = vmatprep.subr.bf16.mxu1 %v3562_v17 }
  0x6d   : > { %3174 = vmatmul.mubr.msk.bf16.gmra.mrb[8].mxu1 %vm646_vm0, %v3531_v50  ;;  %3127 = vmatprep.mubr.msk.bf16.mxu0 %vm646_vm0, %v3532_v51 }
  0x6e   : > { %3175 = vmatprep.mubr.msk.bf16.mxu1 %vm646_vm0, %v3532_v51  ;;  %3210 = vmatpush3.bf16.msra.mxu0 %v3563_v18 }
  0x6f   : > { %3322 = vmatpush3.bf16.msra.mxu1 %v3564_v19  ;;  %3211 = vmatprep.subr.bf16.mxu0 %v3565_v20 }
  0x70   : > { %3323 = vmatprep.subr.bf16.mxu1 %v3566_v21 }
  0x72   : > { %3212 = vmatpush3.bf16.msra.mxu0 %v3567_v22 }
  0x73   : > { %3324 = vmatpush3.bf16.msra.mxu1 %v3568_v23  ;;  %3213 = vmatprep.subr.bf16.mxu0 %v3569_v30  ;;  %v3573_v23 = vld [vmem:[%s4112_s11 + $0x78] sm:$0xff]  }
  0x74   : > { %3128 = vmatmul.mubr.msk.bf16.gmra.mrb[12].mxu0 %vm646_vm0, %v3532_v51  ;;  %3325 = vmatprep.subr.bf16.mxu1 %v3570_v31  ;;  %v3575_v30 = vld [vmem:[%s4112_s11 + $0x38] sm:$0xff]  }
  0x75   : > { %3176 = vmatmul.mubr.msk.bf16.gmra.mrb[12].mxu1 %vm646_vm0, %v3532_v51  ;;  %3129 = vmatprep.mubr.msk.bf16.mxu0 %vm646_vm0, %v3533_v52 }
  0x76   : > { %3177 = vmatprep.mubr.msk.bf16.mxu1 %vm646_vm0, %v3533_v52  ;;  %3214 = vmatpush3.bf16.msra.mxu0 %v3571_v32 }
  0x77   : > { %3326 = vmatpush3.bf16.msra.mxu1 %v3572_v35  ;;  %3215 = vmatprep.subr.bf16.mxu0 %v3573_v23 }
  0x7a   : > { %3216 = vmatpush3.bf16.msra.mxu0 %v3575_v30 }
  0x7c   : > { %3130 = vmatmul.mubr.msk.bf16.gmra.mrb[16].mxu0 %vm646_vm0, %v3533_v52 }
  0x7d   : > { %3178 = vmatmul.mubr.msk.bf16.gmra.mrb[16].mxu1 %vm646_vm0, %v3533_v52  ;;  %3131 = vmatprep.mubr.msk.bf16.mxu0 %vm646_vm0, %v3534_v53 }
  0x7e   : > { %3179 = vmatprep.mubr.msk.bf16.mxu1 %vm646_vm0, %v3534_v53 }
  0x84   : > { %3132 = vmatmul.mubr.msk.bf16.gmra.mrb[20].mxu0 %vm646_vm0, %v3534_v53 }
  0x85   : > { %3180 = vmatmul.mubr.msk.bf16.gmra.mrb[20].mxu1 %vm646_vm0, %v3534_v53  ;;  %3133 = vmatprep.mubr.msk.bf16.mxu0 %vm646_vm0, %v3535_v54 }
  0x86   : > { %3181 = vmatprep.mubr.msk.bf16.mxu1 %vm646_vm0, %v3535_v54 }
  0x8c   : > { %3134 = vmatmul.mubr.msk.bf16.gmra.mrb[24].mxu0 %vm646_vm0, %v3535_v54 }
  0x8d   : > { %3182 = vmatmul.mubr.msk.bf16.gmra.mrb[24].mxu1 %vm646_vm0, %v3535_v54  ;;  %3135 = vmatprep.mubr.msk.bf16.mxu0 %vm646_vm0, %v3536_v55 }
  0x8e   : > { %3183 = vmatprep.mubr.msk.bf16.mxu1 %vm646_vm0, %v3536_v55 }
  0x94   : > { %3136 = vmatmul.mubr.msk.bf16.gmra.mrb[28].mxu0 %vm646_vm0, %v3536_v55 }
  0x95   : > { %3184 = vmatmul.mubr.msk.bf16.gmra.mrb[28].mxu1 %vm646_vm0, %v3536_v55  ;;  %3137 = vmatprep.mubr.msk.bf16.mxu0 %vm646_vm0, %v3537_v56 }
  0x96   : > { %3185 = vmatprep.mubr.msk.bf16.mxu1 %vm646_vm0, %v3537_v56 }
  0x9c   : > { %3138 = vmatmul.mubr.msk.bf16.gmra.mrb[32].mxu0 %vm646_vm0, %v3537_v56 }
  0x9d   : > { %3186 = vmatmul.mubr.msk.bf16.gmra.mrb[32].mxu1 %vm646_vm0, %v3537_v56  ;;  %3139 = vmatprep.mubr.msk.bf16.mxu0 %vm646_vm0, %v3538_v57 }
  0x9e   : > { %3187 = vmatprep.mubr.msk.bf16.mxu1 %vm646_vm0, %v3538_v57 }
  0xa4   : > { %3140 = vmatmul.mubr.msk.bf16.gmra.mrb[36].mxu0 %vm646_vm0, %v3538_v57 }
  0xa5   : > { %3188 = vmatmul.mubr.msk.bf16.gmra.mrb[36].mxu1 %vm646_vm0, %v3538_v57  ;;  %3141 = vmatprep.mubr.msk.bf16.mxu0 %vm646_vm0, %v3539_v58 }
  0xa6   : > { %3189 = vmatprep.mubr.msk.bf16.mxu1 %vm646_vm0, %v3539_v58 }
  0xac   : > { %3142 = vmatmul.mubr.msk.bf16.gmra.mrb[40].mxu0 %vm646_vm0, %v3539_v58 }
  0xad   : > { %3190 = vmatmul.mubr.msk.bf16.gmra.mrb[40].mxu1 %vm646_vm0, %v3539_v58  ;;  %3143 = vmatprep.mubr.msk.bf16.mxu0 %vm646_vm0, %v3540_v59 }
  0xae   : > { %3191 = vmatprep.mubr.msk.bf16.mxu1 %vm646_vm0, %v3540_v59 }
  0xb4   : > { %3144 = vmatmul.mubr.msk.bf16.gmra.mrb[44].mxu0 %vm646_vm0, %v3540_v59 }
  0xb5   : > { %3192 = vmatmul.mubr.msk.bf16.gmra.mrb[44].mxu1 %vm646_vm0, %v3540_v59  ;;  %3145 = vmatprep.mubr.msk.bf16.mxu0 %vm646_vm0, %v3541_v60 }
  0xb6   : > { %3193 = vmatprep.mubr.msk.bf16.mxu1 %vm646_vm0, %v3541_v60 }
  0xbc   : > { %3146 = vmatmul.mubr.msk.bf16.gmra.mrb[48].mxu0 %vm646_vm0, %v3541_v60 }
  0xbd   : > { %3194 = vmatmul.mubr.msk.bf16.gmra.mrb[48].mxu1 %vm646_vm0, %v3541_v60  ;;  %3147 = vmatprep.mubr.msk.bf16.mxu0 %vm646_vm0, %v3542_v61 }
  0xbe   : > { %3195 = vmatprep.mubr.msk.bf16.mxu1 %vm646_vm0, %v3542_v61 }
  0xc4   : > { %3148 = vmatmul.mubr.msk.bf16.gmra.mrb[52].mxu0 %vm646_vm0, %v3542_v61 }
  0xc5   : > { %3196 = vmatmul.mubr.msk.bf16.gmra.mrb[52].mxu1 %vm646_vm0, %v3542_v61  ;;  %3149 = vmatprep.mubr.msk.bf16.mxu0 %vm646_vm0, %v3543_v62 }
  0xc6   : > { %3197 = vmatprep.mubr.msk.bf16.mxu1 %vm646_vm0, %v3543_v62 }
  0xcc   : > { %3150 = vmatmul.mubr.msk.bf16.gmra.mrb[56].mxu0 %vm646_vm0, %v3543_v62 }
  0xcd   : > { %3198 = vmatmul.mubr.msk.bf16.gmra.mrb[56].mxu1 %vm646_vm0, %v3543_v62  ;;  %3151 = vmatprep.mubr.msk.bf16.mxu0 %vm646_vm0, %v3544_v63 }
  0xce   : > { %3199 = vmatprep.mubr.msk.bf16.mxu1 %vm646_vm0, %v3544_v63 }
  0xd4   : > { %3152 = vmatmul.mubr.msk.bf16.gmra.mrb[60].mxu0 %vm646_vm0, %v3544_v63 }
  0xd5   : > { %3200 = vmatmul.mubr.msk.bf16.gmra.mrb[60].mxu1 %vm646_vm0, %v3544_v63 }
 0x12f   : > { %v4227_v24 = vpop.f32.mrb[0].mxu0 }
 0x130   : > { %v4229_v25 = vpop.f32.mrb[0].mxu1  ;;  %v4231_v26 = vpop.f32.mrb[1].mxu0 }
 0x131   : > { %v1177_v27 = vmax.f32 %v4227_v24, %v4231_v26  ;;  %v4235_v28 = vpop.f32.mrb[1].mxu1  ;;  %v4237_v29 = vpop.f32.mrb[2].mxu0 }
 0x132   : > { %v4242_v33 = vpop.f32.mrb[2].mxu1  ;;  %v4244_v34 = vpop.f32.mrb[3].mxu0 }
 0x133   : > { %v1182_v36 = vmax.f32 %v4237_v29, %v4244_v34  ;;  %v4249_v37 = vpop.f32.mrb[3].mxu1  ;;  %v1178_v38 = vmax.f32 %v1177_v27, %v4229_v25  ;;  %v3574_v27 = vld [vmem:[%s4112_s11 + $0xf8] sm:$0xff]  }
 0x134   : > { %3327 = vmatprep.subr.bf16.mxu1 %v3574_v27 }
 0x135   : > { %v1179_v39 = vmax.f32 %v1178_v38, %v4235_v28  ;;  %v1183_v40 = vmax.f32 %v1182_v36, %v4242_v33  ;;  %v3576_v36 = vld [vmem:[%s4112_s11 + $0xb8] sm:$0xff]  }
 0x136   : > { %3328 = vmatpush3.bf16.msra.mxu1 %v3576_v36 }
 0x137   : > { %1180 = vmax.xlane.f32.xlu0 %v1179_v39  ;;  %v4254_v41 = vpop.f32.mrb[4].mxu0  ;;  %v1184_v42 = vmax.f32 %v1183_v40, %v4249_v37 }
 0x138   : > { %v4257_v43 = vpop.f32.mrb[4].mxu1  ;;  %v4259_v44 = vpop.f32.mrb[5].mxu0 }
 0x139   : > { %v1187_v45 = vmax.f32 %v4254_v41, %v4259_v44  ;;  %v4263_v46 = vpop.f32.mrb[5].mxu1  ;;  %v4265_v47 = vpop.f32.mrb[6].mxu0 }
 0x13a   : > { %v4267_v48 = vpop.f32.mrb[6].mxu1  ;;  %v4269_v49 = vpop.f32.mrb[7].mxu0 }
 0x13b   : > { %v1192_v50 = vmax.f32 %v4265_v47, %v4269_v49  ;;  %v4273_v51 = vpop.f32.mrb[7].mxu1  ;;  %1185 = vmax.xlane.f32.xlu0 %v1184_v42  ;;  %v1188_v52 = vmax.f32 %v1187_v45, %v4257_v43 }
 0x13d   : > { %v1189_v53 = vmax.f32 %v1188_v52, %v4263_v46  ;;  %v1193_v54 = vmax.f32 %v1192_v50, %v4267_v48 }
 0x13f   : > { %1190 = vmax.xlane.f32.xlu1 %v1189_v53  ;;  %v4278_v55 = vpop.f32.mrb[8].mxu0  ;;  %v1194_v56 = vmax.f32 %v1193_v54, %v4273_v51 }
 0x140   : > { %v4281_v57 = vpop.f32.mrb[9].mxu0  ;;  %v4283_v58 = vpop.f32.mrb[8].mxu1 }
 0x141   : > { %v1197_v59 = vmax.f32 %v4278_v55, %v4281_v57  ;;  %v4287_v60 = vpop.f32.mrb[10].mxu0  ;;  %v4289_v61 = vpop.f32.mrb[9].mxu1 }
 0x142   : > { %v4291_v62 = vpop.f32.mrb[11].mxu0  ;;  %v4293_v63 = vpop.f32.mrb[10].mxu1 }
 0x143   : > { %v1198_v0 = vmax.f32 %v1197_v59, %v4283_v58  ;;  %v1202_v1 = vmax.f32 %v4287_v60, %v4291_v62  ;;  %1195 = vmax.xlane.f32.xlu1 %v1194_v56  ;;  %v4298_v2 = vpop.f32.mrb[11].mxu1 }
 0x145   : > { %v1203_v3 = vmax.f32 %v1202_v1, %v4293_v63  ;;  %v1199_v4 = vmax.f32 %v1198_v0, %v4289_v61 }
 0x147   : > { %1200 = vmax.xlane.f32.xlu0 %v1199_v4  ;;  %v4302_v5 = vpop.f32.mrb[12].mxu0  ;;  %v1204_v6 = vmax.f32 %v1203_v3, %v4298_v2 }
 0x148   : > { %v4305_v7 = vpop.f32.mrb[13].mxu0  ;;  %v4307_v8 = vpop.f32.mrb[12].mxu1 }
 0x149   : > { %v1207_v9 = vmax.f32 %v4302_v5, %v4305_v7  ;;  %1205 = vmax.xlane.f32.xlu1 %v1204_v6  ;;  %v4311_v10 = vpop.f32.mrb[14].mxu0  ;;  %v4313_v11 = vpop.f32.mrb[13].mxu1 }
 0x14a   : > { %v4315_v12 = vpop.f32.mrb[15].mxu0  ;;  %v4317_v13 = vpop.f32.mrb[14].mxu1 }
 0x14b   : > { %v1208_v14 = vmax.f32 %v1207_v9, %v4307_v8  ;;  %v1212_v15 = vmax.f32 %v4311_v10, %v4315_v12  ;;  %v4322_v16 = vpop.f32.mrb[15].mxu1 }
 0x14d   : > { %v1213_v17 = vmax.f32 %v1212_v15, %v4317_v13  ;;  %v1209_v18 = vmax.f32 %v1208_v14, %v4313_v11 }
 0x14f   : > { %1210 = vmax.xlane.f32.xlu0 %v1209_v18  ;;  %v4326_v19 = vpop.f32.mrb[16].mxu0  ;;  %v1214_v20 = vmax.f32 %v1213_v17, %v4322_v16 }
 0x150   : > { %v4329_v21 = vpop.f32.mrb[17].mxu0  ;;  %v4331_v22 = vpop.f32.mrb[16].mxu1 }
 0x151   : > { %v1217_v31 = vmax.f32 %v4326_v19, %v4329_v21  ;;  %1215 = vmax.xlane.f32.xlu1 %v1214_v20  ;;  %v4338_v32 = vpop.f32.mrb[18].mxu0  ;;  %v4340_v35 = vpop.f32.mrb[17].mxu1 }
 0x152   : > { %v4343_v38 = vpop.f32.mrb[19].mxu0  ;;  %v4345_v39 = vpop.f32.mrb[18].mxu1 }
 0x153   : > { %v1218_v40 = vmax.f32 %v1217_v31, %v4331_v22  ;;  %v1222_v42 = vmax.f32 %v4338_v32, %v4343_v38  ;;  %v4350_v45 = vpop.f32.mrb[19].mxu1 }
 0x155   : > { %v1223_v50 = vmax.f32 %v1222_v42, %v4345_v39  ;;  %v1219_v52 = vmax.f32 %v1218_v40, %v4340_v35 }
 0x157   : > { %1220 = vmax.xlane.f32.xlu0 %v1219_v52  ;;  %v4354_v53 = vpop.f32.mrb[20].mxu0  ;;  %v1224_v54 = vmax.f32 %v1223_v50, %v4350_v45 }
 0x158   : > { %v4357_v56 = vpop.f32.mrb[21].mxu0  ;;  %v4359_v59 = vpop.f32.mrb[20].mxu1 }
 0x159   : > { %v1227_v0 = vmax.f32 %v4354_v53, %v4357_v56  ;;  %1225 = vmax.xlane.f32.xlu1 %v1224_v54  ;;  %v4363_v1 = vpop.f32.mrb[22].mxu0  ;;  %v4365_v3 = vpop.f32.mrb[21].mxu1 }
 0x15a   : > { %v4367_v4 = vpop.f32.mrb[23].mxu0  ;;  %v4369_v6 = vpop.f32.mrb[22].mxu1 }
 0x15b   : > { %v1228_v9 = vmax.f32 %v1227_v0, %v4359_v59  ;;  %v1232_v14 = vmax.f32 %v4363_v1, %v4367_v4  ;;  %v4374_v15 = vpop.f32.mrb[23].mxu1 }
 0x15c   : > { %5121 = vst [vmem:[#allocation2_spill] sm:$0xff] %v4374_v15 }
 0x15d   : > { %v1233_v17 = vmax.f32 %v1232_v14, %v4369_v6  ;;  %v1229_v18 = vmax.f32 %v1228_v9, %v4365_v3 }
 0x15f   : > { %1230 = vmax.xlane.f32.xlu0 %v1229_v18  ;;  %v4378_v20 = vpop.f32.mrb[24].mxu0  ;;  %v1234_v23 = vmax.f32 %v1233_v17, %v4374_v15 }
 0x160   : > { %5122 = vst [vmem:[#allocation3_spill] sm:$0xff] %v4378_v20  ;;  %v4381_v27 = vpop.f32.mrb[25].mxu0  ;;  %v4383_v30 = vpop.f32.mrb[24].mxu1 }
 0x161   : > { %5123 = vst [vmem:[#allocation4_spill] sm:$0xff] %v4381_v27  ;;  %5124 = vst [vmem:[#allocation5_spill] sm:$0xff] %v4383_v30  ;;  %v1237_v31 = vmax.f32 %v4378_v20, %v4381_v27  ;;  %1235 = vmax.xlane.f32.xlu1 %v1234_v23  ;;  %v4387_v36 = vpop.f32.mrb[26].mxu0  ;;  %v4389_v40 = vpop.f32.mrb[25].mxu1 }
 0x162   : > { %5125 = vst [vmem:[#allocation6_spill] sm:$0xff] %v4387_v36  ;;  %5126 = vst [vmem:[#allocation7_spill] sm:$0xff] %v4389_v40  ;;  %v4391_v42 = vpop.f32.mrb[27].mxu0  ;;  %v4393_v50 = vpop.f32.mrb[26].mxu1 }
 0x163   : > { %5127 = vst [vmem:[#allocation8_spill] sm:$0xff] %v4391_v42  ;;  %5128 = vst [vmem:[#allocation9_spill] sm:$0xff] %v4393_v50  ;;  %v1238_v52 = vmax.f32 %v1237_v31, %v4383_v30  ;;  %v1242_v54 = vmax.f32 %v4387_v36, %v4391_v42  ;;  %v4398_v0 = vpop.f32.mrb[27].mxu1 }
 0x164   : > { %5129 = vst [vmem:[#allocation10_spill] sm:$0xff] %v4398_v0 }
 0x165   : > { %v1243_v9 = vmax.f32 %v1242_v54, %v4393_v50  ;;  %v1239_v14 = vmax.f32 %v1238_v52, %v4389_v40 }
 0x167   : > { %1240 = vmax.xlane.f32.xlu0 %v1239_v14  ;;  %v4402_v17 = vpop.f32.mrb[28].mxu0  ;;  %v1244_v18 = vmax.f32 %v1243_v9, %v4398_v0 }
 0x168   : > { %5130 = vst [vmem:[#allocation11_spill] sm:$0xff] %v4402_v17  ;;  %v4405_v23 = vpop.f32.mrb[29].mxu0  ;;  %v4407_v27 = vpop.f32.mrb[28].mxu1 }
 0x169   : > { %5131 = vst [vmem:[#allocation12_spill] sm:$0xff] %v4405_v23  ;;  %5132 = vst [vmem:[#allocation13_spill] sm:$0xff] %v4407_v27  ;;  %v1247_v31 = vmax.f32 %v4402_v17, %v4405_v23  ;;  %1245 = vmax.xlane.f32.xlu1 %v1244_v18  ;;  %v4411_v42 = vpop.f32.mrb[30].mxu0  ;;  %v4413_v36 = vpop.f32.mrb[29].mxu1 }
 0x16a   : > { %5133 = vst [vmem:[#allocation14_spill] sm:$0xff] %v4411_v42  ;;  %5134 = vst [vmem:[#allocation15_spill] sm:$0xff] %v4413_v36  ;;  %v4415_v54 = vpop.f32.mrb[31].mxu0  ;;  %v4417_v52 = vpop.f32.mrb[30].mxu1 }
 0x16b   : > { %5135 = vst [vmem:[#allocation16_spill] sm:$0xff] %v4415_v54  ;;  %5136 = vst [vmem:[#allocation17_spill] sm:$0xff] %v4417_v52  ;;  %v1248_v14 = vmax.f32 %v1247_v31, %v4407_v27  ;;  %v1252_v9 = vmax.f32 %v4411_v42, %v4415_v54  ;;  %v4422_v0 = vpop.f32.mrb[31].mxu1 }
 0x16c   : > { %5137 = vst [vmem:[#allocation18_spill] sm:$0xff] %v4422_v0 }
 0x16d   : > { %v1253_v50 = vmax.f32 %v1252_v9, %v4417_v52  ;;  %v1249_v23 = vmax.f32 %v1248_v14, %v4413_v36 }
 0x16f   : > { %1250 = vmax.xlane.f32.xlu0 %v1249_v23  ;;  %v4426_v18 = vpop.f32.mrb[32].mxu0  ;;  %v1254_v17 = vmax.f32 %v1253_v50, %v4422_v0 }
 0x170   : > { %5138 = vst [vmem:[#allocation19_spill] sm:$0xff] %v4426_v18  ;;  %v4429_v40 = vpop.f32.mrb[33].mxu0  ;;  %v4431_v30 = vpop.f32.mrb[32].mxu1 }
 0x171   : > { %5139 = vst [vmem:[#allocation20_spill] sm:$0xff] %v4429_v40  ;;  %5140 = vst [vmem:[#allocation21_spill] sm:$0xff] %v4431_v30  ;;  %v1257_v31 = vmax.f32 %v4426_v18, %v4429_v40  ;;  %1255 = vmax.xlane.f32.xlu1 %v1254_v17  ;;  %v4435_v54 = vpop.f32.mrb[34].mxu0  ;;  %v4437_v42 = vpop.f32.mrb[33].mxu1 }
 0x172   : > { %5141 = vst [vmem:[#allocation22_spill] sm:$0xff] %v4435_v54  ;;  %5142 = vst [vmem:[#allocation23_spill] sm:$0xff] %v4437_v42  ;;  %v4439_v9 = vpop.f32.mrb[35].mxu0  ;;  %v4441_v14 = vpop.f32.mrb[34].mxu1 }
 0x173   : > { %5143 = vst [vmem:[#allocation24_spill] sm:$0xff] %v4439_v9  ;;  %5144 = vst [vmem:[#allocation25_spill] sm:$0xff] %v4441_v14  ;;  %v1258_v23 = vmax.f32 %v1257_v31, %v4431_v30  ;;  %v1262_v50 = vmax.f32 %v4435_v54, %v4439_v9  ;;  %v4446_v0 = vpop.f32.mrb[35].mxu1 }
 0x174   : > { %5145 = vst [vmem:[#allocation26_spill] sm:$0xff] %v4446_v0 }
 0x175   : > { %v1263_v52 = vmax.f32 %v1262_v50, %v4441_v14  ;;  %v1259_v40 = vmax.f32 %v1258_v23, %v4437_v42 }
 0x177   : > { %1260 = vmax.xlane.f32.xlu0 %v1259_v40  ;;  %v4450_v17 = vpop.f32.mrb[36].mxu0  ;;  %v1264_v18 = vmax.f32 %v1263_v52, %v4446_v0 }
 0x178   : > { %5146 = vst [vmem:[#allocation27_spill] sm:$0xff] %v4450_v17  ;;  %v4453_v36 = vpop.f32.mrb[37].mxu0  ;;  %v4455_v27 = vpop.f32.mrb[36].mxu1 }
 0x179   : > { %5147 = vst [vmem:[#allocation28_spill] sm:$0xff] %v4453_v36  ;;  %5148 = vst [vmem:[#allocation29_spill] sm:$0xff] %v4455_v27  ;;  %v1267_v31 = vmax.f32 %v4450_v17, %v4453_v36  ;;  %1265 = vmax.xlane.f32.xlu1 %v1264_v18  ;;  %v4459_v9 = vpop.f32.mrb[38].mxu0  ;;  %v4461_v54 = vpop.f32.mrb[37].mxu1 }
 0x17a   : > { %5149 = vst [vmem:[#allocation30_spill] sm:$0xff] %v4459_v9  ;;  %5150 = vst [vmem:[#allocation31_spill] sm:$0xff] %v4461_v54  ;;  %v4463_v50 = vpop.f32.mrb[39].mxu0  ;;  %v4465_v23 = vpop.f32.mrb[38].mxu1 }
 0x17b   : > { %5151 = vst [vmem:[#allocation32_spill] sm:$0xff] %v4463_v50  ;;  %5152 = vst [vmem:[#allocation33_spill] sm:$0xff] %v4465_v23  ;;  %v1268_v40 = vmax.f32 %v1267_v31, %v4455_v27  ;;  %v1272_v52 = vmax.f32 %v4459_v9, %v4463_v50  ;;  %v4470_v0 = vpop.f32.mrb[39].mxu1 }
 0x17c   : > { %5153 = vst [vmem:[#allocation34_spill] sm:$0xff] %v4470_v0 }
 0x17d   : > { %v1273_v14 = vmax.f32 %v1272_v52, %v4465_v23  ;;  %v1269_v36 = vmax.f32 %v1268_v40, %v4461_v54 }
 0x17f   : > { %1270 = vmax.xlane.f32.xlu0 %v1269_v36  ;;  %v4474_v18 = vpop.f32.mrb[40].mxu0  ;;  %v1274_v17 = vmax.f32 %v1273_v14, %v4470_v0 }
 0x180   : > { %5154 = vst [vmem:[#allocation35_spill] sm:$0xff] %v4474_v18  ;;  %v4477_v42 = vpop.f32.mrb[41].mxu0  ;;  %v4479_v30 = vpop.f32.mrb[40].mxu1 }
 0x181   : > { %5155 = vst [vmem:[#allocation36_spill] sm:$0xff] %v4477_v42  ;;  %5156 = vst [vmem:[#allocation37_spill] sm:$0xff] %v4479_v30  ;;  %v1277_v31 = vmax.f32 %v4474_v18, %v4477_v42  ;;  %1275 = vmax.xlane.f32.xlu1 %v1274_v17  ;;  %v4483_v50 = vpop.f32.mrb[42].mxu0  ;;  %v4485_v9 = vpop.f32.mrb[41].mxu1 }
 0x182   : > { %5157 = vst [vmem:[#allocation38_spill] sm:$0xff] %v4483_v50  ;;  %5158 = vst [vmem:[#allocation39_spill] sm:$0xff] %v4485_v9  ;;  %v4487_v52 = vpop.f32.mrb[43].mxu0  ;;  %v4489_v40 = vpop.f32.mrb[42].mxu1 }
 0x183   : > { %5159 = vst [vmem:[#allocation40_spill] sm:$0xff] %v4487_v52  ;;  %5160 = vst [vmem:[#allocation41_spill] sm:$0xff] %v4489_v40  ;;  %v1278_v36 = vmax.f32 %v1277_v31, %v4479_v30  ;;  %v1282_v14 = vmax.f32 %v4483_v50, %v4487_v52  ;;  %v4494_v0 = vpop.f32.mrb[43].mxu1 }
 0x184   : > { %5161 = vst [vmem:[#allocation42_spill] sm:$0xff] %v4494_v0 }
 0x185   : > { %v1283_v23 = vmax.f32 %v1282_v14, %v4489_v40  ;;  %v1279_v42 = vmax.f32 %v1278_v36, %v4485_v9 }
 0x187   : > { %1280 = vmax.xlane.f32.xlu0 %v1279_v42  ;;  %v4498_v17 = vpop.f32.mrb[44].mxu0  ;;  %v1284_v18 = vmax.f32 %v1283_v23, %v4494_v0 }
 0x188   : > { %5162 = vst [vmem:[#allocation43_spill] sm:$0xff] %v4498_v17  ;;  %v4501_v54 = vpop.f32.mrb[45].mxu0  ;;  %v4503_v27 = vpop.f32.mrb[44].mxu1 }
 0x189   : > { %5163 = vst [vmem:[#allocation44_spill] sm:$0xff] %v4501_v54  ;;  %5164 = vst [vmem:[#allocation45_spill] sm:$0xff] %v4503_v27  ;;  %v1287_v31 = vmax.f32 %v4498_v17, %v4501_v54  ;;  %1285 = vmax.xlane.f32.xlu1 %v1284_v18  ;;  %v4507_v52 = vpop.f32.mrb[46].mxu0  ;;  %v4509_v50 = vpop.f32.mrb[45].mxu1 }
 0x18a   : > { %5165 = vst [vmem:[#allocation46_spill] sm:$0xff] %v4507_v52  ;;  %5166 = vst [vmem:[#allocation47_spill] sm:$0xff] %v4509_v50  ;;  %v4511_v14 = vpop.f32.mrb[47].mxu0  ;;  %v4513_v36 = vpop.f32.mrb[46].mxu1 }
 0x18b   : > { %5167 = vst [vmem:[#allocation48_spill] sm:$0xff] %v4511_v14  ;;  %5168 = vst [vmem:[#allocation49_spill] sm:$0xff] %v4513_v36  ;;  %v1288_v42 = vmax.f32 %v1287_v31, %v4503_v27  ;;  %v1292_v23 = vmax.f32 %v4507_v52, %v4511_v14  ;;  %v4518_v0 = vpop.f32.mrb[47].mxu1 }
 0x18c   : > { %5169 = vst [vmem:[#allocation50_spill] sm:$0xff] %v4518_v0 }
 0x18d   : > { %v1293_v40 = vmax.f32 %v1292_v23, %v4513_v36  ;;  %v1289_v54 = vmax.f32 %v1288_v42, %v4509_v50 }
 0x18f   : > { %1290 = vmax.xlane.f32.xlu0 %v1289_v54  ;;  %v4522_v18 = vpop.f32.mrb[48].mxu0  ;;  %v1294_v17 = vmax.f32 %v1293_v40, %v4518_v0 }
 0x190   : > { %5170 = vst [vmem:[#allocation51_spill] sm:$0xff] %v4522_v18  ;;  %v4525_v9 = vpop.f32.mrb[49].mxu0  ;;  %v4527_v30 = vpop.f32.mrb[48].mxu1 }
 0x191   : > { %5171 = vst [vmem:[#allocation52_spill] sm:$0xff] %v4525_v9  ;;  %5172 = vst [vmem:[#allocation53_spill] sm:$0xff] %v4527_v30  ;;  %v1297_v31 = vmax.f32 %v4522_v18, %v4525_v9  ;;  %1295 = vmax.xlane.f32.xlu1 %v1294_v17  ;;  %v4531_v14 = vpop.f32.mrb[50].mxu0  ;;  %v4533_v52 = vpop.f32.mrb[49].mxu1 }
 0x192   : > { %5173 = vst [vmem:[#allocation54_spill] sm:$0xff] %v4531_v14  ;;  %5174 = vst [vmem:[#allocation55_spill] sm:$0xff] %v4533_v52  ;;  %v4535_v23 = vpop.f32.mrb[51].mxu0  ;;  %v4537_v42 = vpop.f32.mrb[50].mxu1 }
 0x193   : > { %5175 = vst [vmem:[#allocation56_spill] sm:$0xff] %v4535_v23  ;;  %5176 = vst [vmem:[#allocation57_spill] sm:$0xff] %v4537_v42  ;;  %v1298_v54 = vmax.f32 %v1297_v31, %v4527_v30  ;;  %v1302_v40 = vmax.f32 %v4531_v14, %v4535_v23  ;;  %v4542_v0 = vpop.f32.mrb[51].mxu1 }
 0x194   : > { %5177 = vst [vmem:[#allocation58_spill] sm:$0xff] %v4542_v0 }
 0x195   : > { %v1303_v36 = vmax.f32 %v1302_v40, %v4537_v42  ;;  %v1299_v9 = vmax.f32 %v1298_v54, %v4533_v52 }
 0x197   : > { %1300 = vmax.xlane.f32.xlu0 %v1299_v9  ;;  %v4546_v17 = vpop.f32.mrb[52].mxu0  ;;  %v1304_v18 = vmax.f32 %v1303_v36, %v4542_v0 }
 0x198   : > { %5178 = vst [vmem:[#allocation59_spill] sm:$0xff] %v4546_v17  ;;  %v4549_v50 = vpop.f32.mrb[53].mxu0  ;;  %v4551_v27 = vpop.f32.mrb[52].mxu1 }
 0x199   : > { %5179 = vst [vmem:[#allocation60_spill] sm:$0xff] %v4549_v50  ;;  %5180 = vst [vmem:[#allocation61_spill] sm:$0xff] %v4551_v27  ;;  %v1307_v31 = vmax.f32 %v4546_v17, %v4549_v50  ;;  %1305 = vmax.xlane.f32.xlu1 %v1304_v18  ;;  %v4555_v23 = vpop.f32.mrb[54].mxu0  ;;  %v4557_v14 = vpop.f32.mrb[53].mxu1 }
 0x19a   : > { %5181 = vst [vmem:[#allocation62_spill] sm:$0xff] %v4555_v23  ;;  %5182 = vst [vmem:[#allocation63_spill] sm:$0xff] %v4557_v14  ;;  %v4559_v40 = vpop.f32.mrb[55].mxu0  ;;  %v4561_v54 = vpop.f32.mrb[54].mxu1 }
 0x19b   : > { %5183 = vst [vmem:[#allocation64_spill] sm:$0xff] %v4559_v40  ;;  %5184 = vst [vmem:[#allocation65_spill] sm:$0xff] %v4561_v54  ;;  %v1308_v9 = vmax.f32 %v1307_v31, %v4551_v27  ;;  %v1312_v36 = vmax.f32 %v4555_v23, %v4559_v40  ;;  %v4566_v0 = vpop.f32.mrb[55].mxu1 }
 0x19c   : > { %5185 = vst [vmem:[#allocation66_spill] sm:$0xff] %v4566_v0 }
 0x19d   : > { %v1313_v42 = vmax.f32 %v1312_v36, %v4561_v54  ;;  %v1309_v50 = vmax.f32 %v1308_v9, %v4557_v14 }
 0x19f   : > { %1310 = vmax.xlane.f32.xlu0 %v1309_v50  ;;  %v4570_v18 = vpop.f32.mrb[56].mxu0  ;;  %v1314_v17 = vmax.f32 %v1313_v42, %v4566_v0 }
 0x1a0   : > { %5186 = vst [vmem:[#allocation67_spill] sm:$0xff] %v4570_v18  ;;  %v4573_v52 = vpop.f32.mrb[57].mxu0  ;;  %v4575_v30 = vpop.f32.mrb[56].mxu1 }
 0x1a1   : > { %5187 = vst [vmem:[#allocation68_spill] sm:$0xff] %v4573_v52  ;;  %5188 = vst [vmem:[#allocation69_spill] sm:$0xff] %v4575_v30  ;;  %v1317_v31 = vmax.f32 %v4570_v18, %v4573_v52  ;;  %1315 = vmax.xlane.f32.xlu1 %v1314_v17  ;;  %v4579_v40 = vpop.f32.mrb[58].mxu0  ;;  %v4581_v23 = vpop.f32.mrb[57].mxu1 }
 0x1a2   : > { %5189 = vst [vmem:[#allocation70_spill] sm:$0xff] %v4579_v40  ;;  %5190 = vst [vmem:[#allocation71_spill] sm:$0xff] %v4581_v23  ;;  %v4583_v36 = vpop.f32.mrb[59].mxu0  ;;  %v4585_v9 = vpop.f32.mrb[58].mxu1 }
 0x1a3   : > { %5191 = vst [vmem:[#allocation72_spill] sm:$0xff] %v4583_v36  ;;  %5192 = vst [vmem:[#allocation73_spill] sm:$0xff] %v4585_v9  ;;  %v1318_v50 = vmax.f32 %v1317_v31, %v4575_v30  ;;  %v1322_v42 = vmax.f32 %v4579_v40, %v4583_v36  ;;  %v4590_v0 = vpop.f32.mrb[59].mxu1 }
 0x1a4   : > { %5193 = vst [vmem:[#allocation74_spill] sm:$0xff] %v4590_v0 }
 0x1a5   : > { %v1323_v54 = vmax.f32 %v1322_v42, %v4585_v9  ;;  %v1319_v52 = vmax.f32 %v1318_v50, %v4581_v23 }
 0x1a7   : > { %1320 = vmax.xlane.f32.xlu0 %v1319_v52  ;;  %v4594_v17 = vpop.f32.mrb[60].mxu0  ;;  %v1324_v18 = vmax.f32 %v1323_v54, %v4590_v0 }
 0x1a8   : > { %5194 = vst [vmem:[#allocation75_spill] sm:$0xff] %v4594_v17  ;;  %v4597_v14 = vpop.f32.mrb[61].mxu0  ;;  %v4599_v27 = vpop.f32.mrb[60].mxu1 }
 0x1a9   : > { %5195 = vst [vmem:[#allocation76_spill] sm:$0xff] %v4597_v14  ;;  %5196 = vst [vmem:[#allocation77_spill] sm:$0xff] %v4599_v27  ;;  %v1327_v31 = vmax.f32 %v4594_v17, %v4597_v14  ;;  %1325 = vmax.xlane.f32.xlu1 %v1324_v18  ;;  %v4603_v36 = vpop.f32.mrb[62].mxu0  ;;  %v4605_v40 = vpop.f32.mrb[61].mxu1 }
 0x1aa   : > { %5197 = vst [vmem:[#allocation78_spill] sm:$0xff] %v4603_v36  ;;  %v4607_v42 = vpop.f32.mrb[63].mxu0  ;;  %v4609_v50 = vpop.f32.mrb[62].mxu1 }
 0x1ab   : > { %5198 = vst [vmem:[#allocation79_spill] sm:$0xff] %v4607_v42  ;;  %v1328_v52 = vmax.f32 %v1327_v31, %v4599_v27  ;;  %v1332_v54 = vmax.f32 %v4603_v36, %v4607_v42  ;;  %v4614_v0 = vpop.f32.mrb[63].mxu1 }
 0x1ad   : > { %v1333_v9 = vmax.f32 %v1332_v54, %v4609_v50  ;;  %v1329_v14 = vmax.f32 %v1328_v52, %v4605_v40 }
 0x1af   : > { %1330 = vmax.xlane.f32.xlu0 %v1329_v14  ;;  %v1334_v18 = vmax.f32 %v1333_v9, %v4614_v0 }
 0x1b1   : > { %1335 = vmax.xlane.f32.xlu1 %v1334_v18 }
 0x1c4   : > { %v1181_v17 = vpop.xlane.xlu0 %1180 }
 0x1c5   : > { %v1337_v23 = vsub.f32 %v4227_v24, %v1181_v17  ;;  %v1338_v30 = vsub.f32 %v4231_v26, %v1181_v17  ;;  %v1339_v31 = vsub.f32 %v4229_v25, %v1181_v17  ;;  %v1340_v27 = vsub.f32 %v4235_v28, %v1181_v17 }
 0x1c7   : > { %v1465_v42 = vmul.f32 1.442695, %v1337_v23  ;;  %v1467_v36 = vmul.f32 1.442695, %v1338_v30  ;;  %v1469_v20 = vmul.f32 1.442695, %v1339_v31 }
 0x1c8   : > { %v1471_v15 = vmul.f32 1.442695, %v1340_v27  ;;  %v1186_v54 = vpop.xlane.xlu0 %1185 }
 0x1c9   : > { %3577 = vpow2.f32 %v1465_v42  ;;  %v1341_v14 = vsub.f32 %v4237_v29, %v1186_v54  ;;  %v1342_v9 = vsub.f32 %v4244_v34, %v1186_v54  ;;  %v1343_v52 = vsub.f32 %v4242_v33, %v1186_v54 }
 0x1ca   : > { %3579 = vpow2.f32 %v1467_v36  ;;  %v1344_v24 = vsub.f32 %v4249_v37, %v1186_v54 }
 0x1cb   : > { %3581 = vpow2.f32 %v1469_v20  ;;  %v1473_v26 = vmul.f32 1.442695, %v1341_v14  ;;  %v1475_v25 = vmul.f32 1.442695, %v1342_v9  ;;  %v1477_v18 = vmul.f32 1.442695, %v1343_v52 }
 0x1cc   : > { %3583 = vpow2.f32 %v1471_v15  ;;  %v1479_v28 = vmul.f32 1.442695, %v1344_v24  ;;  %v1191_v30 = vpop.xlane.xlu1 %1190 }
 0x1cd   : > { %3585 = vpow2.f32 %v1473_v26  ;;  %v1345_v27 = vsub.f32 %v4254_v41, %v1191_v30  ;;  %v1346_v23 = vsub.f32 %v4259_v44, %v1191_v30  ;;  %v1347_v29 = vsub.f32 %v4257_v43, %v1191_v30 }
 0x1ce   : > { %3587 = vpow2.f32 %v1475_v25  ;;  %v1348_v33 = vsub.f32 %v4263_v46, %v1191_v30 }
 0x1cf   : > { %3589 = vpow2.f32 %v1477_v18  ;;  %v1481_v34 = vmul.f32 1.442695, %v1345_v27  ;;  %v1483_v37 = vmul.f32 1.442695, %v1346_v23  ;;  %v1485_v20 = vmul.f32 1.442695, %v1347_v29 }
 0x1d0   : > { %3591 = vpow2.f32 %v1479_v28  ;;  %v1487_v36 = vmul.f32 1.442695, %v1348_v33  ;;  %v1196_v17 = vpop.xlane.xlu1 %1195 }
 0x1d1   : > { %3593 = vpow2.f32 %v1481_v34  ;;  %v1349_v15 = vsub.f32 %v4265_v47, %v1196_v17  ;;  %v1350_v42 = vsub.f32 %v4269_v49, %v1196_v17  ;;  %v1351_v41 = vsub.f32 %v4267_v48, %v1196_v17 }
 0x1d2   : > { %3595 = vpow2.f32 %v1483_v37  ;;  %v1352_v43 = vsub.f32 %v4273_v51, %v1196_v17 }
 0x1d3   : > { %v3578_v44 = vpop.eup %3577  ;;  %3597 = vpow2.f32 %v1485_v20  ;;  %v1489_v46 = vmul.f32 1.442695, %v1349_v15  ;;  %v1491_v31 = vmul.f32 1.442695, %v1350_v42  ;;  %v1493_v54 = vmul.f32 1.442695, %v1351_v41 }
 0x1d4   : > { %v3580_v14 = vpop.eup %3579  ;;  %3599 = vpow2.f32 %v1487_v36  ;;  %v1495_v9 = vmul.f32 1.442695, %v1352_v43  ;;  %v1201_v52 = vpop.xlane.xlu0 %1200 }
 0x1d5   : > { %v3582_v24 = vpop.eup %3581  ;;  %3601 = vpow2.f32 %v1489_v46  ;;  %v1353_v47 = vsub.f32 %v4278_v55, %v1201_v52  ;;  %v1354_v49 = vsub.f32 %v4281_v57, %v1201_v52  ;;  %v1355_v48 = vsub.f32 %v4283_v58, %v1201_v52 }
 0x1d6   : > { %v3584_v26 = vpop.eup %3583  ;;  %3603 = vpow2.f32 %v1491_v31  ;;  %v1356_v51 = vsub.f32 %v4289_v61, %v1201_v52  ;;  %v1206_v25 = vpop.xlane.xlu1 %1205  ;;  %v1721_v18 = vadd.f32 %v3580_v14, %v3578_v44 }
 0x1d7   : > { %v3586_v28 = vpop.eup %3585  ;;  %3605 = vpow2.f32 %v1493_v54  ;;  %v1497_v30 = vmul.f32 1.442695, %v1353_v47  ;;  %v1499_v27 = vmul.f32 1.442695, %v1354_v49  ;;  %v1501_v23 = vmul.f32 1.442695, %v1355_v48 }
 0x1d8   : > { %v3588_v29 = vpop.eup %3587  ;;  %3607 = vpow2.f32 %v1495_v9  ;;  %v1503_v33 = vmul.f32 1.442695, %v1356_v51  ;;  %v1357_v55 = vsub.f32 %v4287_v60, %v1206_v25  ;;  %v1358_v57 = vsub.f32 %v4291_v62, %v1206_v25 }
 0x1d9   : > { %v3590_v34 = vpop.eup %3589  ;;  %3609 = vpow2.f32 %v1497_v30  ;;  %v1359_v58 = vsub.f32 %v4293_v63, %v1206_v25  ;;  %v1360_v61 = vsub.f32 %v4298_v2, %v1206_v25  ;;  %v1882_v37 = vpack.c.bf16 %v3588_v29, %v3580_v14 }
 0x1da   : > { %v3592_v20 = vpop.eup %3591  ;;  %3611 = vpow2.f32 %v1499_v27  ;;  %v1505_v36 = vmul.f32 1.442695, %v1357_v55  ;;  %v1507_v17 = vmul.f32 1.442695, %v1358_v57  ;;  %v1722_v15 = vadd.f32 %v3582_v24, %v1721_v18 }
 0x1db   : > { %v4643_v42 = vpop.eup %3593  ;;  %3613 = vpow2.f32 %v1501_v23  ;;  %v1509_v41 = vmul.f32 1.442695, %v1359_v58  ;;  %v1511_v43 = vmul.f32 1.442695, %v1360_v61  ;;  %2233 = vmatprep.mubr.bf16.mxu0 %v1882_v37  ;;  %v1884_v60 = vpack.c.bf16 %v3592_v20, %v3584_v26 }
 0x1dc   : > { %v3596_v62 = vpop.eup %3595  ;;  %3615 = vpow2.f32 %v1503_v33  ;;  %v1723_v46 = vadd.f32 %v3584_v26, %v1722_v15  ;;  %v1881_v31 = vpack.c.bf16 %v3586_v28, %v3578_v44  ;;  %v1883_v63 = vpack.c.bf16 %v3590_v34, %v3582_v24  ;;  %v1211_v54 = vpop.xlane.xlu0 %1210 }
 0x1dd   : > { %v4645_v2 = vpop.eup %3597  ;;  %3617 = vpow2.f32 %v1505_v36  ;;  %2394 = vmatprep.mubr.bf16.mxu1 %v1884_v60  ;;  %v1361_v14 = vsub.f32 %v4302_v5, %v1211_v54  ;;  %v1362_v9 = vsub.f32 %v4305_v7, %v1211_v54  ;;  %v1363_v52 = vsub.f32 %v4307_v8, %v1211_v54 }
 0x1de   : > { %v3600_v47 = vpop.eup %3599  ;;  %3619 = vpow2.f32 %v1507_v17  ;;  %1724 = vadd.xlane.f32.xlu0 %v1723_v46  ;;  %2234 = vmatmul.mubr.bf16.vlgmr.msra.gmra.mrb[64].mxu0 %v1881_v31  ;;  %v1364_v49 = vsub.f32 %v4313_v11, %v1211_v54  ;;  %v1216_v48 = vpop.xlane.xlu1 %1215  ;;  %v1726_v44 = vadd.f32 %v3588_v29, %v3586_v28  ;;  %v1731_v24 = vadd.f32 %v3596_v62, %v4643_v42 }
 0x1df   : > { %v4652_v26 = vpop.eup %3601  ;;  %3621 = vpow2.f32 %v1509_v41  ;;  %2395 = vmatmul.mubr.bf16.vlgmr.msra.gmra.mrb[64].mxu1 %v1883_v63  ;;  %v1513_v51 = vmul.f32 1.442695, %v1361_v14  ;;  %v1515_v5 = vmul.f32 1.442695, %v1362_v9  ;;  %v1517_v25 = vmul.f32 1.442695, %v1363_v52 }
 0x1e0   : > { %v3604_v7 = vpop.eup %3603  ;;  %3623 = vpow2.f32 %v1511_v43  ;;  %v1519_v8 = vmul.f32 1.442695, %v1364_v49  ;;  %v1365_v18 = vsub.f32 %v4311_v10, %v1216_v48  ;;  %v1366_v30 = vsub.f32 %v4315_v12, %v1216_v48 }
 0x1e1   : > { %v4656_v27 = vpop.eup %3605  ;;  %3625 = vpow2.f32 %v1513_v51  ;;  %v1367_v11 = vsub.f32 %v4317_v13, %v1216_v48  ;;  %v1368_v28 = vsub.f32 %v4322_v16, %v1216_v48  ;;  %v1727_v23 = vadd.f32 %v3590_v34, %v1726_v44 }
 0x1e2   : > { %v4660_v29 = vpop.eup %3607  ;;  %3627 = vpow2.f32 %v1515_v5  ;;  %v1521_v33 = vmul.f32 1.442695, %v1365_v18  ;;  %v1523_v55 = vmul.f32 1.442695, %v1366_v30  ;;  %v1886_v57 = vpack.c.bf16 %v3604_v7, %v3596_v62 }
 0x1e3   : > { %v4662_v58 = vpop.eup %3609  ;;  %3629 = vpow2.f32 %v1517_v25  ;;  %v1525_v10 = vmul.f32 1.442695, %v1367_v11  ;;  %v1527_v61 = vmul.f32 1.442695, %v1368_v28  ;;  %v1728_v12 = vadd.f32 %v3592_v20, %v1727_v23 }
 0x1e4   : > { %v3612_v37 = vpop.eup %3611  ;;  %3631 = vpow2.f32 %v1519_v8  ;;  %2241 = vmatprep.mubr.bf16.mxu0 %v1886_v57  ;;  %v1888_v13 = vpack.c.bf16 %v4660_v29, %v3600_v47  ;;  %v1732_v16 = vadd.f32 %v4645_v2, %v1731_v24  ;;  %v1885_v34 = vpack.c.bf16 %v4652_v26, %v4643_v42  ;;  %v1221_v36 = vpop.xlane.xlu0 %1220 }
 0x1e5   : > { %v4668_v17 = vpop.eup %3613  ;;  %3633 = vpow2.f32 %v1521_v33  ;;  %1729 = vadd.xlane.f32.xlu1 %v1728_v12  ;;  %v1887_v15 = vpack.c.bf16 %v4656_v27, %v4645_v2  ;;  %v1369_v20 = vsub.f32 %v4326_v19, %v1221_v36  ;;  %v1370_v41 = vsub.f32 %v4329_v21, %v1221_v36 }
 0x1e6   : > { %v4674_v43 = vpop.eup %3615  ;;  %3635 = vpow2.f32 %v1523_v55  ;;  %2402 = vmatprep.mubr.bf16.mxu1 %v1888_v13  ;;  %v1733_v60 = vadd.f32 %v3600_v47, %v1732_v16  ;;  %2242 = vmatmul.mubr.bf16.gmra.mrb[68].mxu0 %v1885_v34  ;;  %v1371_v42 = vsub.f32 %v4331_v22, %v1221_v36  ;;  %v1372_v62 = vsub.f32 %v4340_v35, %v1221_v36  ;;  %v1226_v46 = vpop.xlane.xlu1 %1225 }
 0x1e7   : > { %v3618_v31 = vpop.eup %3617  ;;  %3637 = vpow2.f32 %v1525_v10  ;;  %2403 = vmatmul.mubr.bf16.gmra.mrb[68].mxu1 %v1887_v15  ;;  %v1529_v63 = vmul.f32 1.442695, %v1369_v20  ;;  %v1531_v54 = vmul.f32 1.442695, %v1370_v41  ;;  %v1373_v19 = vsub.f32 %v4338_v32, %v1226_v46 }
 0x1e8   : > { %v3620_v2 = vpop.eup %3619  ;;  %3639 = vpow2.f32 %v1527_v61  ;;  %1734 = vadd.xlane.f32.xlu0 %v1733_v60  ;;  %v1533_v21 = vmul.f32 1.442695, %v1371_v42  ;;  %v1535_v14 = vmul.f32 1.442695, %v1372_v62  ;;  %v1374_v9 = vsub.f32 %v4343_v38, %v1226_v46 }
 0x1e9   : > { %v3622_v52 = vpop.eup %3621  ;;  %3641 = vpow2.f32 %v1529_v63  ;;  %v1375_v22 = vsub.f32 %v4345_v39, %v1226_v46  ;;  %v1376_v35 = vsub.f32 %v4350_v45, %v1226_v46  ;;  %v1537_v47 = vmul.f32 1.442695, %v1373_v19 }
 0x1ea   : > { %v3624_v49 = vpop.eup %3623  ;;  %3643 = vpow2.f32 %v1531_v54  ;;  %v1539_v48 = vmul.f32 1.442695, %v1374_v9  ;;  %v1736_v44 = vadd.f32 %v3604_v7, %v4652_v26  ;;  %v1890_v32 = vpack.c.bf16 %v3620_v2, %v3612_v37  ;;  %v5201_v9 = vld [vmem:[#allocation4_spill] sm:$0xff] }
 0x1eb   : > { %v4683_v24 = vpop.eup %3625  ;;  %3645 = vpow2.f32 %v1533_v21  ;;  %v1541_v51 = vmul.f32 1.442695, %v1375_v22  ;;  %v1543_v5 = vmul.f32 1.442695, %v1376_v35  ;;  %v1892_v38 = vpack.c.bf16 %v3624_v49, %v4674_v43  ;;  %v5200_v21 = vld [vmem:[#allocation3_spill] sm:$0xff] }
 0x1ec   : > { %v3628_v25 = vpop.eup %3627  ;;  %3647 = vpow2.f32 %v1535_v14  ;;  %v1737_v39 = vadd.f32 %v4656_v27, %v1736_v44  ;;  %2249 = vmatprep.mubr.bf16.mxu0 %v1890_v32  ;;  %v1741_v45 = vadd.f32 %v3612_v37, %v4662_v58  ;;  %v1889_v8 = vpack.c.bf16 %v3618_v31, %v4662_v58  ;;  %v1231_v18 = vpop.xlane.xlu0 %1230  ;;  %v5203_v44 = vld [vmem:[#allocation7_spill] sm:$0xff] }
 0x1ed   : > { %v4689_v30 = vpop.eup %3629  ;;  %3649 = vpow2.f32 %v1537_v47  ;;  %2410 = vmatprep.mubr.bf16.mxu1 %v1892_v38  ;;  %v1891_v26 = vpack.c.bf16 %v3622_v52, %v4668_v17  ;;  %v1377_v7 = vsub.f32 %v4354_v53, %v1231_v18  ;;  %v1378_v11 = vsub.f32 %v4357_v56, %v1231_v18 }
 0x1ee   : > { %v4694_v28 = vpop.eup %3631  ;;  %3651 = vpow2.f32 %v1539_v48  ;;  %v1738_v27 = vadd.f32 %v4660_v29, %v1737_v39  ;;  %v1742_v23 = vadd.f32 %v4668_v17, %v1741_v45  ;;  %2250 = vmatmul.mubr.bf16.gmra.mrb[72].mxu0 %v1889_v8  ;;  %v1379_v33 = vsub.f32 %v4359_v59, %v1231_v18  ;;  %v1236_v55 = vpop.xlane.xlu1 %1235  ;;  %v5199_v17 = vld [vmem:[#allocation2_spill] sm:$0xff] }
 0x1ef   : > { %v3634_v57 = vpop.eup %3633  ;;  %3653 = vpow2.f32 %v1541_v51  ;;  %2411 = vmatmul.mubr.bf16.gmra.mrb[72].mxu1 %v1891_v26  ;;  %v1380_v58 = vsub.f32 %v4365_v3, %v1231_v18  ;;  %v1545_v10 = vmul.f32 1.442695, %v1377_v7  ;;  %v1547_v53 = vmul.f32 1.442695, %v1378_v11  ;;  %v5204_v18 = vld [vmem:[#allocation6_spill] sm:$0xff]  ;;  %v5205_v11 = vld [vmem:[#allocation8_spill] sm:$0xff] }
 0x1f0   : > { %v3636_v61 = vpop.eup %3635  ;;  %3655 = vpow2.f32 %v1543_v5  ;;  %1739 = vadd.xlane.f32.xlu1 %v1738_v27  ;;  %v1743_v56 = vadd.f32 %v4674_v43, %v1742_v23  ;;  %v1549_v12 = vmul.f32 1.442695, %v1379_v33  ;;  %v1746_v29 = vadd.f32 %v3620_v2, %v3618_v31  ;;  %v5206_v23 = vld [vmem:[#allocation9_spill] sm:$0xff] }
 0x1f1   : > { %v3638_v37 = vpop.eup %3637  ;;  %3657 = vpow2.f32 %v1545_v10  ;;  %v1551_v13 = vmul.f32 1.442695, %v1380_v58  ;;  %v1381_v59 = vsub.f32 %v4363_v1, %v1236_v55  ;;  %v1382_v16 = vsub.f32 %v4367_v4, %v1236_v55  ;;  %v5207_v58 = vld [vmem:[#allocation10_spill] sm:$0xff] }
 0x1f2   : > { %v3640_v34 = vpop.eup %3639  ;;  %1744 = vadd.xlane.f32.xlu0 %v1743_v56  ;;  %3659 = vpow2.f32 %v1547_v53  ;;  %v1747_v3 = vadd.f32 %v3622_v52, %v1746_v29  ;;  %v1383_v36 = vsub.f32 %v4369_v6, %v1236_v55  ;;  %v1384_v15 = vsub.f32 %v5199_v17, %v1236_v55  ;;  %v5208_v17 = vld [vmem:[#allocation11_spill] sm:$0xff] }
 0x1f3   : > { %v4705_v20 = vpop.eup %3641  ;;  %3661 = vpow2.f32 %v1549_v12  ;;  %v1553_v41 = vmul.f32 1.442695, %v1381_v59  ;;  %v1555_v43 = vmul.f32 1.442695, %v1382_v16  ;;  %v1894_v60 = vpack.c.bf16 %v3636_v61, %v3628_v25 }
 0x1f4   : > { %v3644_v42 = vpop.eup %3643  ;;  %3663 = vpow2.f32 %v1551_v13  ;;  %v1748_v62 = vadd.f32 %v3624_v49, %v1747_v3  ;;  %v1557_v1 = vmul.f32 1.442695, %v1383_v36  ;;  %v1559_v46 = vmul.f32 1.442695, %v1384_v15  ;;  %v1241_v4 = vpop.xlane.xlu0 %1240  ;;  %v5202_v49 = vld [vmem:[#allocation5_spill] sm:$0xff] }
 0x1f5   : > { %v4707_v31 = vpop.eup %3645  ;;  %3665 = vpow2.f32 %v1553_v41  ;;  %2257 = vmatprep.mubr.bf16.mxu0 %v1894_v60  ;;  %v1896_v6 = vpack.c.bf16 %v3640_v34, %v4694_v28  ;;  %v1751_v63 = vadd.f32 %v3628_v25, %v4683_v24  ;;  %v1893_v54 = vpack.c.bf16 %v3634_v57, %v4683_v24  ;;  %v5209_v60 = vld [vmem:[#allocation12_spill] sm:$0xff] }
 0x1f6   : > { %v4712_v19 = vpop.eup %3647  ;;  %1749 = vadd.xlane.f32.xlu1 %v1748_v62  ;;  %3667 = vpow2.f32 %v1555_v43  ;;  %v1895_v2 = vpack.c.bf16 %v3638_v37, %v4689_v30  ;;  %v1385_v14 = vsub.f32 %v5200_v21, %v1241_v4  ;;  %v1386_v52 = vsub.f32 %v5201_v9, %v1241_v4  ;;  %v1246_v22 = vpop.xlane.xlu1 %1245 }
 0x1f7   : > { %v3650_v35 = vpop.eup %3649  ;;  %3669 = vpow2.f32 %v1557_v1  ;;  %2418 = vmatprep.mubr.bf16.mxu1 %v1896_v6  ;;  %v1752_v47 = vadd.f32 %v4689_v30, %v1751_v63  ;;  %2258 = vmatmul.mubr.bf16.gmra.mrb[76].mxu0 %v1893_v54  ;;  %v1387_v48 = vsub.f32 %v5202_v49, %v1241_v4  ;;  %v1388_v32 = vsub.f32 %v5203_v44, %v1241_v4  ;;  %v5210_v1 = vld [vmem:[#allocation13_spill] sm:$0xff] }
 0x1f8   : > { %v3652_v24 = vpop.eup %3651  ;;  %3671 = vpow2.f32 %v1559_v46  ;;  %2419 = vmatmul.mubr.bf16.gmra.mrb[76].mxu1 %v1895_v2  ;;  %v1561_v51 = vmul.f32 1.442695, %v1385_v14  ;;  %v1563_v5 = vmul.f32 1.442695, %v1386_v52  ;;  %v1756_v38 = vadd.f32 %v3636_v61, %v3634_v57 }
 0x1f9   : > { %v3654_v25 = vpop.eup %3653  ;;  %v1753_v39 = vadd.f32 %v4694_v28, %v1752_v47  ;;  %v1565_v45 = vmul.f32 1.442695, %v1387_v48  ;;  %v1567_v8 = vmul.f32 1.442695, %v1388_v32  ;;  %v1389_v26 = vsub.f32 %v5204_v18, %v1246_v22  ;;  %v5212_v47 = vld [vmem:[#allocation14_spill] sm:$0xff]  ;;  %v5213_v48 = vld [vmem:[#allocation16_spill] sm:$0xff] }
 0x1fa   : > { %v3656_v7 = vpop.eup %3655  ;;  %3673 = vpow2.f32 %v1561_v51  ;;  %v1757_v30 = vadd.f32 %v3638_v37, %v1756_v38  ;;  %v1390_v27 = vsub.f32 %v5205_v11, %v1246_v22  ;;  %v1391_v33 = vsub.f32 %v5206_v23, %v1246_v22  ;;  %v5214_v32 = vld [vmem:[#allocation17_spill] sm:$0xff] }
 0x1fb   : > { %v4724_v55 = vpop.eup %3657  ;;  %1754 = vadd.xlane.f32.xlu0 %v1753_v39  ;;  %3675 = vpow2.f32 %v1563_v5  ;;  %v1392_v57 = vsub.f32 %v5207_v58, %v1246_v22  ;;  %v1569_v10 = vmul.f32 1.442695, %v1389_v26  ;;  %v1898_v53 = vpack.c.bf16 %v3652_v24, %v3644_v42  ;;  %v5216_v58 = vld [vmem:[#allocation19_spill] sm:$0xff] }
 0x1fc   : > { %v4727_v28 = vpop.eup %3659  ;;  %3677 = vpow2.f32 %v1565_v45  ;;  %v1758_v61 = vadd.f32 %v3640_v34, %v1757_v30  ;;  %v1571_v56 = vmul.f32 1.442695, %v1390_v27  ;;  %v1573_v12 = vmul.f32 1.442695, %v1391_v33  ;;  %v1251_v29 = vpop.xlane.xlu0 %1250 }
 0x1fd   : > { %v4729_v37 = vpop.eup %3661  ;;  %3679 = vpow2.f32 %v1567_v8  ;;  %v1575_v13 = vmul.f32 1.442695, %v1392_v57  ;;  %2265 = vmatprep.mubr.bf16.mxu0 %v1898_v53  ;;  %v1900_v59 = vpack.c.bf16 %v3656_v7, %v4712_v19  ;;  %v1761_v16 = vadd.f32 %v3644_v42, %v4705_v20 }
 0x1fe   : > { %v4733_v3 = vpop.eup %3663  ;;  %1759 = vadd.xlane.f32.xlu1 %v1758_v61  ;;  %3681 = vpow2.f32 %v1569_v10  ;;  %v1897_v36 = vpack.c.bf16 %v3650_v35, %v4705_v20  ;;  %v1899_v34 = vpack.c.bf16 %v3654_v25, %v4707_v31  ;;  %v1393_v15 = vsub.f32 %v5208_v17, %v1251_v29  ;;  %v1256_v46 = vpop.xlane.xlu1 %1255  ;;  %v5211_v20 = vld [vmem:[#allocation15_spill] sm:$0xff]  ;;  %v5217_v10 = vld [vmem:[#allocation20_spill] sm:$0xff] }
 0x1ff   : > { %v4738_v41 = vpop.eup %3665  ;;  %3683 = vpow2.f32 %v1571_v56  ;;  %2426 = vmatprep.mubr.bf16.mxu1 %v1900_v59  ;;  %v1762_v43 = vadd.f32 %v4707_v31, %v1761_v16  ;;  %v1394_v62 = vsub.f32 %v5209_v60, %v1251_v29  ;;  %v1395_v42 = vsub.f32 %v5210_v1, %v1251_v29 }
 0x200   : > { %v3668_v4 = vpop.eup %3667  ;;  %3685 = vpow2.f32 %v1573_v12  ;;  %2266 = vmatmul.mubr.bf16.gmra.mrb[80].mxu0 %v1897_v36  ;;  %2427 = vmatmul.mubr.bf16.gmra.mrb[80].mxu1 %v1899_v34  ;;  %v1396_v6 = vsub.f32 %v5211_v20, %v1251_v29  ;;  %v1577_v63 = vmul.f32 1.442695, %v1393_v15  ;;  %v1766_v54 = vadd.f32 %v3652_v24, %v3650_v35  ;;  %v5215_v35 = vld [vmem:[#allocation18_spill] sm:$0xff] }
 0x201   : > { %v3670_v2 = vpop.eup %3669  ;;  %3687 = vpow2.f32 %v1575_v13  ;;  %v1763_v21 = vadd.f32 %v4712_v19, %v1762_v43  ;;  %v1579_v14 = vmul.f32 1.442695, %v1394_v62  ;;  %v1581_v9 = vmul.f32 1.442695, %v1395_v42  ;;  %v5219_v13 = vld [vmem:[#allocation23_spill] sm:$0xff]  ;;  %v5220_v62 = vld [vmem:[#allocation22_spill] sm:$0xff] }
 0x202   : > { %v4745_v31 = vpop.eup %3671  ;;  %3689 = vpow2.f32 %v1577_v63  ;;  %v1583_v52 = vmul.f32 1.442695, %v1396_v6  ;;  %v1767_v22 = vadd.f32 %v3654_v25, %v1766_v54  ;;  %v1397_v49 = vsub.f32 %v5212_v47, %v1256_v46  ;;  %v5222_v6 = vld [vmem:[#allocation25_spill] sm:$0xff] }
 0x203   : > { %1764 = vadd.xlane.f32.xlu0 %v1763_v21  ;;  %3691 = vpow2.f32 %v1579_v14  ;;  %v1398_v44 = vsub.f32 %v5213_v48, %v1256_v46  ;;  %v1399_v51 = vsub.f32 %v5214_v32, %v1256_v46  ;;  %v1400_v24 = vsub.f32 %v5215_v35, %v1256_v46  ;;  %v5221_v46 = vld [vmem:[#allocation24_spill] sm:$0xff]  ;;  %v5223_v21 = vld [vmem:[#allocation26_spill] sm:$0xff] }
 0x204   : > { %v4751_v5 = vpop.eup %3673  ;;  %3693 = vpow2.f32 %v1581_v9  ;;  %v1768_v19 = vadd.f32 %v3656_v7, %v1767_v22  ;;  %v1585_v38 = vmul.f32 1.442695, %v1397_v49  ;;  %v1902_v39 = vpack.c.bf16 %v3668_v4, %v4727_v28  ;;  %v1261_v45 = vpop.xlane.xlu0 %1260 }
 0x205   : > { %v3676_v8 = vpop.eup %3675  ;;  %3695 = vpow2.f32 %v1583_v52  ;;  %v1587_v25 = vmul.f32 1.442695, %v1398_v44  ;;  %v1589_v18 = vmul.f32 1.442695, %v1399_v51  ;;  %v1591_v26 = vmul.f32 1.442695, %v1400_v24 }
 0x206   : > { %v4754_v30 = vpop.eup %3677  ;;  %1769 = vadd.xlane.f32.xlu1 %v1768_v19  ;;  %3697 = vpow2.f32 %v1585_v38  ;;  %2273 = vmatprep.mubr.bf16.mxu0 %v1902_v39  ;;  %v1904_v11 = vpack.c.bf16 %v4745_v31, %v4733_v3  ;;  %v1771_v7 = vadd.f32 %v4727_v28, %v4724_v55  ;;  %v1901_v27 = vpack.c.bf16 %v4738_v41, %v4724_v55  ;;  %v1266_v61 = vpop.xlane.xlu1 %1265  ;;  %v5218_v28 = vld [vmem:[#allocation21_spill] sm:$0xff]  ;;  %v5225_v39 = vld [vmem:[#allocation28_spill] sm:$0xff] }
 0x207   : > { %v4762_v23 = vpop.eup %3679  ;;  %3699 = vpow2.f32 %v1587_v25  ;;  %v1903_v33 = vpack.c.bf16 %v3670_v2, %v4729_v37  ;;  %v1401_v57 = vsub.f32 %v5216_v58, %v1261_v45  ;;  %v1402_v53 = vsub.f32 %v5217_v10, %v1261_v45  ;;  %v5226_v25 = vld [vmem:[#allocation29_spill] sm:$0xff] }
 0x208   : > { %v3682_v56 = vpop.eup %3681  ;;  %3701 = vpow2.f32 %v1589_v18  ;;  %2434 = vmatprep.mubr.bf16.mxu1 %v1904_v11  ;;  %v1772_v12 = vadd.f32 %v4729_v37, %v1771_v7  ;;  %2274 = vmatmul.mubr.bf16.gmra.mrb[84].mxu0 %v1901_v27  ;;  %v1403_v29 = vsub.f32 %v5218_v28, %v1261_v45  ;;  %v1404_v55 = vsub.f32 %v5219_v13, %v1261_v45 }
 0x209   : > { %v3684_v59 = vpop.eup %3683  ;;  %3703 = vpow2.f32 %v1591_v26  ;;  %2435 = vmatmul.mubr.bf16.gmra.mrb[84].mxu1 %v1903_v33  ;;  %v1593_v16 = vmul.f32 1.442695, %v1401_v57  ;;  %v1595_v36 = vmul.f32 1.442695, %v1402_v53  ;;  %v1776_v34 = vadd.f32 %v3668_v4, %v4738_v41 }
 0x20a   : > { %v3686_v17 = vpop.eup %3685  ;;  %v1773_v15 = vadd.f32 %v4733_v3, %v1772_v12  ;;  %v1597_v43 = vmul.f32 1.442695, %v1403_v29  ;;  %v1599_v60 = vmul.f32 1.442695, %v1404_v55  ;;  %v1405_v1 = vsub.f32 %v5220_v62, %v1266_v61  ;;  %v5228_v12 = vld [vmem:[#allocation30_spill] sm:$0xff]  ;;  %v5229_v29 = vld [vmem:[#allocation32_spill] sm:$0xff] }
 0x20b   : > { %v3688_v37 = vpop.eup %3687  ;;  %3705 = vpow2.f32 %v1593_v16  ;;  %v1777_v42 = vadd.f32 %v3670_v2, %v1776_v34  ;;  %v1406_v20 = vsub.f32 %v5221_v46, %v1266_v61  ;;  %v1407_v63 = vsub.f32 %v5222_v6, %v1266_v61  ;;  %v5230_v55 = vld [vmem:[#allocation33_spill] sm:$0xff] }
 0x20c   : > { %v4775_v54 = vpop.eup %3689  ;;  %1774 = vadd.xlane.f32.xlu0 %v1773_v15  ;;  %3707 = vpow2.f32 %v1595_v36  ;;  %v1408_v41 = vsub.f32 %v5223_v21, %v1266_v61  ;;  %v1601_v4 = vmul.f32 1.442695, %v1405_v1  ;;  %v1906_v14 = vpack.c.bf16 %v3684_v59, %v3676_v8  ;;  %v1271_v3 = vpop.xlane.xlu0 %1270  ;;  %v5232_v21 = vld [vmem:[#allocation35_spill] sm:$0xff] }
 0x20d   : > { %v3692_v9 = vpop.eup %3691  ;;  %3709 = vpow2.f32 %v1597_v43  ;;  %v1778_v52 = vadd.f32 %v4745_v31, %v1777_v42  ;;  %v1603_v22 = vmul.f32 1.442695, %v1406_v20  ;;  %v1605_v47 = vmul.f32 1.442695, %v1407_v63  ;;  %v5224_v31 = vld [vmem:[#allocation27_spill] sm:$0xff] }
 0x20e   : > { %v4779_v2 = vpop.eup %3693  ;;  %3711 = vpow2.f32 %v1599_v60  ;;  %v1607_v49 = vmul.f32 1.442695, %v1408_v41  ;;  %2281 = vmatprep.mubr.bf16.mxu0 %v1906_v14  ;;  %v1908_v48 = vpack.c.bf16 %v3688_v37, %v4762_v23  ;;  %v1781_v44 = vadd.f32 %v3676_v8, %v4751_v5  ;;  %v1276_v18 = vpop.xlane.xlu1 %1275 }
 0x20f   : > { %v4783_v32 = vpop.eup %3695  ;;  %1779 = vadd.xlane.f32.xlu1 %v1778_v52  ;;  %3713 = vpow2.f32 %v1601_v4  ;;  %v1905_v51 = vpack.c.bf16 %v3682_v56, %v4751_v5  ;;  %v1907_v35 = vpack.c.bf16 %v3686_v17, %v4754_v30  ;;  %v1409_v24 = vsub.f32 %v5224_v31, %v1271_v3  ;;  %v5227_v5 = vld [vmem:[#allocation31_spill] sm:$0xff]  ;;  %v5233_v4 = vld [vmem:[#allocation36_spill] sm:$0xff] }
 0x210   : > { %v4788_v19 = vpop.eup %3697  ;;  %3715 = vpow2.f32 %v1603_v22  ;;  %2442 = vmatprep.mubr.bf16.mxu1 %v1908_v48  ;;  %v1782_v38 = vadd.f32 %v4754_v30, %v1781_v44  ;;  %v1410_v45 = vsub.f32 %v5225_v39, %v1271_v3  ;;  %v1411_v8 = vsub.f32 %v5226_v25, %v1271_v3 }
 0x211   : > { %v3700_v26 = vpop.eup %3699  ;;  %3717 = vpow2.f32 %v1605_v47  ;;  %2282 = vmatmul.mubr.bf16.gmra.mrb[88].mxu0 %v1905_v51  ;;  %2443 = vmatmul.mubr.bf16.gmra.mrb[88].mxu1 %v1907_v35  ;;  %v1412_v11 = vsub.f32 %v5227_v5, %v1271_v3  ;;  %v1609_v7 = vmul.f32 1.442695, %v1409_v24  ;;  %v1786_v27 = vadd.f32 %v3684_v59, %v3682_v56  ;;  %v5231_v56 = vld [vmem:[#allocation34_spill] sm:$0xff] }
 0x212   : > { %v3702_v33 = vpop.eup %3701  ;;  %3719 = vpow2.f32 %v1607_v49  ;;  %v1783_v58 = vadd.f32 %v4762_v23, %v1782_v38  ;;  %v1611_v57 = vmul.f32 1.442695, %v1410_v45  ;;  %v1613_v10 = vmul.f32 1.442695, %v1411_v8  ;;  %v5235_v49 = vld [vmem:[#allocation39_spill] sm:$0xff]  ;;  %v5236_v45 = vld [vmem:[#allocation38_spill] sm:$0xff] }
 0x213   : > { %v4795_v30 = vpop.eup %3703  ;;  %3721 = vpow2.f32 %v1609_v7  ;;  %v1615_v53 = vmul.f32 1.442695, %v1412_v11  ;;  %v1787_v61 = vadd.f32 %v3686_v17, %v1786_v27  ;;  %v1413_v28 = vsub.f32 %v5228_v12, %v1276_v18  ;;  %v5238_v11 = vld [vmem:[#allocation41_spill] sm:$0xff] }
 0x214   : > { %1784 = vadd.xlane.f32.xlu0 %v1783_v58  ;;  %3723 = vpow2.f32 %v1611_v57  ;;  %v1414_v13 = vsub.f32 %v5229_v29, %v1276_v18  ;;  %v1415_v16 = vsub.f32 %v5230_v55, %v1276_v18  ;;  %v1416_v59 = vsub.f32 %v5231_v56, %v1276_v18  ;;  %v1281_v43 = vpop.xlane.xlu0 %1280  ;;  %v5237_v18 = vld [vmem:[#allocation40_spill] sm:$0xff]  ;;  %v5239_v58 = vld [vmem:[#allocation42_spill] sm:$0xff] }
 0x215   : > { %v4801_v36 = vpop.eup %3705  ;;  %3725 = vpow2.f32 %v1613_v10  ;;  %v1788_v23 = vadd.f32 %v3688_v37, %v1787_v61  ;;  %v1617_v34 = vmul.f32 1.442695, %v1413_v28  ;;  %v1910_v15 = vpack.c.bf16 %v3700_v26, %v3692_v9 }
 0x216   : > { %v3708_v60 = vpop.eup %3707  ;;  %3727 = vpow2.f32 %v1615_v53  ;;  %v1619_v17 = vmul.f32 1.442695, %v1414_v13  ;;  %v1621_v62 = vmul.f32 1.442695, %v1415_v16  ;;  %v1623_v1 = vmul.f32 1.442695, %v1416_v59  ;;  %v1286_v3 = vpop.xlane.xlu1 %1285 }
 0x217   : > { %v4803_v42 = vpop.eup %3709  ;;  %1789 = vadd.xlane.f32.xlu1 %v1788_v23  ;;  %3729 = vpow2.f32 %v1617_v34  ;;  %2289 = vmatprep.mubr.bf16.mxu0 %v1910_v15  ;;  %v1912_v46 = vpack.c.bf16 %v4795_v30, %v4783_v32  ;;  %v1791_v20 = vadd.f32 %v3692_v9, %v4775_v54  ;;  %v1909_v37 = vpack.c.bf16 %v4788_v19, %v4775_v54  ;;  %v5234_v9 = vld [vmem:[#allocation37_spill] sm:$0xff]  ;;  %v5241_v15 = vld [vmem:[#allocation44_spill] sm:$0xff] }
 0x218   : > { %v4810_v6 = vpop.eup %3711  ;;  %3731 = vpow2.f32 %v1619_v17  ;;  %v1911_v63 = vpack.c.bf16 %v3702_v33, %v4779_v2  ;;  %v1417_v41 = vsub.f32 %v5232_v21, %v1281_v43  ;;  %v1418_v14 = vsub.f32 %v5233_v4, %v1281_v43  ;;  %v5242_v17 = vld [vmem:[#allocation45_spill] sm:$0xff] }
 0x219   : > { %v3714_v52 = vpop.eup %3713  ;;  %3733 = vpow2.f32 %v1621_v62  ;;  %2450 = vmatprep.mubr.bf16.mxu1 %v1912_v46  ;;  %v1792_v22 = vadd.f32 %v4779_v2, %v1791_v20  ;;  %2290 = vmatmul.mubr.bf16.gmra.mrb[92].mxu0 %v1909_v37  ;;  %v1419_v47 = vsub.f32 %v5234_v9, %v1281_v43  ;;  %v1420_v54 = vsub.f32 %v5235_v49, %v1281_v43 }
 0x21a   : > { %v3716_v48 = vpop.eup %3715  ;;  %3735 = vpow2.f32 %v1623_v1  ;;  %2451 = vmatmul.mubr.bf16.gmra.mrb[92].mxu1 %v1911_v63  ;;  %v1625_v44 = vmul.f32 1.442695, %v1417_v41  ;;  %v1627_v51 = vmul.f32 1.442695, %v1418_v14  ;;  %v1796_v35 = vadd.f32 %v3700_v26, %v4788_v19 }
 0x21b   : > { %v3718_v31 = vpop.eup %3717  ;;  %v1793_v24 = vadd.f32 %v4783_v32, %v1792_v22  ;;  %v1629_v38 = vmul.f32 1.442695, %v1419_v47  ;;  %v1631_v39 = vmul.f32 1.442695, %v1420_v54  ;;  %v1421_v25 = vsub.f32 %v5236_v45, %v1286_v3  ;;  %v5244_v22 = vld [vmem:[#allocation46_spill] sm:$0xff]  ;;  %v5245_v47 = vld [vmem:[#allocation48_spill] sm:$0xff] }
 0x21c   : > { %v3720_v2 = vpop.eup %3719  ;;  %3737 = vpow2.f32 %v1625_v44  ;;  %v1797_v8 = vadd.f32 %v3702_v33, %v1796_v35  ;;  %v1422_v5 = vsub.f32 %v5237_v18, %v1286_v3  ;;  %v1423_v7 = vsub.f32 %v5238_v11, %v1286_v3  ;;  %v1291_v32 = vpop.xlane.xlu0 %1290  ;;  %v5246_v54 = vld [vmem:[#allocation49_spill] sm:$0xff] }
 0x21d   : > { %v4823_v27 = vpop.eup %3721  ;;  %1794 = vadd.xlane.f32.xlu0 %v1793_v24  ;;  %3739 = vpow2.f32 %v1627_v51  ;;  %v1424_v19 = vsub.f32 %v5239_v58, %v1286_v3  ;;  %v1633_v26 = vmul.f32 1.442695, %v1421_v25  ;;  %v1914_v57 = vpack.c.bf16 %v3716_v48, %v3708_v60  ;;  %v5248_v58 = vld [vmem:[#allocation51_spill] sm:$0xff] }
 0x21e   : > { %v3724_v10 = vpop.eup %3723  ;;  %3741 = vpow2.f32 %v1629_v38  ;;  %v1798_v53 = vadd.f32 %v4795_v30, %v1797_v8  ;;  %v1635_v61 = vmul.f32 1.442695, %v1422_v5  ;;  %v1637_v12 = vmul.f32 1.442695, %v1423_v7  ;;  %v5240_v30 = vld [vmem:[#allocation43_spill] sm:$0xff]  ;;  %v1296_v62 = vpop.xlane.xlu1 %1295 }
 0x21f   : > { %v4827_v33 = vpop.eup %3725  ;;  %3743 = vpow2.f32 %v1631_v39  ;;  %v1639_v28 = vmul.f32 1.442695, %v1424_v19  ;;  %2297 = vmatprep.mubr.bf16.mxu0 %v1914_v57  ;;  %v1916_v29 = vpack.c.bf16 %v3720_v2, %v4810_v6  ;;  %v1801_v13 = vadd.f32 %v3708_v60, %v4801_v36 }
 0x220   : > { %v4831_v55 = vpop.eup %3727  ;;  %1799 = vadd.xlane.f32.xlu1 %v1798_v53  ;;  %3745 = vpow2.f32 %v1633_v26  ;;  %v1913_v16 = vpack.c.bf16 %v3714_v52, %v4801_v36  ;;  %v1915_v56 = vpack.c.bf16 %v3718_v31, %v4803_v42  ;;  %v1425_v59 = vsub.f32 %v5240_v30, %v1291_v32  ;;  %v5243_v36 = vld [vmem:[#allocation47_spill] sm:$0xff]  ;;  %v5249_v26 = vld [vmem:[#allocation52_spill] sm:$0xff] }
 0x221   : > { %v4836_v23 = vpop.eup %3729  ;;  %3747 = vpow2.f32 %v1635_v61  ;;  %2458 = vmatprep.mubr.bf16.mxu1 %v1916_v29  ;;  %v1802_v34 = vadd.f32 %v4803_v42, %v1801_v13  ;;  %v1426_v43 = vsub.f32 %v5241_v15, %v1291_v32  ;;  %v1427_v60 = vsub.f32 %v5242_v17, %v1291_v32 }
 0x222   : > { %v3732_v1 = vpop.eup %3731  ;;  %3749 = vpow2.f32 %v1637_v12  ;;  %2298 = vmatmul.mubr.bf16.gmra.mrb[96].mxu0 %v1913_v16  ;;  %2459 = vmatmul.mubr.bf16.gmra.mrb[96].mxu1 %v1915_v56  ;;  %v1428_v46 = vsub.f32 %v5243_v36, %v1291_v32  ;;  %v1641_v20 = vmul.f32 1.442695, %v1425_v59  ;;  %v1806_v37 = vadd.f32 %v3716_v48, %v3714_v52  ;;  %v5247_v52 = vld [vmem:[#allocation50_spill] sm:$0xff] }
 0x223   : > { %v3734_v63 = vpop.eup %3733  ;;  %3751 = vpow2.f32 %v1639_v28  ;;  %v1803_v21 = vadd.f32 %v4810_v6, %v1802_v34  ;;  %v1643_v41 = vmul.f32 1.442695, %v1426_v43  ;;  %v1645_v4 = vmul.f32 1.442695, %v1427_v60  ;;  %v5251_v28 = vld [vmem:[#allocation55_spill] sm:$0xff]  ;;  %v5252_v43 = vld [vmem:[#allocation54_spill] sm:$0xff] }
 0x224   : > { %v4843_v42 = vpop.eup %3735  ;;  %3753 = vpow2.f32 %v1641_v20  ;;  %v1647_v14 = vmul.f32 1.442695, %v1428_v46  ;;  %v1807_v3 = vadd.f32 %v3718_v31, %v1806_v37  ;;  %v1429_v9 = vsub.f32 %v5244_v22, %v1296_v62  ;;  %v1301_v38 = vpop.xlane.xlu0 %1300  ;;  %v5254_v46 = vld [vmem:[#allocation57_spill] sm:$0xff] }
 0x225   : > { %1804 = vadd.xlane.f32.xlu0 %v1803_v21  ;;  %3755 = vpow2.f32 %v1643_v41  ;;  %v1430_v49 = vsub.f32 %v5245_v47, %v1296_v62  ;;  %v1431_v44 = vsub.f32 %v5246_v54, %v1296_v62  ;;  %v1432_v48 = vsub.f32 %v5247_v52, %v1296_v62  ;;  %v5253_v62 = vld [vmem:[#allocation56_spill] sm:$0xff]  ;;  %v5255_v21 = vld [vmem:[#allocation58_spill] sm:$0xff] }
 0x226   : > { %v4849_v51 = vpop.eup %3737  ;;  %3757 = vpow2.f32 %v1645_v4  ;;  %v1808_v6 = vadd.f32 %v3720_v2, %v1807_v3  ;;  %v1649_v35 = vmul.f32 1.442695, %v1429_v9  ;;  %v1918_v24 = vpack.c.bf16 %v3732_v1, %v3724_v10  ;;  %v1306_v32 = vpop.xlane.xlu1 %1305 }
 0x227   : > { %v3740_v39 = vpop.eup %3739  ;;  %3759 = vpow2.f32 %v1647_v14  ;;  %v1651_v31 = vmul.f32 1.442695, %v1430_v49  ;;  %v1653_v45 = vmul.f32 1.442695, %v1431_v44  ;;  %v1655_v25 = vmul.f32 1.442695, %v1432_v48 }
 0x228   : > { %v4851_v8 = vpop.eup %3741  ;;  %1809 = vadd.xlane.f32.xlu1 %v1808_v6  ;;  %3761 = vpow2.f32 %v1649_v35  ;;  %2305 = vmatprep.mubr.bf16.mxu0 %v1918_v24  ;;  %v1920_v18 = vpack.c.bf16 %v4843_v42, %v4831_v55  ;;  %v1811_v5 = vadd.f32 %v3724_v10, %v4823_v27  ;;  %v1917_v2 = vpack.c.bf16 %v4836_v23, %v4823_v27  ;;  %v5250_v10 = vld [vmem:[#allocation53_spill] sm:$0xff]  ;;  %v5257_v24 = vld [vmem:[#allocation60_spill] sm:$0xff] }
 0x229   : > { %v4858_v11 = vpop.eup %3743  ;;  %3763 = vpow2.f32 %v1651_v31  ;;  %v1919_v7 = vpack.c.bf16 %v3734_v63, %v4827_v33  ;;  %v1433_v19 = vsub.f32 %v5248_v58, %v1301_v38  ;;  %v1434_v57 = vsub.f32 %v5249_v26, %v1301_v38  ;;  %v5258_v31 = vld [vmem:[#allocation61_spill] sm:$0xff] }
 0x22a   : > { %v3746_v53 = vpop.eup %3745  ;;  %3765 = vpow2.f32 %v1653_v45  ;;  %2466 = vmatprep.mubr.bf16.mxu1 %v1920_v18  ;;  %v1812_v61 = vadd.f32 %v4827_v33, %v1811_v5  ;;  %2306 = vmatmul.mubr.bf16.gmra.mrb[100].mxu0 %v1917_v2  ;;  %v1435_v12 = vsub.f32 %v5250_v10, %v1301_v38  ;;  %v1436_v27 = vsub.f32 %v5251_v28, %v1301_v38 }
 0x22b   : > { %v3748_v29 = vpop.eup %3747  ;;  %3767 = vpow2.f32 %v1655_v25  ;;  %2467 = vmatmul.mubr.bf16.gmra.mrb[100].mxu1 %v1919_v7  ;;  %v1657_v13 = vmul.f32 1.442695, %v1433_v19  ;;  %v1659_v16 = vmul.f32 1.442695, %v1434_v57  ;;  %v1816_v56 = vadd.f32 %v3732_v1, %v4836_v23 }
 0x22c   : > { %v3750_v30 = vpop.eup %3749  ;;  %v1813_v59 = vadd.f32 %v4831_v55, %v1812_v61  ;;  %v1661_v34 = vmul.f32 1.442695, %v1435_v12  ;;  %v1663_v15 = vmul.f32 1.442695, %v1436_v27  ;;  %v1437_v17 = vsub.f32 %v5252_v43, %v1306_v32  ;;  %v1311_v55 = vpop.xlane.xlu0 %1310  ;;  %v5260_v61 = vld [vmem:[#allocation62_spill] sm:$0xff]  ;;  %v5261_v12 = vld [vmem:[#allocation64_spill] sm:$0xff] }
 0x22d   : > { %v3752_v33 = vpop.eup %3751  ;;  %3769 = vpow2.f32 %v1657_v13  ;;  %v1817_v60 = vadd.f32 %v3734_v63, %v1816_v56  ;;  %v1438_v36 = vsub.f32 %v5253_v62, %v1306_v32  ;;  %v1439_v20 = vsub.f32 %v5254_v46, %v1306_v32  ;;  %v5262_v27 = vld [vmem:[#allocation65_spill] sm:$0xff] }
 0x22e   : > { %v4871_v37 = vpop.eup %3753  ;;  %1814 = vadd.xlane.f32.xlu0 %v1813_v59  ;;  %3771 = vpow2.f32 %v1659_v16  ;;  %v1440_v23 = vsub.f32 %v5255_v21, %v1306_v32  ;;  %v1665_v1 = vmul.f32 1.442695, %v1437_v17  ;;  %v1922_v41 = vpack.c.bf16 %v3748_v29, %v3740_v39  ;;  %v1316_v45 = vpop.xlane.xlu1 %1315  ;;  %v5264_v21 = vld [vmem:[#allocation67_spill] sm:$0xff] }
 0x22f   : > { %v3756_v4 = vpop.eup %3755  ;;  %3773 = vpow2.f32 %v1661_v34  ;;  %v1818_v14 = vadd.f32 %v4843_v42, %v1817_v60  ;;  %v1667_v3 = vmul.f32 1.442695, %v1438_v36  ;;  %v1669_v22 = vmul.f32 1.442695, %v1439_v20  ;;  %v5256_v42 = vld [vmem:[#allocation59_spill] sm:$0xff] }
 0x230   : > { %v4875_v63 = vpop.eup %3757  ;;  %3775 = vpow2.f32 %v1663_v15  ;;  %v1671_v9 = vmul.f32 1.442695, %v1440_v23  ;;  %2313 = vmatprep.mubr.bf16.mxu0 %v1922_v41  ;;  %v1924_v47 = vpack.c.bf16 %v3752_v33, %v4858_v11  ;;  %v1821_v49 = vadd.f32 %v3740_v39, %v4849_v51 }
 0x231   : > { %v4879_v54 = vpop.eup %3759  ;;  %1819 = vadd.xlane.f32.xlu1 %v1818_v14  ;;  %3777 = vpow2.f32 %v1665_v1  ;;  %v1921_v44 = vpack.c.bf16 %v3746_v53, %v4849_v51  ;;  %v1923_v52 = vpack.c.bf16 %v3750_v30, %v4851_v8  ;;  %v1441_v48 = vsub.f32 %v5256_v42, %v1311_v55  ;;  %v5259_v51 = vld [vmem:[#allocation63_spill] sm:$0xff]  ;;  %v5265_v1 = vld [vmem:[#allocation68_spill] sm:$0xff] }
 0x232   : > { %v4884_v6 = vpop.eup %3761  ;;  %3779 = vpow2.f32 %v1667_v3  ;;  %2474 = vmatprep.mubr.bf16.mxu1 %v1924_v47  ;;  %v1822_v35 = vadd.f32 %v4851_v8, %v1821_v49  ;;  %v1442_v38 = vsub.f32 %v5257_v24, %v1311_v55  ;;  %v1443_v39 = vsub.f32 %v5258_v31, %v1311_v55 }
 0x233   : > { %v3764_v25 = vpop.eup %3763  ;;  %3781 = vpow2.f32 %v1669_v22  ;;  %2314 = vmatmul.mubr.bf16.gmra.mrb[104].mxu0 %v1921_v44  ;;  %2475 = vmatmul.mubr.bf16.gmra.mrb[104].mxu1 %v1923_v52  ;;  %v1444_v18 = vsub.f32 %v5259_v51, %v1311_v55  ;;  %v1673_v5 = vmul.f32 1.442695, %v1441_v48  ;;  %v1826_v2 = vadd.f32 %v3748_v29, %v3746_v53  ;;  %v5263_v53 = vld [vmem:[#allocation66_spill] sm:$0xff] }
 0x234   : > { %v3766_v7 = vpop.eup %3765  ;;  %3783 = vpow2.f32 %v1671_v9  ;;  %v1823_v58 = vadd.f32 %v4858_v11, %v1822_v35  ;;  %v1675_v19 = vmul.f32 1.442695, %v1442_v38  ;;  %v1677_v26 = vmul.f32 1.442695, %v1443_v39  ;;  %v1321_v34 = vpop.xlane.xlu0 %1320  ;;  %v5267_v9 = vld [vmem:[#allocation71_spill] sm:$0xff]  ;;  %v5268_v38 = vld [vmem:[#allocation70_spill] sm:$0xff] }
 0x235   : > { %v4891_v8 = vpop.eup %3767  ;;  %3785 = vpow2.f32 %v1673_v5  ;;  %v1679_v57 = vmul.f32 1.442695, %v1444_v18  ;;  %v1827_v32 = vadd.f32 %v3750_v30, %v1826_v2  ;;  %v1445_v10 = vsub.f32 %v5260_v61, %v1316_v45  ;;  %v5270_v18 = vld [vmem:[#allocation73_spill] sm:$0xff] }
 0x236   : > { %1824 = vadd.xlane.f32.xlu0 %v1823_v58  ;;  %3787 = vpow2.f32 %v1675_v19  ;;  %v1446_v28 = vsub.f32 %v5261_v12, %v1316_v45  ;;  %v1447_v13 = vsub.f32 %v5262_v27, %v1316_v45  ;;  %v1448_v29 = vsub.f32 %v5263_v53, %v1316_v45  ;;  %v1326_v55 = vpop.xlane.xlu1 %1325  ;;  %v5269_v45 = vld [vmem:[#allocation72_spill] sm:$0xff]  ;;  %v5271_v58 = vld [vmem:[#allocation74_spill] sm:$0xff] }
 0x237   : > { %v4897_v16 = vpop.eup %3769  ;;  %3789 = vpow2.f32 %v1677_v26  ;;  %v1828_v11 = vadd.f32 %v3752_v33, %v1827_v32  ;;  %v1681_v56 = vmul.f32 1.442695, %v1445_v10  ;;  %v1926_v59 = vpack.c.bf16 %v3764_v25, %v3756_v4 }
 0x238   : > { %v3772_v15 = vpop.eup %3771  ;;  %3791 = vpow2.f32 %v1679_v57  ;;  %v1683_v30 = vmul.f32 1.442695, %v1446_v28  ;;  %v1685_v43 = vmul.f32 1.442695, %v1447_v13  ;;  %v1687_v17 = vmul.f32 1.442695, %v1448_v29 }
 0x239   : > { %v4899_v60 = vpop.eup %3773  ;;  %1829 = vadd.xlane.f32.xlu1 %v1828_v11  ;;  %3793 = vpow2.f32 %v1681_v56  ;;  %2321 = vmatprep.mubr.bf16.mxu0 %v1926_v59  ;;  %v1928_v62 = vpack.c.bf16 %v4891_v8, %v4879_v54  ;;  %v1831_v36 = vadd.f32 %v3756_v4, %v4871_v37  ;;  %v1925_v33 = vpack.c.bf16 %v4884_v6, %v4871_v37  ;;  %v5266_v4 = vld [vmem:[#allocation69_spill] sm:$0xff]  ;;  %v5273_v59 = vld [vmem:[#allocation76_spill] sm:$0xff] }
 0x23a   : > { %v4906_v46 = vpop.eup %3775  ;;  %3795 = vpow2.f32 %v1683_v30  ;;  %v1927_v20 = vpack.c.bf16 %v3766_v7, %v4875_v63  ;;  %v1449_v23 = vsub.f32 %v5264_v21, %v1321_v34  ;;  %v1450_v41 = vsub.f32 %v5265_v1, %v1321_v34  ;;  %v5274_v30 = vld [vmem:[#allocation77_spill] sm:$0xff] }
 0x23b   : > { %v3778_v14 = vpop.eup %3777  ;;  %3797 = vpow2.f32 %v1685_v43  ;;  %2482 = vmatprep.mubr.bf16.mxu1 %v1928_v62  ;;  %v1832_v3 = vadd.f32 %v4875_v63, %v1831_v36  ;;  %2322 = vmatmul.mubr.bf16.gmra.mrb[108].mxu0 %v1925_v33  ;;  %v1451_v22 = vsub.f32 %v5266_v4, %v1321_v34  ;;  %v1452_v37 = vsub.f32 %v5267_v9, %v1321_v34  ;;  %v5276_v4 = vld [vmem:[#allocation79_spill] sm:$0xff] }
 0x23c   : > { %v3780_v47 = vpop.eup %3779  ;;  %3799 = vpow2.f32 %v1687_v17  ;;  %2483 = vmatmul.mubr.bf16.gmra.mrb[108].mxu1 %v1927_v20  ;;  %v1689_v49 = vmul.f32 1.442695, %v1449_v23  ;;  %v1691_v44 = vmul.f32 1.442695, %v1450_v41  ;;  %v1836_v52 = vadd.f32 %v3764_v25, %v4884_v6 }
 0x23d   : > { %v3782_v42 = vpop.eup %3781  ;;  %v1833_v48 = vadd.f32 %v4879_v54, %v1832_v3  ;;  %v1693_v35 = vmul.f32 1.442695, %v1451_v22  ;;  %v1695_v24 = vmul.f32 1.442695, %v1452_v37  ;;  %v1453_v31 = vsub.f32 %v5268_v38, %v1326_v55  ;;  %v1331_v54 = vpop.xlane.xlu0 %1330 }
 0x23e   : > { %v3784_v63 = vpop.eup %3783  ;;  %3801 = vpow2.f32 %v1689_v49  ;;  %v1837_v39 = vadd.f32 %v3766_v7, %v1836_v52  ;;  %v1454_v51 = vsub.f32 %v5269_v45, %v1326_v55  ;;  %v1455_v5 = vsub.f32 %v5270_v18, %v1326_v55 }
 0x23f   : > { %v4919_v2 = vpop.eup %3785  ;;  %1834 = vadd.xlane.f32.xlu0 %v1833_v48  ;;  %3803 = vpow2.f32 %v1691_v44  ;;  %v1456_v6 = vsub.f32 %v5271_v58, %v1326_v55  ;;  %v1697_v25 = vmul.f32 1.442695, %v1453_v31  ;;  %v1930_v19 = vpack.c.bf16 %v3780_v47, %v3772_v15  ;;  %v5275_v55 = vld [vmem:[#allocation78_spill] sm:$0xff] }
 0x240   : > { %v3788_v26 = vpop.eup %3787  ;;  %3805 = vpow2.f32 %v1693_v35  ;;  %v1838_v57 = vadd.f32 %v4891_v8, %v1837_v39  ;;  %v1699_v32 = vmul.f32 1.442695, %v1454_v51  ;;  %v1701_v61 = vmul.f32 1.442695, %v1455_v5  ;;  %v5272_v8 = vld [vmem:[#allocation75_spill] sm:$0xff] }
 0x241   : > { %v4923_v7 = vpop.eup %3789  ;;  %3807 = vpow2.f32 %v1695_v24  ;;  %v1703_v10 = vmul.f32 1.442695, %v1456_v6  ;;  %2329 = vmatprep.mubr.bf16.mxu0 %v1930_v19  ;;  %v1932_v12 = vpack.c.bf16 %v3784_v63, %v4906_v46  ;;  %v1841_v28 = vadd.f32 %v3772_v15, %v4897_v16  ;;  %v1336_v15 = vpop.xlane.xlu1 %1335 }
 0x242   : > { %v4927_v27 = vpop.eup %3791  ;;  %1839 = vadd.xlane.f32.xlu1 %v1838_v57  ;;  %3809 = vpow2.f32 %v1697_v25  ;;  %v1929_v13 = vpack.c.bf16 %v3778_v14, %v4897_v16  ;;  %v1931_v53 = vpack.c.bf16 %v3782_v42, %v4899_v60  ;;  %v1457_v29 = vsub.f32 %v5272_v8, %v1331_v54 }
 0x243   : > { %v3794_v11 = vpop.eup %3793  ;;  %3811 = vpow2.f32 %v1699_v32  ;;  %2490 = vmatprep.mubr.bf16.mxu1 %v1932_v12  ;;  %v1842_v56 = vadd.f32 %v4899_v60, %v1841_v28  ;;  %v1458_v34 = vsub.f32 %v5273_v59, %v1331_v54  ;;  %v1459_v43 = vsub.f32 %v5274_v30, %v1331_v54 }
 0x244   : > { %v3796_v17 = vpop.eup %3795  ;;  %3813 = vpow2.f32 %v1701_v61  ;;  %2330 = vmatmul.mubr.bf16.gmra.mrb[112].mxu0 %v1929_v13  ;;  %2491 = vmatmul.mubr.bf16.gmra.mrb[112].mxu1 %v1931_v53  ;;  %v1460_v16 = vsub.f32 %v4605_v40, %v1331_v54  ;;  %v1705_v62 = vmul.f32 1.442695, %v1457_v29  ;;  %v1846_v36 = vadd.f32 %v3780_v47, %v3778_v14 }
 0x245   : > { %v3798_v33 = vpop.eup %3797  ;;  %3815 = vpow2.f32 %v1703_v10  ;;  %v1843_v20 = vadd.f32 %v4906_v46, %v1842_v56  ;;  %v1707_v21 = vmul.f32 1.442695, %v1458_v34  ;;  %v1709_v23 = vmul.f32 1.442695, %v1459_v43 }
 0x246   : > { %v3800_v60 = vpop.eup %3799  ;;  %3817 = vpow2.f32 %v1705_v62  ;;  %v1711_v1 = vmul.f32 1.442695, %v1460_v16  ;;  %v1847_v41 = vadd.f32 %v3782_v42, %v1846_v36  ;;  %v1461_v3 = vsub.f32 %v5275_v55, %v1336_v15 }
 0x247   : > { %1844 = vadd.xlane.f32.xlu0 %v1843_v20  ;;  %3819 = vpow2.f32 %v1707_v21  ;;  %v1462_v22 = vsub.f32 %v5276_v4, %v1336_v15  ;;  %v1463_v40 = vsub.f32 %v4609_v50, %v1336_v15  ;;  %v1464_v14 = vsub.f32 %v4614_v0, %v1336_v15 }
 0x248   : > { %v3802_v9 = vpop.eup %3801  ;;  %3821 = vpow2.f32 %v1709_v23  ;;  %v1848_v37 = vadd.f32 %v3784_v63, %v1847_v41  ;;  %v1713_v46 = vmul.f32 1.442695, %v1461_v3  ;;  %v1934_v47 = vpack.c.bf16 %v3796_v17, %v3788_v26 }
 0x249   : > { %v3804_v49 = vpop.eup %3803  ;;  %3823 = vpow2.f32 %v1711_v1  ;;  %v1715_v44 = vmul.f32 1.442695, %v1462_v22  ;;  %v1717_v52 = vmul.f32 1.442695, %v1463_v40  ;;  %v1719_v42 = vmul.f32 1.442695, %v1464_v14 }
 0x24a   : > { %v3806_v48 = vpop.eup %3805  ;;  %1849 = vadd.xlane.f32.xlu1 %v1848_v37  ;;  %3825 = vpow2.f32 %v1713_v46  ;;  %2337 = vmatprep.mubr.bf16.mxu0 %v1934_v47  ;;  %v1936_v35 = vpack.c.bf16 %v3800_v60, %v4927_v27  ;;  %v1851_v50 = vadd.f32 %v3788_v26, %v4919_v2  ;;  %v1933_v0 = vpack.c.bf16 %v3794_v11, %v4919_v2 }
 0x24b   : > { %v3808_v24 = vpop.eup %3807  ;;  %3827 = vpow2.f32 %v1715_v44  ;;  %v1935_v38 = vpack.c.bf16 %v3798_v33, %v4923_v7  ;;  %v1856_v31 = vadd.f32 %v3796_v17, %v3794_v11  ;;  %v1861_v63 = vadd.f32 %v3804_v49, %v3802_v9 }
 0x24c   : > { %v3810_v39 = vpop.eup %3809  ;;  %3829 = vpow2.f32 %v1717_v52  ;;  %2498 = vmatprep.mubr.bf16.mxu1 %v1936_v35  ;;  %v1852_v45 = vadd.f32 %v4923_v7, %v1851_v50  ;;  %2338 = vmatmul.mubr.bf16.gmra.mrb[116].mxu0 %v1933_v0 }
 0x24d   : > { %v3812_v51 = vpop.eup %3811  ;;  %3831 = vpow2.f32 %v1719_v42  ;;  %2499 = vmatmul.mubr.bf16.gmra.mrb[116].mxu1 %v1935_v38  ;;  %v1857_v18 = vadd.f32 %v3798_v33, %v1856_v31  ;;  %v1862_v5 = vadd.f32 %v3806_v48, %v1861_v63  ;;  %v1937_v58 = vpack.c.bf16 %v3810_v39, %v3802_v9 }
 0x24e   : > { %v3814_v6 = vpop.eup %3813  ;;  %v1853_v2 = vadd.f32 %v4927_v27, %v1852_v45  ;;  %v1938_v25 = vpack.c.bf16 %v3812_v51, %v3804_v49  ;;  %v1866_v19 = vadd.f32 %v3812_v51, %v3810_v39 }
 0x24f   : > { %v3816_v54 = vpop.eup %3815  ;;  %v1858_v26 = vadd.f32 %v3800_v60, %v1857_v18  ;;  %v1863_v57 = vadd.f32 %v3808_v24, %v1862_v5  ;;  %v1939_v32 = vpack.c.bf16 %v3814_v6, %v3806_v48 }
 0x250   : > { %v3818_v61 = vpop.eup %3817  ;;  %1854 = vadd.xlane.f32.xlu0 %v1853_v2  ;;  %2345 = vmatprep.mubr.bf16.mxu0 %v1938_v25  ;;  %v1940_v7 = vpack.c.bf16 %v3816_v54, %v3808_v24  ;;  %v1867_v10 = vadd.f32 %v3814_v6, %v1866_v19 }
 0x251   : > { %v3820_v12 = vpop.eup %3819  ;;  %1859 = vadd.xlane.f32.xlu1 %v1858_v26 }
 0x252   : > { %v3822_v28 = vpop.eup %3821  ;;  %2506 = vmatprep.mubr.bf16.mxu1 %v1940_v7  ;;  %v1868_v13 = vadd.f32 %v3816_v54, %v1867_v10  ;;  %v1871_v53 = vadd.f32 %v3820_v12, %v3818_v61 }
 0x253   : > { %v3824_v8 = vpop.eup %3823 }
 0x254   : > { %v3826_v29 = vpop.eup %3825  ;;  %1864 = vadd.xlane.f32.xlu0 %v1863_v57  ;;  %2346 = vmatmul.mubr.bf16.gmra.mrb[120].mxu0 %v1937_v58  ;;  %v1872_v27 = vadd.f32 %v3822_v28, %v1871_v53 }
 0x255   : > { %v3828_v11 = vpop.eup %3827  ;;  %2507 = vmatmul.mubr.bf16.gmra.mrb[120].mxu1 %v1939_v32  ;;  %1869 = vadd.xlane.f32.xlu1 %v1868_v13  ;;  %v1941_v56 = vpack.c.bf16 %v3826_v29, %v3818_v61 }
 0x256   : > { %v3830_v59 = vpop.eup %3829  ;;  %v1942_v34 = vpack.c.bf16 %v3828_v11, %v3820_v12  ;;  %v1873_v30 = vadd.f32 %v3824_v8, %v1872_v27  ;;  %v1876_v43 = vadd.f32 %v3828_v11, %v3826_v29 }
 0x257   : > { %v3832_v15 = vpop.eup %3831  ;;  %v1943_v17 = vpack.c.bf16 %v3830_v59, %v3822_v28 }
 0x258   : > { %2353 = vmatprep.mubr.bf16.mxu0 %v1942_v34  ;;  %v1944_v16 = vpack.c.bf16 %v3832_v15, %v3824_v8  ;;  %1874 = vadd.xlane.f32.xlu0 %v1873_v30  ;;  %v1877_v62 = vadd.f32 %v3830_v59, %v1876_v43 }
 0x25a   : > { %2514 = vmatprep.mubr.bf16.mxu1 %v1944_v16  ;;  %v1878_v36 = vadd.f32 %v3832_v15, %v1877_v62 }
 0x25c   : > { %2354 = vmatmul.mubr.bf16.gmra.mrb[124].mxu0 %v1941_v56  ;;  %1879 = vadd.xlane.f32.xlu1 %v1878_v36 }
 0x25d   : > { %2515 = vmatmul.mubr.bf16.gmra.mrb[124].mxu1 %v1943_v17 }
 0x26b   : > { %v1725_v33 = vpop.xlane.xlu0 %1724 }
 0x26c   : > { %3833 = vrcp.f32 %v1725_v33 }
 0x272   : > { %v1730_v20 = vpop.xlane.xlu1 %1729 }
 0x273   : > { %3835 = vrcp.f32 %v1730_v20 }
 0x275   : > { %v1735_v21 = vpop.xlane.xlu0 %1734 }
 0x276   : > { %3837 = vrcp.f32 %v1735_v21  ;;  %v3834_v47 = vpop.eup %3833 }
 0x27d   : > { %v1740_v60 = vpop.xlane.xlu1 %1739  ;;  %v3836_v35 = vpop.eup %3835 }
 0x27e   : > { %3839 = vrcp.f32 %v1740_v60 }
 0x27f   : > { %v1745_v52 = vpop.xlane.xlu0 %1744 }
 0x280   : > { %3841 = vrcp.f32 %v1745_v52  ;;  %v3838_v54 = vpop.eup %3837 }
 0x283   : > { %v1750_v38 = vpop.xlane.xlu1 %1749 }
 0x284   : > { %3843 = vrcp.f32 %v1750_v38 }
 0x288   : > { %v3840_v32 = vpop.eup %3839  ;;  %v1755_v61 = vpop.xlane.xlu0 %1754 }
 0x289   : > { %3845 = vrcp.f32 %v1755_v61 }
 0x28a   : > { %v3842_v16 = vpop.eup %3841 }
 0x28b   : > { %v1760_v53 = vpop.xlane.xlu1 %1759 }
 0x28c   : > { %3847 = vrcp.f32 %v1760_v53 }
 0x28e   : > { %v3844_v33 = vpop.eup %3843 }
 0x290   : > { %v1765_v20 = vpop.xlane.xlu0 %1764 }
 0x291   : > { %3849 = vrcp.f32 %v1765_v20 }
 0x293   : > { %v3846_v52 = vpop.eup %3845 }
 0x2b1   : > { %v3217_v23 = vpop.f32.mrb[64].mxu0 }
 0x2b2   : > { %v3329_v1 = vpop.f32.mrb[64].mxu1  ;;  %v3218_v55 = vpop.f32.mrb[65].mxu0 }
 0x2b3   : > { %v3330_v41 = vpop.f32.mrb[65].mxu1  ;;  %v3219_v4 = vadd.f32 %v3218_v55, %v3217_v23  ;;  %v3220_v22 = vpop.f32.mrb[66].mxu0 }
 0x2b4   : > { %v3331_v3 = vadd.f32 %v3330_v41, %v3329_v1  ;;  %v3332_v40 = vpop.f32.mrb[66].mxu1  ;;  %v3221_v14 = vpop.f32.mrb[67].mxu0 }
 0x2b5   : > { %v3222_v37 = vadd.f32 %v3221_v14, %v3220_v22  ;;  %v3333_v46 = vpop.f32.mrb[67].mxu1  ;;  %v1770_v55 = vpop.xlane.xlu1 %1769 }
 0x2b6   : > { %v2397_v9 = vadd.f32 %v3331_v3, %v3219_v4  ;;  %v3334_v49 = vadd.f32 %v3333_v46, %v3332_v40  ;;  %3851 = vrcp.f32 %v1770_v55 }
 0x2b8   : > { %v2524_v44 = vmul.f32 %v3834_v47, %v2397_v9  ;;  %v2400_v42 = vadd.f32 %v3334_v49, %v3222_v37 }
 0x2b9   : > { %v3223_v48 = vpop.f32.mrb[68].mxu0 }
 0x2ba   : > { %v3073_v50 = vpack.c.bf16 %v2524_v44, %v2524_v44  ;;  %v3335_v0 = vpop.f32.mrb[68].mxu1  ;;  %v3224_v24 = vpop.f32.mrb[69].mxu0  ;;  %v2526_v31 = vmul.f32 %v3836_v35, %v2400_v42 }
 0x2bb   : > { %v3336_v63 = vpop.f32.mrb[69].mxu1  ;;  %v3225_v39 = vadd.f32 %v3224_v24, %v3223_v48  ;;  %v3226_v51 = vpop.f32.mrb[70].mxu0 }
 0x2bc   : > { %2716 = vst.msk [vmem:[%s4952_s14] sm:$0xf] %vm2715_vm1, %v3073_v50  ;;  %v3337_v45 = vadd.f32 %v3336_v63, %v3335_v0  ;;  %v3338_v18 = vpop.f32.mrb[70].mxu1  ;;  %v3074_v5 = vpack.c.bf16 %v2526_v31, %v2526_v31  ;;  %v3227_v58 = vpop.f32.mrb[71].mxu0 }
 0x2bd   : > { %v3339_v6 = vpop.f32.mrb[71].mxu1  ;;  %v3228_v25 = vadd.f32 %v3227_v58, %v3226_v51  ;;  %v3848_v35 = vpop.eup %3847 }
 0x2be   : > { %v2405_v2 = vadd.f32 %v3337_v45, %v3225_v39  ;;  %v3340_v19 = vadd.f32 %v3339_v6, %v3338_v18  ;;  %2717 = vst.msk [vmem:[%s4952_s14 + $0x4] sm:$0xf] %vm2715_vm1, %v3074_v5  ;;  %v1775_v31 = vpop.xlane.xlu0 %1774 }
 0x2bf   : > { %3853 = vrcp.f32 %v1775_v31 }
 0x2c0   : > { %v2528_v26 = vmul.f32 %v3838_v54, %v2405_v2  ;;  %v2408_v57 = vadd.f32 %v3340_v19, %v3228_v25  ;;  %v1780_v2 = vpop.xlane.xlu1 %1779 }
 0x2c1   : > { %v3229_v7 = vpop.f32.mrb[72].mxu0  ;;  %3855 = vrcp.f32 %v1780_v2 }
 0x2c2   : > { %v3075_v10 = vpack.c.bf16 %v2528_v26, %v2528_v26  ;;  %v2530_v12 = vmul.f32 %v3840_v32, %v2408_v57  ;;  %v3341_v28 = vpop.f32.mrb[72].mxu1  ;;  %v3230_v13 = vpop.f32.mrb[73].mxu0 }
 0x2c3   : > { %v3342_v8 = vpop.f32.mrb[73].mxu1  ;;  %v3231_v29 = vadd.f32 %v3230_v13, %v3229_v7  ;;  %v3232_v56 = vpop.f32.mrb[74].mxu0 }
 0x2c4   : > { %2718 = vst.msk [vmem:[%s4952_s14 + $0x8] sm:$0xf] %vm2715_vm1, %v3075_v10  ;;  %v3076_v27 = vpack.c.bf16 %v2530_v12, %v2530_v12  ;;  %v3343_v11 = vadd.f32 %v3342_v8, %v3341_v28  ;;  %v3344_v59 = vpop.f32.mrb[74].mxu1  ;;  %v3233_v34 = vpop.f32.mrb[75].mxu0 }
 0x2c5   : > { %v3345_v30 = vpop.f32.mrb[75].mxu1  ;;  %v3234_v15 = vadd.f32 %v3233_v34, %v3232_v56  ;;  %v3850_v57 = vpop.eup %3849 }
 0x2c6   : > { %2719 = vst.msk [vmem:[%s4952_s14 + $0xc] sm:$0xf] %vm2715_vm1, %v3076_v27  ;;  %v2413_v43 = vadd.f32 %v3343_v11, %v3231_v29  ;;  %v3346_v17 = vadd.f32 %v3345_v30, %v3344_v59  ;;  %v3852_v7 = vpop.eup %3851  ;;  %v1785_v8 = vpop.xlane.xlu0 %1784 }
 0x2c7   : > { %v1790_v11 = vpop.xlane.xlu1 %1789  ;;  %3857 = vrcp.f32 %v1785_v8 }
 0x2c8   : > { %v2532_v62 = vmul.f32 %v3842_v16, %v2413_v43  ;;  %v2416_v36 = vadd.f32 %v3346_v17, %v3234_v15  ;;  %3859 = vrcp.f32 %v1790_v11 }
 0x2ca   : > { %v3077_v21 = vpack.c.bf16 %v2532_v62, %v2532_v62  ;;  %v2534_v23 = vmul.f32 %v3844_v33, %v2416_v36  ;;  %v3235_v60 = vpop.f32.mrb[76].mxu0  ;;  %v3854_v62 = vpop.eup %3853 }
 0x2cb   : > { %v3347_v1 = vpop.f32.mrb[76].mxu1  ;;  %v3236_v41 = vpop.f32.mrb[77].mxu0 }
 0x2cc   : > { %2720 = vst.msk [vmem:[%s4952_s14 + $0x10] sm:$0xf] %vm2715_vm1, %v3077_v21  ;;  %v3078_v3 = vpack.c.bf16 %v2534_v23, %v2534_v23  ;;  %v3348_v4 = vpop.f32.mrb[77].mxu1  ;;  %v3237_v22 = vadd.f32 %v3236_v41, %v3235_v60  ;;  %v3238_v14 = vpop.f32.mrb[78].mxu0 }
 0x2cd   : > { %v3349_v40 = vadd.f32 %v3348_v4, %v3347_v1  ;;  %v3350_v9 = vpop.f32.mrb[78].mxu1  ;;  %v3239_v37 = vpop.f32.mrb[79].mxu0 }
 0x2ce   : > { %2721 = vst.msk [vmem:[%s4952_s14 + $0x14] sm:$0xf] %vm2715_vm1, %v3078_v3  ;;  %v3351_v46 = vpop.f32.mrb[79].mxu1  ;;  %v3240_v49 = vadd.f32 %v3239_v37, %v3238_v14  ;;  %v1795_v20 = vpop.xlane.xlu0 %1794 }
 0x2cf   : > { %v2421_v47 = vadd.f32 %v3349_v40, %v3237_v22  ;;  %v3352_v44 = vadd.f32 %v3351_v46, %v3350_v9  ;;  %v3856_v23 = vpop.eup %3855  ;;  %v1800_v55 = vpop.xlane.xlu1 %1799  ;;  %3861 = vrcp.f32 %v1795_v20 }
 0x2d0   : > { %3863 = vrcp.f32 %v1800_v55 }
 0x2d1   : > { %v2536_v42 = vmul.f32 %v3846_v52, %v2421_v47  ;;  %v2424_v48 = vadd.f32 %v3352_v44, %v3240_v49 }
 0x2d3   : > { %v3079_v50 = vpack.c.bf16 %v2536_v42, %v2536_v42  ;;  %v2538_v0 = vmul.f32 %v3848_v35, %v2424_v48  ;;  %v3241_v24 = vpop.f32.mrb[80].mxu0  ;;  %v3353_v38 = vpop.f32.mrb[80].mxu1 }
 0x2d4   : > { %v3354_v63 = vpop.f32.mrb[81].mxu1  ;;  %v3242_v51 = vpop.f32.mrb[81].mxu0 }
 0x2d5   : > { %2722 = vst.msk [vmem:[%s4952_s14 + $0x18] sm:$0xf] %vm2715_vm1, %v3079_v50  ;;  %v3080_v39 = vpack.c.bf16 %v2538_v0, %v2538_v0  ;;  %v3355_v45 = vadd.f32 %v3354_v63, %v3353_v38  ;;  %v3356_v18 = vpop.f32.mrb[82].mxu1  ;;  %v3243_v5 = vadd.f32 %v3242_v51, %v3241_v24  ;;  %v3244_v58 = vpop.f32.mrb[82].mxu0 }
 0x2d6   : > { %v3357_v6 = vpop.f32.mrb[83].mxu1  ;;  %v3245_v25 = vpop.f32.mrb[83].mxu0 }
 0x2d7   : > { %2723 = vst.msk [vmem:[%s4952_s14 + $0x1c] sm:$0xf] %vm2715_vm1, %v3080_v39  ;;  %v3358_v19 = vadd.f32 %v3357_v6, %v3356_v18  ;;  %v2429_v54 = vadd.f32 %v3355_v45, %v3243_v5  ;;  %v3246_v26 = vadd.f32 %v3245_v25, %v3244_v58  ;;  %v3858_v48 = vpop.eup %3857  ;;  %v1805_v35 = vpop.xlane.xlu0 %1804 }
 0x2d8   : > { %v3860_v24 = vpop.eup %3859  ;;  %v1810_v38 = vpop.xlane.xlu1 %1809  ;;  %3865 = vrcp.f32 %v1805_v35 }
 0x2d9   : > { %v2540_v32 = vmul.f32 %v3850_v57, %v2429_v54  ;;  %v2432_v61 = vadd.f32 %v3358_v19, %v3246_v26  ;;  %3867 = vrcp.f32 %v1810_v38 }
 0x2db   : > { %v3247_v10 = vpop.f32.mrb[84].mxu0  ;;  %v3081_v12 = vpack.c.bf16 %v2540_v32, %v2540_v32  ;;  %v2542_v28 = vmul.f32 %v3852_v7, %v2432_v61  ;;  %v3862_v61 = vpop.eup %3861 }
 0x2dc   : > { %v3359_v13 = vpop.f32.mrb[84].mxu1  ;;  %v3248_v53 = vpop.f32.mrb[85].mxu0 }
 0x2dd   : > { %v3360_v29 = vpop.f32.mrb[85].mxu1  ;;  %v3249_v27 = vadd.f32 %v3248_v53, %v3247_v10  ;;  %2724 = vst.msk [vmem:[%s4952_s14 + $0x20] sm:$0xf] %vm2715_vm1, %v3081_v12  ;;  %v3082_v56 = vpack.c.bf16 %v2542_v28, %v2542_v28  ;;  %v3250_v34 = vpop.f32.mrb[86].mxu0 }
 0x2de   : > { %v3361_v59 = vadd.f32 %v3360_v29, %v3359_v13  ;;  %v3362_v30 = vpop.f32.mrb[86].mxu1  ;;  %v3251_v43 = vpop.f32.mrb[87].mxu0 }
 0x2df   : > { %2725 = vst.msk [vmem:[%s4952_s14 + $0x24] sm:$0xf] %vm2715_vm1, %v3082_v56  ;;  %v3252_v17 = vadd.f32 %v3251_v43, %v3250_v34  ;;  %v3363_v16 = vpop.f32.mrb[87].mxu1  ;;  %v3864_v12 = vpop.eup %3863 }
 0x2e0   : > { %v2437_v15 = vadd.f32 %v3361_v59, %v3249_v27  ;;  %v3364_v36 = vadd.f32 %v3363_v16, %v3362_v30  ;;  %v1815_v28 = vpop.xlane.xlu0 %1814  ;;  %v1820_v13 = vpop.xlane.xlu1 %1819 }
 0x2e1   : > { %3869 = vrcp.f32 %v1815_v28 }
 0x2e2   : > { %v2544_v33 = vmul.f32 %v3854_v62, %v2437_v15  ;;  %v2440_v21 = vadd.f32 %v3364_v36, %v3252_v17  ;;  %v3866_v20 = vpop.eup %3865  ;;  %3871 = vrcp.f32 %v1820_v13 }
 0x2e4   : > { %v3083_v60 = vpack.c.bf16 %v2544_v33, %v2544_v33  ;;  %v3253_v1 = vpop.f32.mrb[88].mxu0  ;;  %v3365_v41 = vpop.f32.mrb[88].mxu1  ;;  %v2546_v3 = vmul.f32 %v3856_v23, %v2440_v21 }
 0x2e5   : > { %v3366_v4 = vpop.f32.mrb[89].mxu1  ;;  %v3254_v40 = vpop.f32.mrb[89].mxu0 }
 0x2e6   : > { %2726 = vst.msk [vmem:[%s4952_s14 + $0x28] sm:$0xf] %vm2715_vm1, %v3083_v60  ;;  %v3367_v22 = vadd.f32 %v3366_v4, %v3365_v41  ;;  %v3368_v14 = vpop.f32.mrb[90].mxu1  ;;  %v3084_v9 = vpack.c.bf16 %v2546_v3, %v2546_v3  ;;  %v3255_v37 = vadd.f32 %v3254_v40, %v3253_v1  ;;  %v3256_v46 = vpop.f32.mrb[90].mxu0 }
 0x2e7   : > { %v3369_v47 = vpop.f32.mrb[91].mxu1  ;;  %v3257_v49 = vpop.f32.mrb[91].mxu0 }
 0x2e8   : > { %v3370_v44 = vadd.f32 %v3369_v47, %v3368_v14  ;;  %2727 = vst.msk [vmem:[%s4952_s14 + $0x2c] sm:$0xf] %vm2715_vm1, %v3084_v9  ;;  %v2445_v52 = vadd.f32 %v3367_v22, %v3255_v37  ;;  %v3258_v42 = vadd.f32 %v3257_v49, %v3256_v46  ;;  %v3868_v60 = vpop.eup %3867  ;;  %v1825_v1 = vpop.xlane.xlu0 %1824 }
 0x2e9   : > { %v1830_v41 = vpop.xlane.xlu1 %1829  ;;  %3873 = vrcp.f32 %v1825_v1 }
 0x2ea   : > { %v2548_v50 = vmul.f32 %v3858_v48, %v2445_v52  ;;  %v2448_v0 = vadd.f32 %v3370_v44, %v3258_v42  ;;  %3875 = vrcp.f32 %v1830_v41 }
 0x2ec   : > { %v3259_v31 = vpop.f32.mrb[92].mxu0  ;;  %v3085_v63 = vpack.c.bf16 %v2548_v50, %v2548_v50  ;;  %v2550_v39 = vmul.f32 %v3860_v24, %v2448_v0  ;;  %v3870_v50 = vpop.eup %3869 }
 0x2ed   : > { %v3371_v45 = vpop.f32.mrb[92].mxu1  ;;  %v3260_v51 = vpop.f32.mrb[93].mxu0 }
 0x2ee   : > { %v3261_v18 = vadd.f32 %v3260_v51, %v3259_v31  ;;  %v3372_v5 = vpop.f32.mrb[93].mxu1  ;;  %v3262_v58 = vpop.f32.mrb[94].mxu0  ;;  %2728 = vst.msk [vmem:[%s4952_s14 + $0x30] sm:$0xf] %vm2715_vm1, %v3085_v63  ;;  %v3086_v6 = vpack.c.bf16 %v2550_v39, %v2550_v39 }
 0x2ef   : > { %v3373_v2 = vadd.f32 %v3372_v5, %v3371_v45  ;;  %v3374_v25 = vpop.f32.mrb[94].mxu1  ;;  %v3263_v19 = vpop.f32.mrb[95].mxu0 }
 0x2f0   : > { %v3264_v54 = vadd.f32 %v3263_v19, %v3262_v58  ;;  %v3375_v26 = vpop.f32.mrb[95].mxu1  ;;  %2729 = vst.msk [vmem:[%s4952_s14 + $0x34] sm:$0xf] %vm2715_vm1, %v3086_v6  ;;  %v3872_v38 = vpop.eup %3871 }
 0x2f1   : > { %v2453_v57 = vadd.f32 %v3373_v2, %v3261_v18  ;;  %v3376_v32 = vadd.f32 %v3375_v26, %v3374_v25  ;;  %v1835_v31 = vpop.xlane.xlu0 %1834  ;;  %v1840_v63 = vpop.xlane.xlu1 %1839 }
 0x2f2   : > { %3877 = vrcp.f32 %v1835_v31 }
 0x2f3   : > { %v2552_v7 = vmul.f32 %v3862_v61, %v2453_v57  ;;  %v2456_v10 = vadd.f32 %v3376_v32, %v3264_v54  ;;  %3879 = vrcp.f32 %v1840_v63 }
 0x2f5   : > { %v3087_v53 = vpack.c.bf16 %v2552_v7, %v2552_v7  ;;  %v2554_v8 = vmul.f32 %v3864_v12, %v2456_v10  ;;  %v3265_v29 = vpop.f32.mrb[96].mxu0  ;;  %v3377_v27 = vpop.f32.mrb[96].mxu1 }
 0x2f6   : > { %v3266_v11 = vpop.f32.mrb[97].mxu0  ;;  %v3378_v56 = vpop.f32.mrb[97].mxu1 }
 0x2f7   : > { %2730 = vst.msk [vmem:[%s4952_s14 + $0x38] sm:$0xf] %vm2715_vm1, %v3087_v53  ;;  %v3088_v59 = vpack.c.bf16 %v2554_v8, %v2554_v8  ;;  %v3267_v34 = vadd.f32 %v3266_v11, %v3265_v29  ;;  %v3379_v30 = vadd.f32 %v3378_v56, %v3377_v27  ;;  %v3268_v43 = vpop.f32.mrb[98].mxu0  ;;  %v3380_v15 = vpop.f32.mrb[98].mxu1 }
 0x2f8   : > { %v3269_v17 = vpop.f32.mrb[99].mxu0  ;;  %v3381_v16 = vpop.f32.mrb[99].mxu1 }
 0x2f9   : > { %2731 = vst.msk [vmem:[%s4952_s14 + $0x3c] sm:$0xf] %vm2715_vm1, %v3088_v59  ;;  %v2461_v62 = vadd.f32 %v3379_v30, %v3267_v34  ;;  %v3270_v36 = vadd.f32 %v3269_v17, %v3268_v43  ;;  %v3382_v33 = vadd.f32 %v3381_v16, %v3380_v15  ;;  %v3874_v10 = vpop.eup %3873  ;;  %v1845_v53 = vpop.xlane.xlu0 %1844 }
 0x2fa   : > { %v3876_v13 = vpop.eup %3875  ;;  %v1850_v8 = vpop.xlane.xlu1 %1849  ;;  %3881 = vrcp.f32 %v1845_v53 }
 0x2fb   : > { %v2556_v21 = vmul.f32 %v3866_v20, %v2461_v62  ;;  %v2464_v23 = vadd.f32 %v3382_v33, %v3270_v36  ;;  %3883 = vrcp.f32 %v1850_v8 }
 0x2fd   : > { %v3089_v55 = vpack.c.bf16 %v2556_v21, %v2556_v21  ;;  %v2558_v3 = vmul.f32 %v3868_v60, %v2464_v23  ;;  %v3271_v4 = vpop.f32.mrb[100].mxu0  ;;  %v3878_v23 = vpop.eup %3877 }
 0x2fe   : > { %v3383_v22 = vpop.f32.mrb[100].mxu1  ;;  %v3272_v40 = vpop.f32.mrb[101].mxu0 }
 0x2ff   : > { %2732 = vst.msk [vmem:[%s4952_s14 + $0x40] sm:$0xf] %vm2715_vm1, %v3089_v55  ;;  %v3090_v14 = vpack.c.bf16 %v2558_v3, %v2558_v3  ;;  %v3273_v9 = vadd.f32 %v3272_v40, %v3271_v4  ;;  %v3384_v37 = vpop.f32.mrb[101].mxu1  ;;  %v3274_v46 = vpop.f32.mrb[102].mxu0 }
 0x300   : > { %v3385_v47 = vadd.f32 %v3384_v37, %v3383_v22  ;;  %v3386_v49 = vpop.f32.mrb[102].mxu1  ;;  %v3275_v44 = vpop.f32.mrb[103].mxu0 }
 0x301   : > { %2733 = vst.msk [vmem:[%s4952_s14 + $0x44] sm:$0xf] %vm2715_vm1, %v3090_v14  ;;  %v3276_v52 = vadd.f32 %v3275_v44, %v3274_v46  ;;  %v3387_v42 = vpop.f32.mrb[103].mxu1  ;;  %v3880_v41 = vpop.eup %3879 }
 0x302   : > { %v2469_v48 = vadd.f32 %v3385_v47, %v3273_v9  ;;  %v3388_v35 = vadd.f32 %v3387_v42, %v3386_v49  ;;  %v1855_v55 = vpop.xlane.xlu0 %1854  ;;  %v1860_v3 = vpop.xlane.xlu1 %1859 }
 0x303   : > { %3885 = vrcp.f32 %v1855_v55 }
 0x304   : > { %v2560_v0 = vmul.f32 %v3870_v50, %v2469_v48  ;;  %v2472_v24 = vadd.f32 %v3388_v35, %v3276_v52  ;;  %3887 = vrcp.f32 %v1860_v3 }
 0x306   : > { %v3091_v39 = vpack.c.bf16 %v2560_v0, %v2560_v0  ;;  %v2562_v45 = vmul.f32 %v3872_v38, %v2472_v24  ;;  %v3277_v51 = vpop.f32.mrb[104].mxu0  ;;  %v3389_v18 = vpop.f32.mrb[104].mxu1 }
 0x307   : > { %v3278_v5 = vpop.f32.mrb[105].mxu0  ;;  %v3390_v58 = vpop.f32.mrb[105].mxu1 }
 0x308   : > { %2734 = vst.msk [vmem:[%s4952_s14 + $0x48] sm:$0xf] %vm2715_vm1, %v3091_v39  ;;  %v3092_v6 = vpack.c.bf16 %v2562_v45, %v2562_v45  ;;  %v3279_v2 = vadd.f32 %v3278_v5, %v3277_v51  ;;  %v3391_v25 = vadd.f32 %v3390_v58, %v3389_v18  ;;  %v3280_v19 = vpop.f32.mrb[106].mxu0  ;;  %v3392_v54 = vpop.f32.mrb[106].mxu1 }
 0x309   : > { %v3281_v26 = vpop.f32.mrb[107].mxu0  ;;  %v3393_v57 = vpop.f32.mrb[107].mxu1 }
 0x30a   : > { %2735 = vst.msk [vmem:[%s4952_s14 + $0x4c] sm:$0xf] %vm2715_vm1, %v3092_v6  ;;  %v2477_v32 = vadd.f32 %v3391_v25, %v3279_v2  ;;  %v3282_v61 = vadd.f32 %v3281_v26, %v3280_v19  ;;  %v3394_v7 = vadd.f32 %v3393_v57, %v3392_v54  ;;  %v3882_v24 = vpop.eup %3881  ;;  %v1865_v39 = vpop.xlane.xlu0 %1864 }
 0x30b   : > { %v3884_v63 = vpop.eup %3883  ;;  %v1870_v45 = vpop.xlane.xlu1 %1869  ;;  %3889 = vrcp.f32 %v1865_v39 }
 0x30c   : > { %v2564_v12 = vmul.f32 %v3874_v10, %v2477_v32  ;;  %v2480_v28 = vadd.f32 %v3394_v7, %v3282_v61  ;;  %3891 = vrcp.f32 %v1870_v45 }
 0x30e   : > { %v3093_v29 = vpack.c.bf16 %v2564_v12, %v2564_v12  ;;  %v2566_v27 = vmul.f32 %v3876_v13, %v2480_v28  ;;  %v3283_v11 = vpop.f32.mrb[108].mxu0  ;;  %v3886_v28 = vpop.eup %3885 }
 0x30f   : > { %v3395_v56 = vpop.f32.mrb[108].mxu1  ;;  %v3284_v59 = vpop.f32.mrb[109].mxu0 }
 0x310   : > { %2736 = vst.msk [vmem:[%s4952_s14 + $0x50] sm:$0xf] %vm2715_vm1, %v3093_v29  ;;  %v3094_v34 = vpack.c.bf16 %v2566_v27, %v2566_v27  ;;  %v3285_v30 = vadd.f32 %v3284_v59, %v3283_v11  ;;  %v3396_v43 = vpop.f32.mrb[109].mxu1  ;;  %v3286_v15 = vpop.f32.mrb[110].mxu0 }
 0x311   : > { %v3397_v17 = vadd.f32 %v3396_v43, %v3395_v56  ;;  %v3398_v16 = vpop.f32.mrb[110].mxu1  ;;  %v3287_v62 = vpop.f32.mrb[111].mxu0 }
 0x312   : > { %2737 = vst.msk [vmem:[%s4952_s14 + $0x54] sm:$0xf] %vm2715_vm1, %v3094_v34  ;;  %v3288_v36 = vadd.f32 %v3287_v62, %v3286_v15  ;;  %v3399_v33 = vpop.f32.mrb[111].mxu1  ;;  %v1875_v13 = vpop.xlane.xlu0 %1874 }
 0x313   : > { %v2485_v20 = vadd.f32 %v3397_v17, %v3285_v30  ;;  %v3400_v21 = vadd.f32 %v3399_v33, %v3398_v16  ;;  %v3888_v29 = vpop.eup %3887  ;;  %v1880_v27 = vpop.xlane.xlu1 %1879  ;;  %3893 = vrcp.f32 %v1875_v13 }
 0x314   : > { %3895 = vrcp.f32 %v1880_v27 }
 0x315   : > { %v2568_v60 = vmul.f32 %v3878_v23, %v2485_v20  ;;  %v2488_v1 = vadd.f32 %v3400_v21, %v3288_v36 }
 0x317   : > { %v3095_v4 = vpack.c.bf16 %v2568_v60, %v2568_v60  ;;  %v2570_v22 = vmul.f32 %v3880_v41, %v2488_v1  ;;  %v3289_v40 = vpop.f32.mrb[112].mxu0  ;;  %v3401_v14 = vpop.f32.mrb[112].mxu1 }
 0x318   : > { %v3290_v9 = vpop.f32.mrb[113].mxu0  ;;  %v3402_v37 = vpop.f32.mrb[113].mxu1 }
 0x319   : > { %2738 = vst.msk [vmem:[%s4952_s14 + $0x58] sm:$0xf] %vm2715_vm1, %v3095_v4  ;;  %v3096_v46 = vpack.c.bf16 %v2570_v22, %v2570_v22  ;;  %v3291_v47 = vadd.f32 %v3290_v9, %v3289_v40  ;;  %v3403_v49 = vadd.f32 %v3402_v37, %v3401_v14  ;;  %v3292_v44 = vpop.f32.mrb[114].mxu0  ;;  %v3404_v52 = vpop.f32.mrb[114].mxu1 }
 0x31a   : > { %v3293_v42 = vpop.f32.mrb[115].mxu0  ;;  %v3405_v48 = vpop.f32.mrb[115].mxu1 }
 0x31b   : > { %2739 = vst.msk [vmem:[%s4952_s14 + $0x5c] sm:$0xf] %vm2715_vm1, %v3096_v46  ;;  %v2493_v35 = vadd.f32 %v3403_v49, %v3291_v47  ;;  %v3294_v50 = vadd.f32 %v3293_v42, %v3292_v44  ;;  %v3406_v0 = vadd.f32 %v3405_v48, %v3404_v52  ;;  %v3890_v1 = vpop.eup %3889 }
 0x31c   : > { %v3892_v3 = vpop.eup %3891 }
 0x31d   : > { %v2572_v38 = vmul.f32 %v3882_v24, %v2493_v35  ;;  %v2496_v31 = vadd.f32 %v3406_v0, %v3294_v50  ;;  %v3894_v24 = vpop.eup %3893 }
 0x31f   : > { %v3097_v51 = vpack.c.bf16 %v2572_v38, %v2572_v38  ;;  %v2574_v18 = vmul.f32 %v3884_v63, %v2496_v31  ;;  %v3295_v5 = vpop.f32.mrb[116].mxu0  ;;  %v3896_v63 = vpop.eup %3895 }
 0x320   : > { %v3407_v58 = vpop.f32.mrb[116].mxu1  ;;  %v3296_v6 = vpop.f32.mrb[117].mxu0 }
 0x321   : > { %2740 = vst.msk [vmem:[%s4952_s14 + $0x60] sm:$0xf] %vm2715_vm1, %v3097_v51  ;;  %v3098_v2 = vpack.c.bf16 %v2574_v18, %v2574_v18  ;;  %v3297_v25 = vadd.f32 %v3296_v6, %v3295_v5  ;;  %v3408_v19 = vpop.f32.mrb[117].mxu1  ;;  %v3298_v54 = vpop.f32.mrb[118].mxu0 }
 0x322   : > { %v3409_v26 = vadd.f32 %v3408_v19, %v3407_v58  ;;  %v3410_v57 = vpop.f32.mrb[118].mxu1  ;;  %v3299_v32 = vpop.f32.mrb[119].mxu0 }
 0x323   : > { %2741 = vst.msk [vmem:[%s4952_s14 + $0x64] sm:$0xf] %vm2715_vm1, %v3098_v2  ;;  %v3300_v61 = vadd.f32 %v3299_v32, %v3298_v54  ;;  %v3411_v7 = vpop.f32.mrb[119].mxu1 }
 0x324   : > { %v2501_v10 = vadd.f32 %v3409_v26, %v3297_v25  ;;  %v3412_v12 = vadd.f32 %v3411_v7, %v3410_v57 }
 0x326   : > { %v2576_v53 = vmul.f32 %v3886_v28, %v2501_v10  ;;  %v2504_v8 = vadd.f32 %v3412_v12, %v3300_v61 }
 0x327   : > { %v3301_v11 = vpop.f32.mrb[120].mxu0 }
 0x328   : > { %v3099_v56 = vpack.c.bf16 %v2576_v53, %v2576_v53  ;;  %v2578_v59 = vmul.f32 %v3888_v29, %v2504_v8  ;;  %v3413_v34 = vpop.f32.mrb[120].mxu1  ;;  %v3302_v30 = vpop.f32.mrb[121].mxu0 }
 0x329   : > { %v3303_v43 = vadd.f32 %v3302_v30, %v3301_v11  ;;  %v3414_v15 = vpop.f32.mrb[121].mxu1  ;;  %v3304_v17 = vpop.f32.mrb[122].mxu0 }
 0x32a   : > { %2742 = vst.msk [vmem:[%s4952_s14 + $0x68] sm:$0xf] %vm2715_vm1, %v3099_v56  ;;  %v3100_v16 = vpack.c.bf16 %v2578_v59, %v2578_v59  ;;  %v3415_v62 = vadd.f32 %v3414_v15, %v3413_v34  ;;  %v3416_v36 = vpop.f32.mrb[122].mxu1  ;;  %v3305_v33 = vpop.f32.mrb[123].mxu0 }
 0x32b   : > { %v3306_v20 = vadd.f32 %v3305_v33, %v3304_v17  ;;  %v3417_v21 = vpop.f32.mrb[123].mxu1 }
 0x32c   : > { %2743 = vst.msk [vmem:[%s4952_s14 + $0x6c] sm:$0xf] %vm2715_vm1, %v3100_v16  ;;  %v2509_v23 = vadd.f32 %v3415_v62, %v3303_v43  ;;  %v3418_v60 = vadd.f32 %v3417_v21, %v3416_v36 }
 0x32e   : > { %v2580_v41 = vmul.f32 %v3890_v1, %v2509_v23  ;;  %v2512_v55 = vadd.f32 %v3418_v60, %v3306_v20 }
 0x32f   : > { %v3307_v4 = vpop.f32.mrb[124].mxu0 }
 0x330   : > { %v3101_v22 = vpack.c.bf16 %v2580_v41, %v2580_v41  ;;  %v2582_v40 = vmul.f32 %v3892_v3, %v2512_v55  ;;  %v3419_v14 = vpop.f32.mrb[124].mxu1  ;;  %v3308_v9 = vpop.f32.mrb[125].mxu0 }
 0x331   : > { %v3309_v37 = vadd.f32 %v3308_v9, %v3307_v4  ;;  %v3420_v46 = vpop.f32.mrb[125].mxu1  ;;  %v3310_v47 = vpop.f32.mrb[126].mxu0 }
 0x332   : > { %2744 = vst.msk [vmem:[%s4952_s14 + $0x70] sm:$0xf] %vm2715_vm1, %v3101_v22  ;;  %v3102_v49 = vpack.c.bf16 %v2582_v40, %v2582_v40  ;;  %v3421_v44 = vadd.f32 %v3420_v46, %v3419_v14  ;;  %v3422_v52 = vpop.f32.mrb[126].mxu1  ;;  %v3311_v42 = vpop.f32.mrb[127].mxu0 }
 0x333   : > { %v3312_v48 = vadd.f32 %v3311_v42, %v3310_v47  ;;  %v3423_v35 = vpop.f32.mrb[127].mxu1 }
 0x334   : > { %2745 = vst.msk [vmem:[%s4952_s14 + $0x74] sm:$0xf] %vm2715_vm1, %v3102_v49  ;;  %v2517_v50 = vadd.f32 %v3421_v44, %v3309_v37  ;;  %v3424_v0 = vadd.f32 %v3423_v35, %v3422_v52 }
 0x336   : > { %v2584_v38 = vmul.f32 %v3894_v24, %v2517_v50  ;;  %v2520_v31 = vadd.f32 %v3424_v0, %v3312_v48 }
 0x338   : > { %v3103_v39 = vpack.c.bf16 %v2584_v38, %v2584_v38  ;;  %v2586_v45 = vmul.f32 %v3896_v63, %v2520_v31 }
 0x33a   : > { %2746 = vst.msk [vmem:[%s4952_s14 + $0x78] sm:$0xf] %vm2715_vm1, %v3103_v39  ;;  %v3104_v51 = vpack.c.bf16 %v2586_v45, %v2586_v45 }
 0x33c   : > { %2747 = vst.msk [vmem:[%s4952_s14 + $0x7c] sm:$0xf] %vm2715_vm1, %v3104_v51 }
 0x33d PF: > { %s13_s18 = sadd.s32 1, %s3951_s18   ;;  %s5277_s12 = smov %s3939_s15 }
 0x33e   : > { %p10_p9 = scmp.ge.s32.totalorder %s13_s18, 10   ;;  %s5278_s13 = smov %s3943_s16 }
 0x33f   : > { %s5279_s14 = smov %s3947_s17  ;;  %s5280_s15 = smov %s5284_s19 }
 0x340   : > { %s5281_s16 = smov %s5288_s20  ;;  %s5282_s17 = smov %s5292_s21 }
 0x341   :  { %12 = sbr.rel (!%p10_p9) target bundleno = 4 (0x4), region = 68 }

// kernel: attention_forward.5
= control target key start
LH: loop header
LB: loop body
LE: loop exit
PB: predicated region body
PF: predicated region fallthrough
CT: control target
= control target key end

     0   :  { %8 = vsyncpa [#allocation3], 0  ;;  %s1587_s0 = inlined_call_operand.vmem [shape: bf16[1024,128], index: 0, kind: input, shape index: {}]   ;;  %s1588_s1 = inlined_call_operand.vmem [shape: bf16[128,128], index: 1, kind: input, shape index: {}]   ;;  %s1589_s2 = inlined_call_operand.vmem [shape: f32[1,128], index: 2, kind: input, shape index: {}]   ;;  %s1590_s3 = inlined_call_operand.hbm [shape: f32[1024,128], index: 3, kind: output, shape index: {}]  }
   0x1   :  { %10 = vsyncpa [#allocation3 + $0x1], 0  ;;  %s1287_s12 = smov 0   ;;  %s1289_s13 = smov 0  }
   0x2   :  { %s1291_s14 = smov 0   ;;  %s1293_s15 = smov 0  }
   0x3 LB: > { %s1308_s16 = sadd.s32 4294967295, %s1262_s15   ;;  %s929_s17 = sadd.s32 4294967294, %s1262_s15   ;;  %s1262_s15 = sphi %s1293_s15, %s1596_s15   ;;  %s1258_s14 = sphi %s1291_s14, %s1595_s14   ;;  %s1254_s13 = sphi %s1289_s13, %s1594_s13   ;;  %s1250_s12 = sphi %s1287_s12, %s1593_s12  }
   0x4   : > { %s1312_s18 = sadd.s32 1, %s1262_s15   ;;  %s91_s19 = sadd.s32 1, %s1258_s14 }
   0x5   : > { %s88_s20 = ssub.s32 %s1262_s15, %s1312_s18  ;;  %p101_p0 = scmp.ne.s32.totalorder %s1258_s14, %s1254_s13 }
   0x6   : > { %p89_p1 = scmp.eq.s32.totalorder %s88_s20, 0  ;;  %p102_p2 = scmp.eq.s32.totalorder %s1308_s16, 1 }
   0x7   : > { %p107_p3 = scmp.ne.s32.totalorder %s1254_s13, %s1250_s12  ;;  %p108_p4 = scmp.eq.s32.totalorder %s929_s17, 1 }
   0x8   : > { %s1323_s21 = scalar_select %p89_p1, %s1258_s14, %s91_s19  }
   0x9   : > { %p1325_p5 = por %p102_p2, %p101_p0  ;;  %p1329_p6 = por %p108_p4, %p107_p3 }
   0xa   : > { %p932_p7 = scmp.ge.s32.totalorder %s1262_s15, 1  ;;  %p141_p8 = scmp.lt.s32.totalorder %s1262_s15, 3 }
   0xc   : > { %p142_p9 = pnand %p932_p7, %p141_p8 }
   0xd   : > { %v1160_v0 = vld [vmem:[%s1588_s1] sm:$0xff] (!%p142_p9)   ;;  %s934_s26 = sshll.u32 (!%p142_p9), %s1308_s16, 6  ;;  %v1161_v1 = vld [vmem:[%s1588_s1 + $0x8] sm:$0xff] (!%p142_p9)   ;;  %v1162_v2 = vld [vmem:[%s1588_s1 + $0x10] sm:$0xff] (!%p142_p9)   ;;  %s162_s27 = sand.u32 (!%p142_p9), 1, %s1254_s13  }
   0xe   : > { %145 = sbr.rel (%p142_p9) target bundleno = 334 (0x14e), region = 32  ;;  %p166_p10 = scmp.lt.s32.totalorder (!%p142_p9), %s934_s26, 127  ;;  %1023 = vmatprep.subr.bf16.mxu0 (!%p142_p9), %v1160_v0  ;;  %1103 = vmatprep.subr.bf16.mxu1 (!%p142_p9), %v1160_v0  ;;  %v1163_v3 = vld [vmem:[%s1588_s1 + $0x18] sm:$0xff] (!%p142_p9)   ;;  %v1164_v6 = vld [vmem:[%s1588_s1 + $0x20] sm:$0xff] (!%p142_p9)   ;;  %v1165_v7 = vld [vmem:[%s1588_s1 + $0x28] sm:$0xff] (!%p142_p9)  }
   0xf   : > { %1024 = vmatpush3.bf16.msra.mxu0 (!%p142_p9), %v1160_v0  ;;  %1111 = vmatpush3.bf16.msra.mxu1 (!%p142_p9), %v1160_v0  ;;  %v1166_v8 = vld [vmem:[%s1588_s1 + $0x30] sm:$0xff] (!%p142_p9)   ;;  %v1167_v9 = vld [vmem:[%s1588_s1 + $0x38] sm:$0xff] (!%p142_p9)   ;;  %s933_s28 = sshll.u32 (!%p142_p9), %s162_s27, 9  ;;  %v1403_v40 = vld [vmem:[%s1589_s2] ss:$0 sm:$0xff] (!%p142_p9)  ;;  %s982_s5 = sshll.u32 (!%p142_p9), %s1308_s16, 13 }
  0x10   : > { %1025 = vmatprep.subr.bf16.mxu0 (!%p142_p9), %v1161_v1  ;;  %1104 = vmatprep.subr.bf16.mxu1 (!%p142_p9), %v1161_v1  ;;  %s1532_s8 = scalar_lea.hbm (!%p142_p9), %s1590_s3, %s982_s5  ;;  %s1546_s9 = scalar_lea.sflag (!%p142_p9), [#allocation3], %s162_s27 }
  0x11   : > { %s1264_s11 = smov (!%p142_p9), [#allocation2]  }
  0x12   : > { %s1204_s17 = sshll.u32 (!%p142_p9), %s1264_s11, 4  ;;  %s1205_s17 = int_to_ptr.vmem [resolvable:$false] %s1204_s17 }
  0x13   : > { %1026 = vmatpush3.bf16.msra.mxu0 (!%p142_p9), %v1161_v1  ;;  %1112 = vmatpush3.bf16.msra.mxu1 (!%p142_p9), %v1161_v1  ;;  %s1206_s19 = scalar_lea.vmem (!%p142_p9), %s1205_s17, 16384 }
  0x14   : > { %1027 = vmatprep.subr.bf16.mxu0 (!%p142_p9), %v1162_v2  ;;  %1105 = vmatprep.subr.bf16.mxu1 (!%p142_p9), %v1162_v2 }
  0x15   : > { %s1598_s26 = smov (!%p166_p10, %s934_s26), 127 }
  0x16   : > { %s935_s4 = sshll.u32 %s1598_s26, 2 }
  0x17   : > { %s1348_s7 = scalar_lea.vmem %s1587_s0, %s935_s4  ;;  %1028 = vmatpush3.bf16.msra.mxu0 %v1162_v2  ;;  %1113 = vmatpush3.bf16.msra.mxu1 %v1162_v2  ;;  %s1409_s4 = scalar_lea.vmem [#allocation2], %s933_s28 }
  0x18   : > { %v1168_v4 = vld [vmem:[%s1348_s7] sm:$0xff]   ;;  %1029 = vmatprep.subr.bf16.mxu0 %v1163_v3  ;;  %1106 = vmatprep.subr.bf16.mxu1 %v1163_v3  ;;  %v1170_v10 = vld [vmem:[%s1348_s7 + $0x8] sm:$0xff]   ;;  %v1172_v12 = vld [vmem:[%s1348_s7 + $0x10] sm:$0xff]   ;;  %s867_s6 = sshll.u32 %s1409_s4, 4  ;;  %s1534_s6 = int_to_ptr.vmem [resolvable:$true] %s867_s6 }
  0x19   : > { %v1169_v5 = vld [vmem:[%s1348_s7 + $0x80] sm:$0xff]   ;;  %1039 = vmatprep.mubr.bf16.mxu0 %v1168_v4  ;;  %v1171_v11 = vld [vmem:[%s1348_s7 + $0x88] sm:$0xff]   ;;  %v1173_v13 = vld [vmem:[%s1348_s7 + $0x90] sm:$0xff]   ;;  %s1200_s10 = scalar_lea.vmem %s1534_s6, 8192  ;;  %p1207_p0 = scmp.lt.s32.totalorder %s1534_s6, %s1205_s17 }
  0x1a   : > { %1071 = vmatprep.mubr.bf16.mxu1 %v1169_v5  ;;  %v1174_v14 = vld [vmem:[%s1348_s7 + $0x18] sm:$0xff]   ;;  %v1176_v16 = vld [vmem:[%s1348_s7 + $0x20] sm:$0xff]   ;;  %v1178_v18 = vld [vmem:[%s1348_s7 + $0x28] sm:$0xff]   ;;  %p1201_p11 = scmp.ne.s32.totalorder %s1534_s6, %s1200_s10  ;;  %p1208_p1 = scmp.lt.s32.totalorder %s1206_s19, %s1200_s10 }
  0x1b   : > { %1030 = vmatpush3.bf16.msra.mxu0 %v1163_v3  ;;  %1114 = vmatpush3.bf16.msra.mxu1 %v1163_v3  ;;  %v1175_v15 = vld [vmem:[%s1348_s7 + $0x98] sm:$0xff]   ;;  %v1177_v17 = vld [vmem:[%s1348_s7 + $0xa0] sm:$0xff]   ;;  %v1179_v19 = vld [vmem:[%s1348_s7 + $0xa8] sm:$0xff]  }
  0x1c   : > { %1031 = vmatprep.subr.bf16.mxu0 %v1164_v6  ;;  %1107 = vmatprep.subr.bf16.mxu1 %v1164_v6  ;;  %v1180_v20 = vld [vmem:[%s1348_s7 + $0x30] sm:$0xff]   ;;  %v1182_v22 = vld [vmem:[%s1348_s7 + $0x38] sm:$0xff]   ;;  %v1184_v24 = vld [vmem:[%s1348_s7 + $0x40] sm:$0xff]   ;;  %p1202_p12 = pnand %p1201_p11, %p1325_p5  ;;  %p1209_p2 = por %p1208_p1, %p1207_p0 }
  0x1d   : > { %v1181_v21 = vld [vmem:[%s1348_s7 + $0xb0] sm:$0xff]   ;;  %v1183_v23 = vld [vmem:[%s1348_s7 + $0xb8] sm:$0xff]   ;;  %v1185_v25 = vld [vmem:[%s1348_s7 + $0xc0] sm:$0xff]  }
  0x1e   : > { %v1186_v26 = vld [vmem:[%s1348_s7 + $0x48] sm:$0xff]   ;;  %v1188_v28 = vld [vmem:[%s1348_s7 + $0x50] sm:$0xff]   ;;  %v1190_v30 = vld [vmem:[%s1348_s7 + $0x58] sm:$0xff]   ;;  %p1203_p13 = pneg %p1202_p12 }
  0x1f   : > { %1032 = vmatpush3.bf16.msra.mxu0 %v1164_v6  ;;  %1115 = vmatpush3.bf16.msra.mxu1 %v1164_v6  ;;  %v1187_v27 = vld [vmem:[%s1348_s7 + $0xc8] sm:$0xff]   ;;  %v1189_v29 = vld [vmem:[%s1348_s7 + $0xd0] sm:$0xff]   ;;  %v1191_v31 = vld [vmem:[%s1348_s7 + $0xd8] sm:$0xff]  }
  0x20   : > { %1033 = vmatprep.subr.bf16.mxu0 %v1165_v7  ;;  %1108 = vmatprep.subr.bf16.mxu1 %v1165_v7  ;;  %v1192_v32 = vld [vmem:[%s1348_s7 + $0x60] sm:$0xff]   ;;  %v1194_v34 = vld [vmem:[%s1348_s7 + $0x68] sm:$0xff]   ;;  %v1196_v36 = vld [vmem:[%s1348_s7 + $0x70] sm:$0xff]   ;;  %p1210_p3 = pnand %p1209_p2, %p1203_p13 }
  0x21   : > { %v1193_v33 = vld [vmem:[%s1348_s7 + $0xe0] sm:$0xff]   ;;  %v1195_v35 = vld [vmem:[%s1348_s7 + $0xe8] sm:$0xff]   ;;  %v1197_v37 = vld [vmem:[%s1348_s7 + $0xf0] sm:$0xff]  }
  0x22   : > { %v1198_v38 = vld [vmem:[%s1348_s7 + $0x78] sm:$0xff]  }
  0x23   : > { %1034 = vmatpush3.bf16.msra.mxu0 %v1165_v7  ;;  %1116 = vmatpush3.bf16.msra.mxu1 %v1165_v7  ;;  %v1199_v39 = vld [vmem:[%s1348_s7 + $0xf8] sm:$0xff]  }
  0x24   : > { %1035 = vmatprep.subr.bf16.mxu0 %v1166_v8  ;;  %1109 = vmatprep.subr.bf16.mxu1 %v1166_v8 }
  0x27   : > { %1036 = vmatpush3.bf16.msra.mxu0 %v1166_v8  ;;  %1117 = vmatpush3.bf16.msra.mxu1 %v1166_v8 }
  0x28   : > { %1037 = vmatprep.subr.bf16.mxu0 %v1167_v9  ;;  %1110 = vmatprep.subr.bf16.mxu1 %v1167_v9 }
  0x2b   : > { %1038 = vmatpush3.bf16.msra.mxu0 %v1167_v9  ;;  %1118 = vmatpush3.bf16.msra.mxu1 %v1167_v9 }
  0x2e   : > { %1040 = vmatmul.mubr.bf16.vlgmr.msra.gmra.mrb[0].mxu0 %v1170_v10  ;;  %1072 = vmatmul.mubr.bf16.vlgmr.msra.gmra.mrb[0].mxu1 %v1171_v11 }
  0x2f   : > { %1043 = vmatprep.mubr.bf16.mxu0 %v1172_v12  ;;  %1075 = vmatprep.mubr.bf16.mxu1 %v1173_v13 }
  0x36   : > { %1044 = vmatmul.mubr.bf16.gmra.mrb[4].mxu0 %v1174_v14  ;;  %1076 = vmatmul.mubr.bf16.gmra.mrb[4].mxu1 %v1175_v15 }
  0x37   : > { %1047 = vmatprep.mubr.bf16.mxu0 %v1176_v16  ;;  %1079 = vmatprep.mubr.bf16.mxu1 %v1177_v17 }
  0x3e   : > { %1048 = vmatmul.mubr.bf16.gmra.mrb[8].mxu0 %v1178_v18  ;;  %1080 = vmatmul.mubr.bf16.gmra.mrb[8].mxu1 %v1179_v19 }
  0x3f   : > { %1051 = vmatprep.mubr.bf16.mxu0 %v1180_v20  ;;  %1083 = vmatprep.mubr.bf16.mxu1 %v1181_v21 }
  0x46   : > { %1052 = vmatmul.mubr.bf16.gmra.mrb[12].mxu0 %v1182_v22  ;;  %1084 = vmatmul.mubr.bf16.gmra.mrb[12].mxu1 %v1183_v23 }
  0x47   : > { %1055 = vmatprep.mubr.bf16.mxu0 %v1184_v24  ;;  %1087 = vmatprep.mubr.bf16.mxu1 %v1185_v25 }
  0x4e   : > { %1056 = vmatmul.mubr.bf16.gmra.mrb[16].mxu0 %v1186_v26  ;;  %1088 = vmatmul.mubr.bf16.gmra.mrb[16].mxu1 %v1187_v27 }
  0x4f   : > { %1059 = vmatprep.mubr.bf16.mxu0 %v1188_v28  ;;  %1091 = vmatprep.mubr.bf16.mxu1 %v1189_v29 }
  0x56   : > { %1060 = vmatmul.mubr.bf16.gmra.mrb[20].mxu0 %v1190_v30  ;;  %1092 = vmatmul.mubr.bf16.gmra.mrb[20].mxu1 %v1191_v31 }
  0x57   : > { %1063 = vmatprep.mubr.bf16.mxu0 %v1192_v32  ;;  %1095 = vmatprep.mubr.bf16.mxu1 %v1193_v33 }
  0x5e   : > { %1064 = vmatmul.mubr.bf16.gmra.mrb[24].mxu0 %v1194_v34  ;;  %1096 = vmatmul.mubr.bf16.gmra.mrb[24].mxu1 %v1195_v35 }
  0x5f   : > { %1067 = vmatprep.mubr.bf16.mxu0 %v1196_v36  ;;  %1099 = vmatprep.mubr.bf16.mxu1 %v1197_v37 }
  0x66   : > { %1068 = vmatmul.mubr.bf16.gmra.mrb[28].mxu0 %v1198_v38  ;;  %1100 = vmatmul.mubr.bf16.gmra.mrb[28].mxu1 %v1199_v39 }
 0x101   : > { %v1041_v41 = vpop.f32.mrb[0].mxu0  ;;  %v1073_v42 = vpop.f32.mrb[0].mxu1 }
 0x102   : > { %v543_v43 = vadd.f32 %v1041_v41, %v1403_v40  ;;  %v671_v44 = vadd.f32 %v1073_v42, %v1403_v40  ;;  %v534_v45 = vpop.f32.mrb[1].mxu0  ;;  %v662_v46 = vpop.f32.mrb[1].mxu1 }
 0x103   : > { %v535_v47 = vadd.f32 %v1403_v40, %v534_v45  ;;  %v663_v48 = vadd.f32 %v1403_v40, %v662_v46  ;;  %v1042_v49 = vpop.f32.mrb[2].mxu0  ;;  %v1074_v50 = vpop.f32.mrb[2].mxu1 }
 0x104   : > { %791 = vst [vmem:[%s1409_s4 + $0x10] sm:$0xff] %v543_v43  ;;  %823 = vst [vmem:[%s1409_s4 + $0x110] sm:$0xff] %v671_v44  ;;  %v546_v51 = vadd.f32 %v1042_v49, %v1403_v40  ;;  %v674_v52 = vadd.f32 %v1074_v50, %v1403_v40  ;;  %v537_v53 = vpop.f32.mrb[3].mxu0  ;;  %v665_v54 = vpop.f32.mrb[3].mxu1 }
 0x105   : > { %789 = vst [vmem:[%s1409_s4] sm:$0xff] %v535_v47  ;;  %821 = vst [vmem:[%s1409_s4 + $0x100] sm:$0xff] %v663_v48  ;;  %v538_v55 = vadd.f32 %v1403_v40, %v537_v53  ;;  %v666_v56 = vadd.f32 %v1403_v40, %v665_v54 }
 0x106   : > { %792 = vst [vmem:[%s1409_s4 + $0x18] sm:$0xff] %v546_v51  ;;  %824 = vst [vmem:[%s1409_s4 + $0x118] sm:$0xff] %v674_v52 }
 0x107   : > { %790 = vst [vmem:[%s1409_s4 + $0x8] sm:$0xff] %v538_v55  ;;  %822 = vst [vmem:[%s1409_s4 + $0x108] sm:$0xff] %v666_v56 }
 0x109   : > { %v1045_v57 = vpop.f32.mrb[4].mxu0  ;;  %v1077_v58 = vpop.f32.mrb[4].mxu1 }
 0x10a   : > { %v559_v59 = vadd.f32 %v1045_v57, %v1403_v40  ;;  %v687_v60 = vadd.f32 %v1077_v58, %v1403_v40  ;;  %v550_v61 = vpop.f32.mrb[5].mxu0  ;;  %v678_v62 = vpop.f32.mrb[5].mxu1 }
 0x10b   : > { %v551_v63 = vadd.f32 %v1403_v40, %v550_v61  ;;  %v679_v0 = vadd.f32 %v1403_v40, %v678_v62  ;;  %v1046_v1 = vpop.f32.mrb[6].mxu0  ;;  %v1078_v2 = vpop.f32.mrb[6].mxu1 }
 0x10c   : > { %795 = vst [vmem:[%s1409_s4 + $0x30] sm:$0xff] %v559_v59  ;;  %827 = vst [vmem:[%s1409_s4 + $0x130] sm:$0xff] %v687_v60  ;;  %v562_v3 = vadd.f32 %v1046_v1, %v1403_v40  ;;  %v690_v4 = vadd.f32 %v1078_v2, %v1403_v40  ;;  %v553_v5 = vpop.f32.mrb[7].mxu0  ;;  %v681_v6 = vpop.f32.mrb[7].mxu1 }
 0x10d   : > { %793 = vst [vmem:[%s1409_s4 + $0x20] sm:$0xff] %v551_v63  ;;  %825 = vst [vmem:[%s1409_s4 + $0x120] sm:$0xff] %v679_v0  ;;  %v554_v7 = vadd.f32 %v1403_v40, %v553_v5  ;;  %v682_v8 = vadd.f32 %v1403_v40, %v681_v6 }
 0x10e   : > { %796 = vst [vmem:[%s1409_s4 + $0x38] sm:$0xff] %v562_v3  ;;  %828 = vst [vmem:[%s1409_s4 + $0x138] sm:$0xff] %v690_v4 }
 0x10f   : > { %794 = vst [vmem:[%s1409_s4 + $0x28] sm:$0xff] %v554_v7  ;;  %826 = vst [vmem:[%s1409_s4 + $0x128] sm:$0xff] %v682_v8 }
 0x111   : > { %v1049_v9 = vpop.f32.mrb[8].mxu0  ;;  %v1081_v10 = vpop.f32.mrb[8].mxu1 }
 0x112   : > { %v575_v11 = vadd.f32 %v1049_v9, %v1403_v40  ;;  %v703_v12 = vadd.f32 %v1081_v10, %v1403_v40  ;;  %v566_v13 = vpop.f32.mrb[9].mxu0  ;;  %v694_v14 = vpop.f32.mrb[9].mxu1 }
 0x113   : > { %v567_v15 = vadd.f32 %v1403_v40, %v566_v13  ;;  %v695_v16 = vadd.f32 %v1403_v40, %v694_v14  ;;  %v1050_v17 = vpop.f32.mrb[10].mxu0  ;;  %v1082_v18 = vpop.f32.mrb[10].mxu1 }
 0x114   : > { %799 = vst [vmem:[%s1409_s4 + $0x50] sm:$0xff] %v575_v11  ;;  %831 = vst [vmem:[%s1409_s4 + $0x150] sm:$0xff] %v703_v12  ;;  %v578_v19 = vadd.f32 %v1050_v17, %v1403_v40  ;;  %v706_v20 = vadd.f32 %v1082_v18, %v1403_v40  ;;  %v569_v21 = vpop.f32.mrb[11].mxu0  ;;  %v697_v22 = vpop.f32.mrb[11].mxu1 }
 0x115   : > { %797 = vst [vmem:[%s1409_s4 + $0x40] sm:$0xff] %v567_v15  ;;  %829 = vst [vmem:[%s1409_s4 + $0x140] sm:$0xff] %v695_v16  ;;  %v570_v23 = vadd.f32 %v1403_v40, %v569_v21  ;;  %v698_v24 = vadd.f32 %v1403_v40, %v697_v22 }
 0x116   : > { %800 = vst [vmem:[%s1409_s4 + $0x58] sm:$0xff] %v578_v19  ;;  %832 = vst [vmem:[%s1409_s4 + $0x158] sm:$0xff] %v706_v20 }
 0x117   : > { %798 = vst [vmem:[%s1409_s4 + $0x48] sm:$0xff] %v570_v23  ;;  %830 = vst [vmem:[%s1409_s4 + $0x148] sm:$0xff] %v698_v24 }
 0x119   : > { %v1053_v25 = vpop.f32.mrb[12].mxu0  ;;  %v1085_v26 = vpop.f32.mrb[12].mxu1 }
 0x11a   : > { %v591_v27 = vadd.f32 %v1053_v25, %v1403_v40  ;;  %v719_v28 = vadd.f32 %v1085_v26, %v1403_v40  ;;  %v582_v29 = vpop.f32.mrb[13].mxu0  ;;  %v710_v30 = vpop.f32.mrb[13].mxu1 }
 0x11b   : > { %v583_v31 = vadd.f32 %v1403_v40, %v582_v29  ;;  %v711_v32 = vadd.f32 %v1403_v40, %v710_v30  ;;  %v1054_v33 = vpop.f32.mrb[14].mxu0  ;;  %v1086_v34 = vpop.f32.mrb[14].mxu1 }
 0x11c   : > { %803 = vst [vmem:[%s1409_s4 + $0x70] sm:$0xff] %v591_v27  ;;  %835 = vst [vmem:[%s1409_s4 + $0x170] sm:$0xff] %v719_v28  ;;  %v594_v35 = vadd.f32 %v1054_v33, %v1403_v40  ;;  %v722_v36 = vadd.f32 %v1086_v34, %v1403_v40  ;;  %v585_v37 = vpop.f32.mrb[15].mxu0  ;;  %v713_v38 = vpop.f32.mrb[15].mxu1 }
 0x11d   : > { %801 = vst [vmem:[%s1409_s4 + $0x60] sm:$0xff] %v583_v31  ;;  %833 = vst [vmem:[%s1409_s4 + $0x160] sm:$0xff] %v711_v32  ;;  %v586_v39 = vadd.f32 %v1403_v40, %v585_v37  ;;  %v714_v41 = vadd.f32 %v1403_v40, %v713_v38 }
 0x11e   : > { %804 = vst [vmem:[%s1409_s4 + $0x78] sm:$0xff] %v594_v35  ;;  %836 = vst [vmem:[%s1409_s4 + $0x178] sm:$0xff] %v722_v36 }
 0x11f   : > { %802 = vst [vmem:[%s1409_s4 + $0x68] sm:$0xff] %v586_v39  ;;  %834 = vst [vmem:[%s1409_s4 + $0x168] sm:$0xff] %v714_v41 }
 0x121   : > { %v1057_v42 = vpop.f32.mrb[16].mxu0  ;;  %v1089_v43 = vpop.f32.mrb[16].mxu1 }
 0x122   : > { %v607_v44 = vadd.f32 %v1057_v42, %v1403_v40  ;;  %v735_v45 = vadd.f32 %v1089_v43, %v1403_v40  ;;  %v598_v46 = vpop.f32.mrb[17].mxu0  ;;  %v726_v47 = vpop.f32.mrb[17].mxu1 }
 0x123   : > { %v599_v48 = vadd.f32 %v1403_v40, %v598_v46  ;;  %v727_v49 = vadd.f32 %v1403_v40, %v726_v47  ;;  %v1058_v50 = vpop.f32.mrb[18].mxu0  ;;  %v1090_v51 = vpop.f32.mrb[18].mxu1 }
 0x124   : > { %807 = vst [vmem:[%s1409_s4 + $0x90] sm:$0xff] %v607_v44  ;;  %839 = vst [vmem:[%s1409_s4 + $0x190] sm:$0xff] %v735_v45  ;;  %v610_v52 = vadd.f32 %v1058_v50, %v1403_v40  ;;  %v738_v53 = vadd.f32 %v1090_v51, %v1403_v40  ;;  %v601_v54 = vpop.f32.mrb[19].mxu0  ;;  %v729_v55 = vpop.f32.mrb[19].mxu1 }
 0x125   : > { %805 = vst [vmem:[%s1409_s4 + $0x80] sm:$0xff] %v599_v48  ;;  %837 = vst [vmem:[%s1409_s4 + $0x180] sm:$0xff] %v727_v49  ;;  %v602_v56 = vadd.f32 %v1403_v40, %v601_v54  ;;  %v730_v57 = vadd.f32 %v1403_v40, %v729_v55 }
 0x126   : > { %808 = vst [vmem:[%s1409_s4 + $0x98] sm:$0xff] %v610_v52  ;;  %840 = vst [vmem:[%s1409_s4 + $0x198] sm:$0xff] %v738_v53 }
 0x127   : > { %806 = vst [vmem:[%s1409_s4 + $0x88] sm:$0xff] %v602_v56  ;;  %838 = vst [vmem:[%s1409_s4 + $0x188] sm:$0xff] %v730_v57 }
 0x129   : > { %v1061_v58 = vpop.f32.mrb[20].mxu0  ;;  %v1093_v59 = vpop.f32.mrb[20].mxu1 }
 0x12a   : > { %v623_v60 = vadd.f32 %v1061_v58, %v1403_v40  ;;  %v751_v61 = vadd.f32 %v1093_v59, %v1403_v40  ;;  %v614_v62 = vpop.f32.mrb[21].mxu0  ;;  %v742_v63 = vpop.f32.mrb[21].mxu1 }
 0x12b   : > { %v615_v0 = vadd.f32 %v1403_v40, %v614_v62  ;;  %v743_v1 = vadd.f32 %v1403_v40, %v742_v63  ;;  %v1062_v2 = vpop.f32.mrb[22].mxu0  ;;  %v1094_v3 = vpop.f32.mrb[22].mxu1 }
 0x12c   : > { %811 = vst [vmem:[%s1409_s4 + $0xb0] sm:$0xff] %v623_v60  ;;  %843 = vst [vmem:[%s1409_s4 + $0x1b0] sm:$0xff] %v751_v61  ;;  %v626_v4 = vadd.f32 %v1062_v2, %v1403_v40  ;;  %v754_v5 = vadd.f32 %v1094_v3, %v1403_v40  ;;  %v617_v6 = vpop.f32.mrb[23].mxu0  ;;  %v745_v7 = vpop.f32.mrb[23].mxu1 }
 0x12d   : > { %809 = vst [vmem:[%s1409_s4 + $0xa0] sm:$0xff] %v615_v0  ;;  %841 = vst [vmem:[%s1409_s4 + $0x1a0] sm:$0xff] %v743_v1  ;;  %v618_v8 = vadd.f32 %v1403_v40, %v617_v6  ;;  %v746_v9 = vadd.f32 %v1403_v40, %v745_v7 }
 0x12e   : > { %812 = vst [vmem:[%s1409_s4 + $0xb8] sm:$0xff] %v626_v4  ;;  %844 = vst [vmem:[%s1409_s4 + $0x1b8] sm:$0xff] %v754_v5 }
 0x12f   : > { %810 = vst [vmem:[%s1409_s4 + $0xa8] sm:$0xff] %v618_v8  ;;  %842 = vst [vmem:[%s1409_s4 + $0x1a8] sm:$0xff] %v746_v9 }
 0x131   : > { %v1065_v10 = vpop.f32.mrb[24].mxu0  ;;  %v1097_v11 = vpop.f32.mrb[24].mxu1 }
 0x132   : > { %v639_v12 = vadd.f32 %v1065_v10, %v1403_v40  ;;  %v767_v13 = vadd.f32 %v1097_v11, %v1403_v40  ;;  %v630_v14 = vpop.f32.mrb[25].mxu0  ;;  %v758_v15 = vpop.f32.mrb[25].mxu1 }
 0x133   : > { %v631_v16 = vadd.f32 %v1403_v40, %v630_v14  ;;  %v759_v17 = vadd.f32 %v1403_v40, %v758_v15  ;;  %v1066_v18 = vpop.f32.mrb[26].mxu0  ;;  %v1098_v19 = vpop.f32.mrb[26].mxu1 }
 0x134   : > { %815 = vst [vmem:[%s1409_s4 + $0xd0] sm:$0xff] %v639_v12  ;;  %847 = vst [vmem:[%s1409_s4 + $0x1d0] sm:$0xff] %v767_v13  ;;  %v642_v20 = vadd.f32 %v1066_v18, %v1403_v40  ;;  %v770_v21 = vadd.f32 %v1098_v19, %v1403_v40  ;;  %v633_v22 = vpop.f32.mrb[27].mxu0  ;;  %v761_v23 = vpop.f32.mrb[27].mxu1 }
 0x135   : > { %813 = vst [vmem:[%s1409_s4 + $0xc0] sm:$0xff] %v631_v16  ;;  %845 = vst [vmem:[%s1409_s4 + $0x1c0] sm:$0xff] %v759_v17  ;;  %v634_v24 = vadd.f32 %v1403_v40, %v633_v22  ;;  %v762_v25 = vadd.f32 %v1403_v40, %v761_v23 }
 0x136   : > { %816 = vst [vmem:[%s1409_s4 + $0xd8] sm:$0xff] %v642_v20  ;;  %848 = vst [vmem:[%s1409_s4 + $0x1d8] sm:$0xff] %v770_v21 }
 0x137   : > { %814 = vst [vmem:[%s1409_s4 + $0xc8] sm:$0xff] %v634_v24  ;;  %846 = vst [vmem:[%s1409_s4 + $0x1c8] sm:$0xff] %v762_v25 }
 0x139   : > { %v1069_v26 = vpop.f32.mrb[28].mxu0  ;;  %v1101_v27 = vpop.f32.mrb[28].mxu1 }
 0x13a   : > { %v655_v28 = vadd.f32 %v1069_v26, %v1403_v40  ;;  %v783_v29 = vadd.f32 %v1101_v27, %v1403_v40  ;;  %v646_v30 = vpop.f32.mrb[29].mxu0  ;;  %v774_v31 = vpop.f32.mrb[29].mxu1 }
 0x13b   : > { %v647_v32 = vadd.f32 %v1403_v40, %v646_v30  ;;  %v775_v33 = vadd.f32 %v1403_v40, %v774_v31  ;;  %v1070_v34 = vpop.f32.mrb[30].mxu0  ;;  %v1102_v35 = vpop.f32.mrb[30].mxu1 }
 0x13c   : > { %819 = vst [vmem:[%s1409_s4 + $0xf0] sm:$0xff] %v655_v28  ;;  %851 = vst [vmem:[%s1409_s4 + $0x1f0] sm:$0xff] %v783_v29  ;;  %v658_v36 = vadd.f32 %v1070_v34, %v1403_v40  ;;  %v786_v37 = vadd.f32 %v1102_v35, %v1403_v40  ;;  %v649_v38 = vpop.f32.mrb[31].mxu0  ;;  %v777_v39 = vpop.f32.mrb[31].mxu1 }
 0x13d   : > { %817 = vst [vmem:[%s1409_s4 + $0xe0] sm:$0xff] %v647_v32  ;;  %849 = vst [vmem:[%s1409_s4 + $0x1e0] sm:$0xff] %v775_v33  ;;  %v650_v41 = vadd.f32 %v1403_v40, %v649_v38  ;;  %v778_v42 = vadd.f32 %v1403_v40, %v777_v39 }
 0x13e   : > { %820 = vst [vmem:[%s1409_s4 + $0xf8] sm:$0xff] %v658_v36  ;;  %852 = vst [vmem:[%s1409_s4 + $0x1f8] sm:$0xff] %v786_v37 }
 0x13f   : > { %818 = vst [vmem:[%s1409_s4 + $0xe8] sm:$0xff] %v650_v41  ;;  %850 = vst [vmem:[%s1409_s4 + $0x1e8] sm:$0xff] %v778_v42 }
 0x140   : > { %1213 = shalt.err (!%p1210_p3)
}
 0x141   : > { %s1214_s20 = scalar_lea.hbm %s1532_s8, 8192  ;;  %s1218_s26 = scalar_lea.hbm %s1590_s3, 16384 }
 0x142   : > { %p1215_p4 = scmp.ne.s32.totalorder %s1532_s8, %s1214_s20  ;;  %p1219_p9 = scmp.lt.u32.totalorder %s1532_s8, %s1590_s3 }
 0x143   : > { %p1220_p10 = scmp.lt.u32.totalorder %s1218_s26, %s1214_s20  ;;  %p1222_p12 = scmp.lt.u32.totalorder %s1214_s20, %s1532_s8 }
 0x144   : > { %p1216_p7 = pnand %p1215_p4, %p1325_p5 }
 0x145   : > { %p1221_p11 = por %p1220_p10, %p1219_p9 }
 0x146   : > { %p1217_p8 = pneg %p1216_p7 }
 0x147   : > { %p1223_p13 = por %p1222_p12, %p1221_p11 }
 0x149   : > { %p1224_p0 = pnand %p1223_p13, %p1217_p8 }
 0x14b   : > { %1227 = shalt.err (!%p1224_p0)
}
 0x14c   : > { %s1265_s29 = smov 128   ;;  %s1266_s30 = smov 8  }
 0x14d   : > { %1119 = dma.vmem_to_hbm [thread:$0]  (%p1325_p5), %s1534_s6, 8192, %s1532_s8, %s1546_s9, %s1265_s29, %s1265_s29, %s1266_s30  }
 0x14e PF: > { %p1125_p1 = scmp.ge.s32.totalorder %s1262_s15, 2  ;;  %s882_s4 = sand.u32 1, %s1250_s12  }
 0x14f   : > { %s883_s5 = scalar_lea.sflag [#allocation3], %s882_s4 }
 0x150   : > { %p1122_p2 = pnand %p1125_p1, %p1329_p6 }
 0x152   : > { %1245 = dma.done.wait (!%p1122_p2), %s883_s5, 8192  }
 0x153   : > { %1247 = vsyncadd (!%p1122_p2), %s883_s5, 4294959104  ;;  %p13_p3 = scmp.ge.s32.totalorder %s1312_s18, 4   ;;  %s1593_s12 = smov %s1254_s13 }
 0x154   : > { %s1594_s13 = smov %s1258_s14  ;;  %s1595_s14 = smov %s1323_s21 }
 0x155   : > { %s1596_s15 = smov %s1312_s18  ;;  %15 = sbr.rel (!%p13_p3) target bundleno = 3 (0x3), region = 67 }
 0x15c   :  { %888 = vsyncpa [#allocation3], 1 }
 0x15d   :  { %890 = vsyncpa [#allocation3 + $0x1], 1 }

</bundles_post_ra>
